<compile_context>
chip_gen: v7x
topology: tpu7x:2x2x1
jax: 0.10.0
libtpu: 0.0.40
codegen_flags: <defaults>
</compile_context>

<pallas_src>
import functools

import jax
import jax.numpy as jnp
import numpy as np
from jax.experimental import pallas as pl
from jax.experimental.pallas import tpu as pltpu


# ----------------------------- tiling constants -----------------------------
TM_CONV = 1024             # max row tile for the conv (im2col) matmuls
TM_FC = 256                # max row tile for the fused fc head
FC1_K = 64 * 7 * 7         # 3136 (full-K head; w1 is VMEM resident)
VMEM_LIMIT = 32 * 1024 * 1024


def _round_up(x, m):
    return ((x + m - 1) // m) * m


def _row_tile(M, tm_max):
    """Largest row tile <= tm_max that is a multiple of 8, capped near M/2 so
    there are >= 2 parallel M tiles whenever M > 8 (keeps both v7x TCs busy;
    harmless on single-TC v5e/v6e)."""
    if M <= 8:
        return M                              # tiny M: one full-extent block
    return max(8, min(tm_max, _round_up((M + 1) // 2, 8)))


# ---------------------------------------------------------------------------
# Kernel 1: conv-as-matmul  y = relu(x @ w + b)
#           x: bf16 patches, w: bf16, f32 MXU accumulation, bf16 output.
# ---------------------------------------------------------------------------
def _mm_bias_relu_kernel(x_ref, w_ref, b_ref, o_ref):
    acc = jnp.dot(x_ref[...], w_ref[...], preferred_element_type=jnp.float32)
    acc = jnp.maximum(acc + b_ref[...], 0.0)
    o_ref[...] = acc.astype(o_ref.dtype)


def matmul_bias_relu(x, w, b, *, tm_max=TM_CONV):
    """x:(M,K) bf16, w:(K,N) bf16, b:(1,N) f32 -> (M,N) bf16."""
    M, K = x.shape
    N = w.shape[1]
    tm = _row_tile(M, tm_max)
    return pl.pallas_call(
        _mm_bias_relu_kernel,
        out_shape=jax.ShapeDtypeStruct((M, N), jnp.bfloat16),
        grid=(pl.cdiv(M, tm),),               # trailing partial tile is masked
        in_specs=[
            pl.BlockSpec((tm, K), lambda i: (i, 0)),
            pl.BlockSpec((K, N), lambda i: (0, 0)),
            pl.BlockSpec((1, N), lambda i: (0, 0)),
        ],
        out_specs=pl.BlockSpec((tm, N), lambda i: (i, 0)),
        compiler_params=pltpu.CompilerParams(
            dimension_semantics=("parallel",),
            vmem_limit_bytes=VMEM_LIMIT),
    )(x, w, b)


# ---------------------------------------------------------------------------
# Kernel 2: fused head  q = relu(x @ W1 + b1) @ W2 + b2
#           Single full-K block (w1 = 3.2 MiB bf16 stays resident in VMEM),
#           grid over row tiles only.  W2/b2 are pre-padded to 128 lanes.
# ---------------------------------------------------------------------------
def _head_kernel(x_ref, w1_ref, b1_ref, w2_ref, b2_ref, o_ref):
    h = jnp.dot(x_ref[...], w1_ref[...], preferred_element_type=jnp.float32)
    h = jnp.maximum(h + b1_ref[...], 0.0)
    q = jnp.dot(h.astype(jnp.bfloat16), w2_ref[...],
                preferred_element_type=jnp.float32)
    o_ref[...] = (q + b2_ref[...]).astype(o_ref.dtype)


def fused_head(x, w1, b1, w2, b2, *, tm_max=TM_FC):
    """x:(M,3136) bf16, w1:(3136,512) bf16, w2:(512,128) bf16 -> (M,128) f32."""
    M, K = x.shape
    H = w1.shape[1]
    Np = w2.shape[1]                          # 128 (lane-dense output)
    tm = _row_tile(M, tm_max)
    return pl.pallas_call(
        _head_kernel,
        out_shape=jax.ShapeDtypeStruct((M, Np), jnp.float32),
        grid=(pl.cdiv(M, tm),),
        in_specs=[
            pl.BlockSpec((tm, K), lambda i: (i, 0)),
            pl.BlockSpec((K, H), lambda i: (0, 0)),
            pl.BlockSpec((1, H), lambda i: (0, 0)),
            pl.BlockSpec((H, Np), lambda i: (0, 0)),
            pl.BlockSpec((1, Np), lambda i: (0, 0)),
        ],
        out_specs=pl.BlockSpec((tm, Np), lambda i: (i, 0)),
        compiler_params=pltpu.CompilerParams(
            dimension_semantics=("parallel",),
            vmem_limit_bytes=VMEM_LIMIT),
    )(x, w1, b1, w2, b2)


# ---------------------------------------------------------------------------
# Conv2d = one patch-extraction op (XLA glue, bf16) + one Pallas matmul kernel.
# conv_general_dilated_patches feature order is c*kh*kw + i*kw + j, which
# matches the PyTorch (O, C, kh, kw).reshape(O, -1) weight layout.
# ---------------------------------------------------------------------------
def conv2d_pallas(x_nhwc, wmat, b, *, ksize, stride):
    B = x_nhwc.shape[0]
    patches = jax.lax.conv_general_dilated_patches(
        x_nhwc, (ksize, ksize), (stride, stride), "VALID",
        dimension_numbers=("NHWC", "HWIO", "NHWC"))
    _, OH, OW, K = patches.shape
    y = matmul_bias_relu(patches.reshape(B * OH * OW, K), wmat, b)
    return y.reshape(B, OH, OW, -1)           # stays NHWC, bf16


# ---------------------------------------------------------------------------
# Parameters: raw PyTorch layouts -> one-time kernel-ready layouts
# ---------------------------------------------------------------------------
def init_params(key, input_channels, num_actions):
    """Raw parameters in PyTorch layouts (Conv: (O,C,kh,kw), Linear: (out,in))."""
    ks = jax.random.split(key, 10)

    def w_init(k, shape, fan_in):
        return jax.random.normal(k, shape, jnp.float32) / jnp.sqrt(float(fan_in))

    def b_init(k, shape):
        return 0.01 * jax.random.normal(k, shape, jnp.float32)

    return {
        "c1_w": w_init(ks[0], (32, input_channels, 8, 8), input_channels * 64),
        "c1_b": b_init(ks[1], (32,)),
        "c2_w": w_init(ks[2], (64, 32, 4, 4), 32 * 16),
        "c2_b": b_init(ks[3], (64,)),
        "c3_w": w_init(ks[4], (64, 64, 3, 3), 64 * 9),
        "c3_b": b_init(ks[5], (64,)),
        "fc1_w": w_init(ks[6], (512, FC1_K), FC1_K),
        "fc1_b": b_init(ks[7], (512,)),
        "fc2_w": w_init(ks[8], (num_actions, 512), 512),
        "fc2_b": b_init(ks[9], (num_actions,)),
    }


def prepare_params(raw, num_actions):
    """One-time layout work: (K,O) conv mats (1/255 folded into conv1),
    NHWC-ordered fc1, fc2 padded to 128 lanes, everything cast to bf16."""
    def conv_w(w, scale=1.0):                 # (O,C,kh,kw) -> (C*kh*kw, O)
        w = w * scale                         # fold scale in f32, then cast
        return jnp.transpose(w.reshape(w.shape[0], -1)).astype(jnp.bfloat16)

    def bias(b):
        return b.reshape(1, -1).astype(jnp.float32)

    # fc1 input order in PyTorch is the NCHW flatten (C=64,H=7,W=7); our conv
    # activations are NHWC, so permute to (H,W,C) once.  No K padding (full-K
    # head kernel).
    w1 = raw["fc1_w"].reshape(512, 64, 7, 7).transpose(2, 3, 1, 0)
    w1 = w1.reshape(FC1_K, 512)

    # fc2: transpose to (512, A) and zero-pad the output lanes to 128.
    n_pad = max(128, _round_up(num_actions, 128))
    w2 = jnp.transpose(raw["fc2_w"]).astype(jnp.float32)
    w2 = jnp.pad(w2, ((0, 0), (0, n_pad - num_actions)))
    b2 = jnp.pad(raw["fc2_b"].astype(jnp.float32), (0, n_pad - num_actions))

    return {
        "c1_w": conv_w(raw["c1_w"], scale=1.0 / 255.0), "c1_b": bias(raw["c1_b"]),
        "c2_w": conv_w(raw["c2_w"]), "c2_b": bias(raw["c2_b"]),
        "c3_w": conv_w(raw["c3_w"]), "c3_b": bias(raw["c3_b"]),
        "fc1_w": w1.astype(jnp.bfloat16), "fc1_b": bias(raw["fc1_b"]),
        "fc2_w": w2.astype(jnp.bfloat16), "fc2_b": b2.reshape(1, -1),
    }


# ---------------------------------------------------------------------------
# Forward pass
# ---------------------------------------------------------------------------
@functools.partial(jax.jit, static_argnames=("num_actions",))
def dqn_forward(params, x, *, num_actions):
    # x: (B, C, 84, 84) NCHW, raw pixel scale [0, 255]
    x = jnp.transpose(x, (0, 2, 3, 1)).astype(jnp.bfloat16)   # NHWC, bf16, once
    h = conv2d_pallas(x, params["c1_w"], params["c1_b"],
                      ksize=8, stride=4)                      # (B,20,20,32)
    h = conv2d_pallas(h, params["c2_w"], params["c2_b"],
                      ksize=4, stride=2)                      # (B,9,9,64)
    h = conv2d_pallas(h, params["c3_w"], params["c3_b"],
                      ksize=3, stride=1)                      # (B,7,7,64)
    B = h.shape[0]
    hf = h.reshape(B, FC1_K)        # NHWC flatten (fc1_w permuted to match), bf16
    q = fused_head(hf, params["fc1_w"], params["fc1_b"],
                   params["fc2_w"], params["fc2_b"])          # (B, 128) f32
    return q[:, :num_actions]
    # TODO(synk): fusing conv3's matmul directly into the head kernel (its
    # flattened output IS the fc1 input) would remove one more HBM round trip
    # at tiny batch; kept separate for clarity.


# ---------------------------------------------------------------------------
# Pure-JAX f32 reference (original PyTorch layouts / semantics) for validation.
# ---------------------------------------------------------------------------
def dqn_reference(raw, x):
    hp = jax.lax.Precision.HIGHEST
    h = x / 255.0

    def conv(h, w, b, stride):
        y = jax.lax.conv_general_dilated(
            h, w, (stride, stride), "VALID",
            dimension_numbers=("NCHW", "OIHW", "NCHW"), precision=hp)
        return jax.nn.relu(y + b.reshape(1, -1, 1, 1))

    h = conv(h, raw["c1_w"], raw["c1_b"], 4)
    h = conv(h, raw["c2_w"], raw["c2_b"], 2)
    h = conv(h, raw["c3_w"], raw["c3_b"], 1)
    h = h.reshape(h.shape[0], -1)                       # NCHW flatten (torch)
    h = jax.nn.relu(jnp.dot(h, raw["fc1_w"].T, precision=hp) + raw["fc1_b"])
    return jnp.dot(h, raw["fc2_w"].T, precision=hp) + raw["fc2_b"]


if __name__ == "__main__":
    batch, input_channels, num_actions = 2, 4, 6
    key = jax.random.PRNGKey(0)
    k_params, k_x = jax.random.split(key)

    raw = init_params(k_params, input_channels, num_actions)
    params = prepare_params(raw, num_actions)      # one-time layout / bf16 prep
    x = jax.random.uniform(k_x, (batch, input_channels, 84, 84),
                           jnp.float32, minval=0.0, maxval=255.0)

    q = dqn_forward(params, x, num_actions=num_actions)
    q = jax.block_until_ready(q)
    assert q.shape == (batch, num_actions) and q.dtype == jnp.float32

    # Validate patch ordering / weight-layout transforms against f32 reference
    # (tolerance accounts for bf16 activations & weights).
    q_ref = jax.block_until_ready(dqn_reference(raw, x))
    assert np.allclose(np.asarray(q), np.asarray(q_ref), rtol=1e-1, atol=1e-1), (
        float(np.max(np.abs(np.asarray(q) - np.asarray(q_ref)))))

    print("KERNEL_OK")
</pallas_src>

<mosaic_0001>
module attributes {stable_mosaic.version = 11 : i64} {
  func.func @_mm_bias_relu_kernel(%arg0: i32, %arg1: memref<400x256xbf16, #tpu.memory_space<vmem>>, %arg2: memref<256x32xbf16, #tpu.memory_space<vmem>>, %arg3: memref<1x32xf32, #tpu.memory_space<vmem>>, %arg4: memref<400x32xbf16, #tpu.memory_space<vmem>>) attributes {dimension_semantics = [#tpu.dimension_semantics<parallel>], iteration_bounds = array<i64: 2>, scalar_prefetch = 0 : i64, scratch_operands = 0 : i64, tpu.core_type = #tpu.core_type<tc>, window_params = [{transform_indices = @transform_0, window_bounds = array<i64: 400, 256>}, {pipeline_mode = #tpu.pipeline_mode<synchronous>, transform_indices = @transform_1, window_bounds = array<i64: 256, 32>}, {pipeline_mode = #tpu.pipeline_mode<synchronous>, transform_indices = @transform_2, window_bounds = array<i64: 1, 32>}, {transform_indices = @transform_3, window_bounds = array<i64: 400, 32>}]} {
    %c0 = arith.constant 0 : index
    %c0_0 = arith.constant 0 : index
    %0 = vector.load %arg1[%c0, %c0_0] : memref<400x256xbf16, #tpu.memory_space<vmem>>, vector<400x256xbf16>
    %c0_1 = arith.constant 0 : index
    %c0_2 = arith.constant 0 : index
    %1 = vector.load %arg2[%c0_1, %c0_2] : memref<256x32xbf16, #tpu.memory_space<vmem>>, vector<256x32xbf16>
    %cst = arith.constant dense<0.000000e+00> : vector<400x32xf32>
    %2 = tpu.matmul %0, %1, %cst {dimension_numbers = #tpu.dot_dimension_numbers<[1], [0], [0], [1], [0, 0, 1, 1], [], []>} : vector<400x256xbf16>, vector<256x32xbf16>, vector<400x32xf32> -> vector<400x32xf32>
    %c0_3 = arith.constant 0 : index
    %c0_4 = arith.constant 0 : index
    %3 = vector.load %arg3[%c0_3, %c0_4] : memref<1x32xf32, #tpu.memory_space<vmem>>, vector<1x32xf32>
    %4 = vector.broadcast %3 : vector<1x32xf32> to vector<400x32xf32>
    %5 = arith.addf %2, %4 : vector<400x32xf32>
    %cst_5 = arith.constant 0.000000e+00 : f32
    %6 = vector.broadcast %cst_5 : f32 to vector<400x32xf32>
    %7 = arith.maximumf %5, %6 : vector<400x32xf32>
    %8 = arith.truncf %7 : vector<400x32xf32> to vector<400x32xbf16>
    %c0_6 = arith.constant 0 : index
    %c0_7 = arith.constant 0 : index
    %9 = vector.load %arg4[%c0_6, %c0_7] : memref<400x32xbf16, #tpu.memory_space<vmem>>, vector<400x32xbf16>
    tpu.vector_store %arg4[%c0_6, %c0_7], %8 {strides = array<i32>} : memref<400x32xbf16, #tpu.memory_space<vmem>>, vector<400x32xbf16>,
    return
  }
  func.func @transform_0(%arg0: i32) -> (i32, i32) {
    %c0_i32 = arith.constant 0 : i32
    %c0_i32_0 = arith.constant 0 : i32
    return %arg0, %c0_i32 : i32, i32
  }
  func.func @transform_1(%arg0: i32) -> (i32, i32) {
    %c0_i32 = arith.constant 0 : i32
    %c0_i32_0 = arith.constant 0 : i32
    %c0_i32_1 = arith.constant 0 : i32
    return %c0_i32, %c0_i32_0 : i32, i32
  }
  func.func @transform_2(%arg0: i32) -> (i32, i32) {
    %c0_i32 = arith.constant 0 : i32
    %c0_i32_0 = arith.constant 0 : i32
    %c0_i32_1 = arith.constant 0 : i32
    return %c0_i32, %c0_i32_0 : i32, i32
  }
  func.func @transform_3(%arg0: i32) -> (i32, i32) {
    %c0_i32 = arith.constant 0 : i32
    %c0_i32_0 = arith.constant 0 : i32
    return %arg0, %c0_i32 : i32, i32
  }
}

module attributes {stable_mosaic.version = 11 : i64} {
  func.func @_mm_bias_relu_kernel(%arg0: i32, %arg1: memref<88x512xbf16, #tpu.memory_space<vmem>>, %arg2: memref<512x64xbf16, #tpu.memory_space<vmem>>, %arg3: memref<1x64xf32, #tpu.memory_space<vmem>>, %arg4: memref<88x64xbf16, #tpu.memory_space<vmem>>) attributes {dimension_semantics = [#tpu.dimension_semantics<parallel>], iteration_bounds = array<i64: 2>, scalar_prefetch = 0 : i64, scratch_operands = 0 : i64, tpu.core_type = #tpu.core_type<tc>, window_params = [{transform_indices = @transform_0, window_bounds = array<i64: 88, 512>}, {pipeline_mode = #tpu.pipeline_mode<synchronous>, transform_indices = @transform_1, window_bounds = array<i64: 512, 64>}, {pipeline_mode = #tpu.pipeline_mode<synchronous>, transform_indices = @transform_2, window_bounds = array<i64: 1, 64>}, {transform_indices = @transform_3, window_bounds = array<i64: 88, 64>}]} {
    %c0 = arith.constant 0 : index
    %c0_0 = arith.constant 0 : index
    %0 = vector.load %arg1[%c0, %c0_0] : memref<88x512xbf16, #tpu.memory_space<vmem>>, vector<88x512xbf16>
    %c0_1 = arith.constant 0 : index
    %c0_2 = arith.constant 0 : index
    %1 = vector.load %arg2[%c0_1, %c0_2] : memref<512x64xbf16, #tpu.memory_space<vmem>>, vector<512x64xbf16>
    %cst = arith.constant dense<0.000000e+00> : vector<88x64xf32>
    %2 = tpu.matmul %0, %1, %cst {dimension_numbers = #tpu.dot_dimension_numbers<[1], [0], [0], [1], [0, 0, 1, 1], [], []>} : vector<88x512xbf16>, vector<512x64xbf16>, vector<88x64xf32> -> vector<88x64xf32>
    %c0_3 = arith.constant 0 : index
    %c0_4 = arith.constant 0 : index
    %3 = vector.load %arg3[%c0_3, %c0_4] : memref<1x64xf32, #tpu.memory_space<vmem>>, vector<1x64xf32>
    %4 = vector.broadcast %3 : vector<1x64xf32> to vector<88x64xf32>
    %5 = arith.addf %2, %4 : vector<88x64xf32>
    %cst_5 = arith.constant 0.000000e+00 : f32
    %6 = vector.broadcast %cst_5 : f32 to vector<88x64xf32>
    %7 = arith.maximumf %5, %6 : vector<88x64xf32>
    %8 = arith.truncf %7 : vector<88x64xf32> to vector<88x64xbf16>
    %c0_6 = arith.constant 0 : index
    %c0_7 = arith.constant 0 : index
    %9 = vector.load %arg4[%c0_6, %c0_7] : memref<88x64xbf16, #tpu.memory_space<vmem>>, vector<88x64xbf16>
    tpu.vector_store %arg4[%c0_6, %c0_7], %8 {strides = array<i32>} : memref<88x64xbf16, #tpu.memory_space<vmem>>, vector<88x64xbf16>,
    return
  }
  func.func @transform_0(%arg0: i32) -> (i32, i32) {
    %c0_i32 = arith.constant 0 : i32
    %c0_i32_0 = arith.constant 0 : i32
    return %arg0, %c0_i32 : i32, i32
  }
  func.func @transform_1(%arg0: i32) -> (i32, i32) {
    %c0_i32 = arith.constant 0 : i32
    %c0_i32_0 = arith.constant 0 : i32
    %c0_i32_1 = arith.constant 0 : i32
    return %c0_i32, %c0_i32_0 : i32, i32
  }
  func.func @transform_2(%arg0: i32) -> (i32, i32) {
    %c0_i32 = arith.constant 0 : i32
    %c0_i32_0 = arith.constant 0 : i32
    %c0_i32_1 = arith.constant 0 : i32
    return %c0_i32, %c0_i32_0 : i32, i32
  }
  func.func @transform_3(%arg0: i32) -> (i32, i32) {
    %c0_i32 = arith.constant 0 : i32
    %c0_i32_0 = arith.constant 0 : i32
    return %arg0, %c0_i32 : i32, i32
  }
}

module attributes {stable_mosaic.version = 11 : i64} {
  func.func @_mm_bias_relu_kernel(%arg0: i32, %arg1: memref<56x576xbf16, #tpu.memory_space<vmem>>, %arg2: memref<576x64xbf16, #tpu.memory_space<vmem>>, %arg3: memref<1x64xf32, #tpu.memory_space<vmem>>, %arg4: memref<56x64xbf16, #tpu.memory_space<vmem>>) attributes {dimension_semantics = [#tpu.dimension_semantics<parallel>], iteration_bounds = array<i64: 2>, scalar_prefetch = 0 : i64, scratch_operands = 0 : i64, tpu.core_type = #tpu.core_type<tc>, window_params = [{transform_indices = @transform_0, window_bounds = array<i64: 56, 576>}, {pipeline_mode = #tpu.pipeline_mode<synchronous>, transform_indices = @transform_1, window_bounds = array<i64: 576, 64>}, {pipeline_mode = #tpu.pipeline_mode<synchronous>, transform_indices = @transform_2, window_bounds = array<i64: 1, 64>}, {transform_indices = @transform_3, window_bounds = array<i64: 56, 64>}]} {
    %c0 = arith.constant 0 : index
    %c0_0 = arith.constant 0 : index
    %0 = vector.load %arg1[%c0, %c0_0] : memref<56x576xbf16, #tpu.memory_space<vmem>>, vector<56x576xbf16>
    %c0_1 = arith.constant 0 : index
    %c0_2 = arith.constant 0 : index
    %1 = vector.load %arg2[%c0_1, %c0_2] : memref<576x64xbf16, #tpu.memory_space<vmem>>, vector<576x64xbf16>
    %cst = arith.constant dense<0.000000e+00> : vector<56x64xf32>
    %2 = tpu.matmul %0, %1, %cst {dimension_numbers = #tpu.dot_dimension_numbers<[1], [0], [0], [1], [0, 0, 1, 1], [], []>} : vector<56x576xbf16>, vector<576x64xbf16>, vector<56x64xf32> -> vector<56x64xf32>
    %c0_3 = arith.constant 0 : index
    %c0_4 = arith.constant 0 : index
    %3 = vector.load %arg3[%c0_3, %c0_4] : memref<1x64xf32, #tpu.memory_space<vmem>>, vector<1x64xf32>
    %4 = vector.broadcast %3 : vector<1x64xf32> to vector<56x64xf32>
    %5 = arith.addf %2, %4 : vector<56x64xf32>
    %cst_5 = arith.constant 0.000000e+00 : f32
    %6 = vector.broadcast %cst_5 : f32 to vector<56x64xf32>
    %7 = arith.maximumf %5, %6 : vector<56x64xf32>
    %8 = arith.truncf %7 : vector<56x64xf32> to vector<56x64xbf16>
    %c0_6 = arith.constant 0 : index
    %c0_7 = arith.constant 0 : index
    %9 = vector.load %arg4[%c0_6, %c0_7] : memref<56x64xbf16, #tpu.memory_space<vmem>>, vector<56x64xbf16>
    tpu.vector_store %arg4[%c0_6, %c0_7], %8 {strides = array<i32>} : memref<56x64xbf16, #tpu.memory_space<vmem>>, vector<56x64xbf16>,
    return
  }
  func.func @transform_0(%arg0: i32) -> (i32, i32) {
    %c0_i32 = arith.constant 0 : i32
    %c0_i32_0 = arith.constant 0 : i32
    return %arg0, %c0_i32 : i32, i32
  }
  func.func @transform_1(%arg0: i32) -> (i32, i32) {
    %c0_i32 = arith.constant 0 : i32
    %c0_i32_0 = arith.constant 0 : i32
    %c0_i32_1 = arith.constant 0 : i32
    return %c0_i32, %c0_i32_0 : i32, i32
  }
  func.func @transform_2(%arg0: i32) -> (i32, i32) {
    %c0_i32 = arith.constant 0 : i32
    %c0_i32_0 = arith.constant 0 : i32
    %c0_i32_1 = arith.constant 0 : i32
    return %c0_i32, %c0_i32_0 : i32, i32
  }
  func.func @transform_3(%arg0: i32) -> (i32, i32) {
    %c0_i32 = arith.constant 0 : i32
    %c0_i32_0 = arith.constant 0 : i32
    return %arg0, %c0_i32 : i32, i32
  }
}

module attributes {stable_mosaic.version = 11 : i64} {
  func.func @_head_kernel(%arg0: i32, %arg1: memref<2x3136xbf16, #tpu.memory_space<vmem>>, %arg2: memref<3136x512xbf16, #tpu.memory_space<vmem>>, %arg3: memref<1x512xf32, #tpu.memory_space<vmem>>, %arg4: memref<512x128xbf16, #tpu.memory_space<vmem>>, %arg5: memref<1x128xf32, #tpu.memory_space<vmem>>, %arg6: memref<2x128xf32, #tpu.memory_space<vmem>>) attributes {dimension_semantics = [#tpu.dimension_semantics<parallel>], iteration_bounds = array<i64: 1>, scalar_prefetch = 0 : i64, scratch_operands = 0 : i64, tpu.core_type = #tpu.core_type<tc>, window_params = [{transform_indices = @transform_0, window_bounds = array<i64: 2, 3136>}, {pipeline_mode = #tpu.pipeline_mode<synchronous>, transform_indices = @transform_1, window_bounds = array<i64: 3136, 512>}, {pipeline_mode = #tpu.pipeline_mode<synchronous>, transform_indices = @transform_2, window_bounds = array<i64: 1, 512>}, {pipeline_mode = #tpu.pipeline_mode<synchronous>, transform_indices = @transform_3, window_bounds = array<i64: 512, 128>}, {pipeline_mode = #tpu.pipeline_mode<synchronous>, transform_indices = @transform_4, window_bounds = array<i64: 1, 128>}, {transform_indices = @transform_5, window_bounds = array<i64: 2, 128>}]} {
    %c0 = arith.constant 0 : index
    %c0_0 = arith.constant 0 : index
    %0 = vector.load %arg1[%c0, %c0_0] : memref<2x3136xbf16, #tpu.memory_space<vmem>>, vector<2x3136xbf16>
    %c0_1 = arith.constant 0 : index
    %c0_2 = arith.constant 0 : index
    %1 = vector.load %arg2[%c0_1, %c0_2] : memref<3136x512xbf16, #tpu.memory_space<vmem>>, vector<3136x512xbf16>
    %cst = arith.constant dense<0.000000e+00> : vector<2x512xf32>
    %2 = tpu.matmul %0, %1, %cst {dimension_numbers = #tpu.dot_dimension_numbers<[1], [0], [0], [1], [0, 0, 1, 1], [], []>} : vector<2x3136xbf16>, vector<3136x512xbf16>, vector<2x512xf32> -> vector<2x512xf32>
    %c0_3 = arith.constant 0 : index
    %c0_4 = arith.constant 0 : index
    %3 = vector.load %arg3[%c0_3, %c0_4] : memref<1x512xf32, #tpu.memory_space<vmem>>, vector<1x512xf32>
    %4 = vector.broadcast %3 : vector<1x512xf32> to vector<2x512xf32>
    %5 = arith.addf %2, %4 : vector<2x512xf32>
    %cst_5 = arith.constant 0.000000e+00 : f32
    %6 = vector.broadcast %cst_5 : f32 to vector<2x512xf32>
    %7 = arith.maximumf %5, %6 : vector<2x512xf32>
    %8 = arith.truncf %7 : vector<2x512xf32> to vector<2x512xbf16>
    %c0_6 = arith.constant 0 : index
    %c0_7 = arith.constant 0 : index
    %9 = vector.load %arg4[%c0_6, %c0_7] : memref<512x128xbf16, #tpu.memory_space<vmem>>, vector<512x128xbf16>
    %cst_8 = arith.constant dense<0.000000e+00> : vector<2x128xf32>
    %10 = tpu.matmul %8, %9, %cst_8 {dimension_numbers = #tpu.dot_dimension_numbers<[1], [0], [0], [1], [0, 0, 1, 1], [], []>} : vector<2x512xbf16>, vector<512x128xbf16>, vector<2x128xf32> -> vector<2x128xf32>
    %c0_9 = arith.constant 0 : index
    %c0_10 = arith.constant 0 : index
    %11 = vector.load %arg5[%c0_9, %c0_10] : memref<1x128xf32, #tpu.memory_space<vmem>>, vector<1x128xf32>
    %12 = vector.broadcast %11 : vector<1x128xf32> to vector<2x128xf32>
    %13 = arith.addf %10, %12 : vector<2x128xf32>
    %c0_11 = arith.constant 0 : index
    %c0_12 = arith.constant 0 : index
    %14 = vector.load %arg6[%c0_11, %c0_12] : memref<2x128xf32, #tpu.memory_space<vmem>>, vector<2x128xf32>
    tpu.vector_store %arg6[%c0_11, %c0_12], %13 {strides = array<i32>} : memref<2x128xf32, #tpu.memory_space<vmem>>, vector<2x128xf32>,
    return
  }
  func.func @transform_0(%arg0: i32) -> (i32, i32) {
    %c0_i32 = arith.constant 0 : i32
    %c0_i32_0 = arith.constant 0 : i32
    return %arg0, %c0_i32 : i32, i32
  }
  func.func @transform_1(%arg0: i32) -> (i32, i32) {
    %c0_i32 = arith.constant 0 : i32
    %c0_i32_0 = arith.constant 0 : i32
    %c0_i32_1 = arith.constant 0 : i32
    return %c0_i32, %c0_i32_0 : i32, i32
  }
  func.func @transform_2(%arg0: i32) -> (i32, i32) {
    %c0_i32 = arith.constant 0 : i32
    %c0_i32_0 = arith.constant 0 : i32
    %c0_i32_1 = arith.constant 0 : i32
    return %c0_i32, %c0_i32_0 : i32, i32
  }
  func.func @transform_3(%arg0: i32) -> (i32, i32) {
    %c0_i32 = arith.constant 0 : i32
    %c0_i32_0 = arith.constant 0 : i32
    %c0_i32_1 = arith.constant 0 : i32
    return %c0_i32, %c0_i32_0 : i32, i32
  }
  func.func @transform_4(%arg0: i32) -> (i32, i32) {
    %c0_i32 = arith.constant 0 : i32
    %c0_i32_0 = arith.constant 0 : i32
    %c0_i32_1 = arith.constant 0 : i32
    return %c0_i32, %c0_i32_0 : i32, i32
  }
  func.func @transform_5(%arg0: i32) -> (i32, i32) {
    %c0_i32 = arith.constant 0 : i32
    %c0_i32_0 = arith.constant 0 : i32
    return %arg0, %c0_i32 : i32, i32
  }
}

</mosaic_0001>

<bundles_post_ra>
// kernel: dqn_forward.4
= control target key start
LH: loop header
LB: loop body
LE: loop exit
PB: predicated region body
PF: predicated region fallthrough
CT: control target
= control target key end

     0   :  { %s1542_s12 = smov 0   ;;  %s1852_s0 = inlined_call_operand.vmem [shape: bf16[800,256], index: 0, kind: input, shape index: {}]   ;;  %s1853_s1 = inlined_call_operand.vmem [shape: bf16[256,32], index: 1, kind: input, shape index: {}]   ;;  %s1854_s2 = inlined_call_operand.vmem [shape: f32[1,32], index: 2, kind: input, shape index: {}]   ;;  %s1855_s3 = inlined_call_operand.vmem [shape: bf16[800,32], index: 3, kind: output, shape index: {}]  }
   0x1 LB: > { %s1203_s13 = sadd.s32 4294967295, %s1519_s12   ;;  %p1207_p0 = scmp.ge.s32.totalorder %s1519_s12, 1  ;;  %s1519_s12 = sphi %s1542_s12, %s13_s12  }
   0x2   : > { %p139_p1 = scmp.lt.s32.totalorder %s1519_s12, 3 }
   0x4   : > { %p140_p2 = pnand %p1207_p0, %p139_p1 }
   0x5   : > { %v1422_v0 = vld [vmem:[%s1853_s1] sm:$0xff] (!%p140_p2)   ;;  %v1521_v1 = vmov (!%p140_p2), 0   ;;  %s164_s16 = smul.u32 (!%p140_p2), 50, %s1203_s13  ;;  %v1423_v2 = vld [vmem:[%s1853_s1 + $0x8] sm:$0xff] (!%p140_p2)   ;;  %v1424_v3 = vld [vmem:[%s1853_s1 + $0x10] sm:$0xff] (!%p140_p2)   ;;  %vm1096_vm0 = vcmask (!%p140_p2), 257024  }
   0x6   : > { %143 = sbr.rel (%p140_p2) target bundleno = 387 (0x183), region = 32  ;;  %613 = vmatprep.subr.bf16.mxu0 (!%p140_p2), %v1521_v1  ;;  %1381 = vmatprep.subr.bf16.mxu1 (!%p140_p2), %v1521_v1  ;;  %v1425_v4 = vld [vmem:[%s1853_s1 + $0x18] sm:$0xff] (!%p140_p2)   ;;  %v1426_v5 = vld [vmem:[%s1853_s1 + $0x20] sm:$0xff] (!%p140_p2)   ;;  %v1427_v7 = vld [vmem:[%s1853_s1 + $0x28] sm:$0xff] (!%p140_p2)  }
   0x7   : > { %614 = vmatpush1.bf16.msra.mxu0 (!%p140_p2), %v1422_v0  ;;  %1397 = vmatpush1.bf16.msra.mxu1 (!%p140_p2), %v1422_v0  ;;  %p165_p3 = scmp.lt.s32.totalorder (!%p140_p2), %s164_s16, 99  ;;  %v1428_v9 = vld [vmem:[%s1853_s1 + $0x30] sm:$0xff] (!%p140_p2)   ;;  %v1429_v10 = vld [vmem:[%s1853_s1 + $0x38] sm:$0xff] (!%p140_p2)   ;;  %v1430_v11 = vld [vmem:[%s1853_s1 + $0x40] sm:$0xff] (!%p140_p2)  }
   0x8   : > { %615 = vmatprep.subr.bf16.mxu0 (!%p140_p2), %v1521_v1  ;;  %1382 = vmatprep.subr.bf16.mxu1 (!%p140_p2), %v1521_v1  ;;  %v1431_v12 = vld [vmem:[%s1853_s1 + $0x48] sm:$0xff] (!%p140_p2)   ;;  %v1432_v13 = vld [vmem:[%s1853_s1 + $0x50] sm:$0xff] (!%p140_p2)   ;;  %v1433_v14 = vld [vmem:[%s1853_s1 + $0x58] sm:$0xff] (!%p140_p2)  }
   0x9   : > { %v1434_v15 = vld [vmem:[%s1853_s1 + $0x60] sm:$0xff] (!%p140_p2)   ;;  %v1435_v16 = vld [vmem:[%s1853_s1 + $0x68] sm:$0xff] (!%p140_p2)   ;;  %v1436_v17 = vld [vmem:[%s1853_s1 + $0x70] sm:$0xff] (!%p140_p2)  }
   0xa   : > { %v1437_v18 = vld [vmem:[%s1853_s1 + $0x78] sm:$0xff] (!%p140_p2)  }
   0xb   : > { %616 = vmatpush1.bf16.msra.mxu0 (!%p140_p2), %v1423_v2  ;;  %1398 = vmatpush1.bf16.msra.mxu1 (!%p140_p2), %v1423_v2 }
   0xc   : > { %617 = vmatprep.subr.bf16.mxu0 (!%p140_p2), %v1521_v1  ;;  %1383 = vmatprep.subr.bf16.mxu1 (!%p140_p2), %v1521_v1 }
   0xd   : > { %s1857_s16 = smov (!%p165_p3, %s164_s16), 99 }
   0xe   : > { %s1330_s23 = sshll.u32 %s1857_s16, 3  ;;  %s1210_s29 = sshll.u32 %s1857_s16, 2 }
   0xf   : > { %618 = vmatpush1.bf16.msra.mxu0 %v1424_v3  ;;  %1399 = vmatpush1.bf16.msra.mxu1 %v1424_v3  ;;  %s1579_s28 = scalar_lea.vmem %s1852_s0, %s1330_s23  ;;  %v1691_v3 = vld [vmem:[%s1854_s2] ss:$0 sm:$0xff]  ;;  %s1701_s16 = scalar_lea.vmem %s1855_s3, %s1210_s29 }
  0x10   : > { %619 = vmatprep.subr.bf16.mxu0 %v1521_v1  ;;  %1384 = vmatprep.subr.bf16.mxu1 %v1521_v1  ;;  %v1440_v6 = vld [vmem:[%s1579_s28 + $0x4] ss:$8 sps:$4 sm:$0xff]   ;;  %v1443_v8 = vld [vmem:[%s1579_s28 + $0xd4] ss:$8 sps:$4 sm:$0xff]   ;;  %v1438_v19 = vld [vmem:[%s1579_s28] ss:$8 sps:$4 sm:$0xff]  }
  0x11   : > { %645 = vmatprep.mubr.bf16.mxu0 %v1440_v6  ;;  %749 = vmatprep.mubr.bf16.mxu1 %v1443_v8  ;;  %v1441_v20 = vld [vmem:[%s1579_s28 + $0xd0] ss:$8 sps:$4 sm:$0xff]   ;;  %v1444_v21 = vld [vmem:[%s1579_s28 + $0x14] ss:$8 sps:$4 sm:$0xff]   ;;  %v1447_v22 = vld [vmem:[%s1579_s28 + $0xe4] ss:$8 sps:$4 sm:$0xff]  }
  0x12   : > { %v1446_v23 = vld [vmem:[%s1579_s28 + $0x10] ss:$8 sps:$4 sm:$0xff]   ;;  %v1449_v24 = vld [vmem:[%s1579_s28 + $0xe0] ss:$8 sps:$4 sm:$0xff]   ;;  %v1450_v25 = vld [vmem:[%s1579_s28 + $0x24] ss:$8 sps:$4 sm:$0xff]  }
  0x13   : > { %620 = vmatpush1.bf16.msra.mxu0 %v1425_v4  ;;  %1400 = vmatpush1.bf16.msra.mxu1 %v1425_v4  ;;  %v1453_v26 = vld [vmem:[%s1579_s28 + $0xf4] ss:$8 sps:$4 sm:$0xff]   ;;  %v1452_v27 = vld [vmem:[%s1579_s28 + $0x20] ss:$8 sps:$4 sm:$0xff]   ;;  %v1455_v28 = vld [vmem:[%s1579_s28 + $0xf0] ss:$8 sps:$4 sm:$0xff]  }
  0x14   : > { %621 = vmatprep.subr.bf16.mxu0 %v1521_v1  ;;  %1385 = vmatprep.subr.bf16.mxu1 %v1521_v1  ;;  %v1456_v29 = vld [vmem:[%s1579_s28 + $0x34] ss:$8 sps:$4 sm:$0xff]   ;;  %v1459_v30 = vld [vmem:[%s1579_s28 + $0x104] ss:$8 sps:$4 sm:$0xff]   ;;  %v1458_v31 = vld [vmem:[%s1579_s28 + $0x30] ss:$8 sps:$4 sm:$0xff]  }
  0x15   : > { %v1461_v32 = vld [vmem:[%s1579_s28 + $0x100] ss:$8 sps:$4 sm:$0xff]   ;;  %v1462_v33 = vld [vmem:[%s1579_s28 + $0x44] ss:$8 sps:$4 sm:$0xff]   ;;  %v1465_v34 = vld [vmem:[%s1579_s28 + $0x114] ss:$8 sps:$4 sm:$0xff]  }
  0x16   : > { %v1464_v35 = vld [vmem:[%s1579_s28 + $0x40] ss:$8 sps:$4 sm:$0xff]   ;;  %v1467_v36 = vld [vmem:[%s1579_s28 + $0x110] ss:$8 sps:$4 sm:$0xff]   ;;  %v1468_v37 = vld [vmem:[%s1579_s28 + $0x54] ss:$8 sps:$4 sm:$0xff]  }
  0x17   : > { %622 = vmatpush1.bf16.msra.mxu0 %v1426_v5  ;;  %1401 = vmatpush1.bf16.msra.mxu1 %v1426_v5  ;;  %v1471_v38 = vld [vmem:[%s1579_s28 + $0x124] ss:$8 sps:$4 sm:$0xff]   ;;  %v1470_v39 = vld [vmem:[%s1579_s28 + $0x50] ss:$8 sps:$4 sm:$0xff]   ;;  %v1473_v40 = vld [vmem:[%s1579_s28 + $0x120] ss:$8 sps:$4 sm:$0xff]  }
  0x18   : > { %623 = vmatprep.subr.bf16.mxu0 %v1521_v1  ;;  %1386 = vmatprep.subr.bf16.mxu1 %v1521_v1  ;;  %v1474_v41 = vld [vmem:[%s1579_s28 + $0x64] ss:$8 sps:$4 sm:$0xff]   ;;  %v1477_v42 = vld [vmem:[%s1579_s28 + $0x134] ss:$8 sps:$4 sm:$0xff]   ;;  %v1476_v43 = vld [vmem:[%s1579_s28 + $0x60] ss:$8 sps:$4 sm:$0xff]  }
  0x19   : > { %v1479_v44 = vld [vmem:[%s1579_s28 + $0x130] ss:$8 sps:$4 sm:$0xff]   ;;  %v1480_v45 = vld [vmem:[%s1579_s28 + $0x74] ss:$8 sps:$4 sm:$0xff]   ;;  %v1483_v46 = vld [vmem:[%s1579_s28 + $0x144] ss:$8 sps:$4 sm:$0xff]  }
  0x1a   : > { %v1482_v47 = vld [vmem:[%s1579_s28 + $0x70] ss:$8 sps:$4 sm:$0xff]   ;;  %v1485_v48 = vld [vmem:[%s1579_s28 + $0x140] ss:$8 sps:$4 sm:$0xff]   ;;  %v1486_v49 = vld [vmem:[%s1579_s28 + $0x84] ss:$8 sps:$4 sm:$0xff]  }
  0x1b   : > { %624 = vmatpush1.bf16.msra.mxu0 %v1427_v7  ;;  %1402 = vmatpush1.bf16.msra.mxu1 %v1427_v7  ;;  %v1489_v50 = vld [vmem:[%s1579_s28 + $0x154] ss:$8 sps:$4 sm:$0xff]   ;;  %v1488_v51 = vld [vmem:[%s1579_s28 + $0x80] ss:$8 sps:$4 sm:$0xff]   ;;  %v1491_v52 = vld [vmem:[%s1579_s28 + $0x150] ss:$8 sps:$4 sm:$0xff]  }
  0x1c   : > { %625 = vmatprep.subr.bf16.mxu0 %v1521_v1  ;;  %1387 = vmatprep.subr.bf16.mxu1 %v1521_v1  ;;  %v1492_v53 = vld [vmem:[%s1579_s28 + $0x94] ss:$8 sps:$4 sm:$0xff]   ;;  %v1495_v54 = vld [vmem:[%s1579_s28 + $0x164] ss:$8 sps:$4 sm:$0xff]   ;;  %v1494_v55 = vld [vmem:[%s1579_s28 + $0x90] ss:$8 sps:$4 sm:$0xff]  }
  0x1d   : > { %v1497_v56 = vld [vmem:[%s1579_s28 + $0x160] ss:$8 sps:$4 sm:$0xff]   ;;  %v1498_v57 = vld [vmem:[%s1579_s28 + $0xa4] ss:$8 sps:$4 sm:$0xff]   ;;  %v1501_v58 = vld [vmem:[%s1579_s28 + $0x174] ss:$8 sps:$4 sm:$0xff]  }
  0x1e   : > { %v1500_v59 = vld [vmem:[%s1579_s28 + $0xa0] ss:$8 sps:$4 sm:$0xff]   ;;  %v1503_v60 = vld [vmem:[%s1579_s28 + $0x170] ss:$8 sps:$4 sm:$0xff]   ;;  %v1504_v61 = vld [vmem:[%s1579_s28 + $0xb4] ss:$8 sps:$4 sm:$0xff]  }
  0x1f   : > { %626 = vmatpush1.bf16.msra.mxu0 %v1428_v9  ;;  %1403 = vmatpush1.bf16.msra.mxu1 %v1428_v9  ;;  %v1507_v62 = vld [vmem:[%s1579_s28 + $0x184] ss:$8 sps:$4 sm:$0xff]   ;;  %v1506_v63 = vld [vmem:[%s1579_s28 + $0xb0] ss:$8 sps:$4 sm:$0xff]   ;;  %v1509_v0 = vld [vmem:[%s1579_s28 + $0x180] ss:$8 sps:$4 sm:$0xff]  }
  0x20   : > { %627 = vmatprep.subr.bf16.mxu0 %v1521_v1  ;;  %1388 = vmatprep.subr.bf16.mxu1 %v1521_v1  ;;  %v1512_v2 = vld [vmem:[%s1579_s28 + $0xc0] ss:$8 sps:$4 sm:$0xff]  }
  0x23   : > { %628 = vmatpush1.bf16.msra.mxu0 %v1429_v10  ;;  %1404 = vmatpush1.bf16.msra.mxu1 %v1429_v10 }
  0x24   : > { %629 = vmatprep.subr.bf16.mxu0 %v1521_v1  ;;  %1389 = vmatprep.subr.bf16.mxu1 %v1521_v1 }
  0x27   : > { %630 = vmatpush1.bf16.msra.mxu0 %v1430_v11  ;;  %1405 = vmatpush1.bf16.msra.mxu1 %v1430_v11 }
  0x28   : > { %631 = vmatprep.subr.bf16.mxu0 %v1521_v1  ;;  %1390 = vmatprep.subr.bf16.mxu1 %v1521_v1 }
  0x2b   : > { %632 = vmatpush1.bf16.msra.mxu0 %v1431_v12  ;;  %1406 = vmatpush1.bf16.msra.mxu1 %v1431_v12 }
  0x2c   : > { %633 = vmatprep.subr.bf16.mxu0 %v1521_v1  ;;  %1391 = vmatprep.subr.bf16.mxu1 %v1521_v1 }
  0x2f   : > { %634 = vmatpush1.bf16.msra.mxu0 %v1432_v13  ;;  %1407 = vmatpush1.bf16.msra.mxu1 %v1432_v13 }
  0x30   : > { %635 = vmatprep.subr.bf16.mxu0 %v1521_v1  ;;  %1392 = vmatprep.subr.bf16.mxu1 %v1521_v1 }
  0x33   : > { %636 = vmatpush1.bf16.msra.mxu0 %v1433_v14  ;;  %1408 = vmatpush1.bf16.msra.mxu1 %v1433_v14 }
  0x34   : > { %637 = vmatprep.subr.bf16.mxu0 %v1521_v1  ;;  %1393 = vmatprep.subr.bf16.mxu1 %v1521_v1 }
  0x37   : > { %638 = vmatpush1.bf16.msra.mxu0 %v1434_v15  ;;  %1409 = vmatpush1.bf16.msra.mxu1 %v1434_v15 }
  0x38   : > { %639 = vmatprep.subr.bf16.mxu0 %v1521_v1  ;;  %1394 = vmatprep.subr.bf16.mxu1 %v1521_v1 }
  0x3b   : > { %640 = vmatpush1.bf16.msra.mxu0 %v1435_v16  ;;  %1410 = vmatpush1.bf16.msra.mxu1 %v1435_v16 }
  0x3c   : > { %641 = vmatprep.subr.bf16.mxu0 %v1521_v1  ;;  %1395 = vmatprep.subr.bf16.mxu1 %v1521_v1 }
  0x3f   : > { %642 = vmatpush1.bf16.msra.mxu0 %v1436_v17  ;;  %1411 = vmatpush1.bf16.msra.mxu1 %v1436_v17 }
  0x40   : > { %643 = vmatprep.subr.bf16.mxu0 %v1521_v1  ;;  %1396 = vmatprep.subr.bf16.mxu1 %v1521_v1  ;;  %v1510_v1 = vld [vmem:[%s1579_s28 + $0xc4] ss:$8 sps:$4 sm:$0xff]  }
  0x43   : > { %644 = vmatpush1.bf16.msra.mxu0 %v1437_v18  ;;  %1412 = vmatpush1.bf16.msra.mxu1 %v1437_v18 }
  0x46   : > { %646 = vmatmul.mubr.bf16.vlgmr.msra.gmra.mrb[0].mxu0 %v1438_v19  ;;  %750 = vmatmul.mubr.bf16.vlgmr.msra.gmra.mrb[0].mxu1 %v1441_v20 }
  0x47   : > { %653 = vmatprep.mubr.bf16.mxu0 %v1444_v21  ;;  %757 = vmatprep.mubr.bf16.mxu1 %v1447_v22 }
  0x4e   : > { %654 = vmatmul.mubr.bf16.gmra.mrb[4].mxu0 %v1446_v23  ;;  %758 = vmatmul.mubr.bf16.gmra.mrb[4].mxu1 %v1449_v24 }
  0x4f   : > { %661 = vmatprep.mubr.bf16.mxu0 %v1450_v25  ;;  %765 = vmatprep.mubr.bf16.mxu1 %v1453_v26 }
  0x56   : > { %662 = vmatmul.mubr.bf16.gmra.mrb[8].mxu0 %v1452_v27  ;;  %766 = vmatmul.mubr.bf16.gmra.mrb[8].mxu1 %v1455_v28 }
  0x57   : > { %669 = vmatprep.mubr.bf16.mxu0 %v1456_v29  ;;  %773 = vmatprep.mubr.bf16.mxu1 %v1459_v30 }
  0x5e   : > { %670 = vmatmul.mubr.bf16.gmra.mrb[12].mxu0 %v1458_v31  ;;  %774 = vmatmul.mubr.bf16.gmra.mrb[12].mxu1 %v1461_v32 }
  0x5f   : > { %677 = vmatprep.mubr.bf16.mxu0 %v1462_v33  ;;  %781 = vmatprep.mubr.bf16.mxu1 %v1465_v34 }
  0x66   : > { %678 = vmatmul.mubr.bf16.gmra.mrb[16].mxu0 %v1464_v35  ;;  %782 = vmatmul.mubr.bf16.gmra.mrb[16].mxu1 %v1467_v36 }
  0x67   : > { %685 = vmatprep.mubr.bf16.mxu0 %v1468_v37  ;;  %789 = vmatprep.mubr.bf16.mxu1 %v1471_v38 }
  0x6e   : > { %686 = vmatmul.mubr.bf16.gmra.mrb[20].mxu0 %v1470_v39  ;;  %790 = vmatmul.mubr.bf16.gmra.mrb[20].mxu1 %v1473_v40 }
  0x6f   : > { %693 = vmatprep.mubr.bf16.mxu0 %v1474_v41  ;;  %797 = vmatprep.mubr.bf16.mxu1 %v1477_v42 }
  0x76   : > { %694 = vmatmul.mubr.bf16.gmra.mrb[24].mxu0 %v1476_v43  ;;  %798 = vmatmul.mubr.bf16.gmra.mrb[24].mxu1 %v1479_v44 }
  0x77   : > { %701 = vmatprep.mubr.bf16.mxu0 %v1480_v45  ;;  %805 = vmatprep.mubr.bf16.mxu1 %v1483_v46 }
  0x7e   : > { %702 = vmatmul.mubr.bf16.gmra.mrb[28].mxu0 %v1482_v47  ;;  %806 = vmatmul.mubr.bf16.gmra.mrb[28].mxu1 %v1485_v48 }
  0x7f   : > { %709 = vmatprep.mubr.bf16.mxu0 %v1486_v49  ;;  %813 = vmatprep.mubr.bf16.mxu1 %v1489_v50 }
  0x86   : > { %710 = vmatmul.mubr.bf16.gmra.mrb[32].mxu0 %v1488_v51  ;;  %814 = vmatmul.mubr.bf16.gmra.mrb[32].mxu1 %v1491_v52 }
  0x87   : > { %717 = vmatprep.mubr.bf16.mxu0 %v1492_v53  ;;  %821 = vmatprep.mubr.bf16.mxu1 %v1495_v54 }
  0x8e   : > { %718 = vmatmul.mubr.bf16.gmra.mrb[36].mxu0 %v1494_v55  ;;  %822 = vmatmul.mubr.bf16.gmra.mrb[36].mxu1 %v1497_v56 }
  0x8f   : > { %725 = vmatprep.mubr.bf16.mxu0 %v1498_v57  ;;  %829 = vmatprep.mubr.bf16.mxu1 %v1501_v58 }
  0x96   : > { %726 = vmatmul.mubr.bf16.gmra.mrb[40].mxu0 %v1500_v59  ;;  %830 = vmatmul.mubr.bf16.gmra.mrb[40].mxu1 %v1503_v60 }
  0x97   : > { %733 = vmatprep.mubr.bf16.mxu0 %v1504_v61  ;;  %837 = vmatprep.mubr.bf16.mxu1 %v1507_v62 }
  0x9e   : > { %734 = vmatmul.mubr.bf16.gmra.mrb[44].mxu0 %v1506_v63  ;;  %838 = vmatmul.mubr.bf16.gmra.mrb[44].mxu1 %v1509_v0 }
  0x9f   : > { %741 = vmatprep.mubr.bf16.mxu0 %v1510_v1 }
  0xa6   : > { %742 = vmatmul.mubr.bf16.gmra.mrb[48].mxu0 %v1512_v2 }
 0x119   : > { %v647_v4 = vpop.f32.mrb[0].mxu0  ;;  %v751_v5 = vpop.f32.mrb[0].mxu1 }
 0x11a   : > { %v648_v6 = vadd.f32 %v1691_v3, %v647_v4  ;;  %v649_v7 = vpop.f32.mrb[1].mxu0  ;;  %v752_v8 = vadd.f32 %v1691_v3, %v751_v5  ;;  %v753_v9 = vpop.f32.mrb[1].mxu1 }
 0x11b   : > { %v650_v10 = vpop.f32.mrb[2].mxu0  ;;  %v754_v11 = vpop.f32.mrb[2].mxu1 }
 0x11c   : > { %v846_v12 = vmax.f32 %v648_v6, 0.0  ;;  %v651_v13 = vadd.f32 %v1691_v3, %v650_v10  ;;  %v652_v14 = vpop.f32.mrb[3].mxu0  ;;  %v872_v15 = vmax.f32 %v752_v8, 0.0  ;;  %v755_v16 = vadd.f32 %v1691_v3, %v754_v11  ;;  %v756_v17 = vpop.f32.mrb[3].mxu1 }
 0x11e   : > { %v1331_v18 = vpack.c.bf16 %v846_v12, %v846_v12  ;;  %v847_v19 = vmax.f32 %v651_v13, 0.0  ;;  %v1357_v20 = vpack.c.bf16 %v872_v15, %v872_v15  ;;  %v873_v21 = vmax.f32 %v755_v16, 0.0 }
 0x120   : > { %1097 = vst.msk [vmem:[%s1701_s16] sm:$0xf] %vm1096_vm0, %v1331_v18  ;;  %v1332_v22 = vpack.c.bf16 %v847_v19, %v847_v19  ;;  %1123 = vst.msk [vmem:[%s1701_s16 + $0x68] sm:$0xf] %vm1096_vm0, %v1357_v20  ;;  %v1358_v23 = vpack.c.bf16 %v873_v21, %v873_v21 }
 0x121   : > { %v655_v24 = vpop.f32.mrb[4].mxu0  ;;  %v759_v25 = vpop.f32.mrb[4].mxu1 }
 0x122   : > { %1098 = vst.msk [vmem:[%s1701_s16 + $0x4] sm:$0xf] %vm1096_vm0, %v1332_v22  ;;  %1124 = vst.msk [vmem:[%s1701_s16 + $0x6c] sm:$0xf] %vm1096_vm0, %v1358_v23  ;;  %v656_v26 = vadd.f32 %v1691_v3, %v655_v24  ;;  %v657_v27 = vpop.f32.mrb[5].mxu0  ;;  %v760_v28 = vadd.f32 %v1691_v3, %v759_v25  ;;  %v761_v29 = vpop.f32.mrb[5].mxu1 }
 0x123   : > { %v658_v30 = vpop.f32.mrb[6].mxu0  ;;  %v762_v31 = vpop.f32.mrb[6].mxu1 }
 0x124   : > { %v848_v32 = vmax.f32 %v656_v26, 0.0  ;;  %v659_v33 = vadd.f32 %v1691_v3, %v658_v30  ;;  %v660_v34 = vpop.f32.mrb[7].mxu0  ;;  %v874_v35 = vmax.f32 %v760_v28, 0.0  ;;  %v763_v36 = vadd.f32 %v1691_v3, %v762_v31  ;;  %v764_v37 = vpop.f32.mrb[7].mxu1 }
 0x126   : > { %v1333_v38 = vpack.c.bf16 %v848_v32, %v848_v32  ;;  %v849_v39 = vmax.f32 %v659_v33, 0.0  ;;  %v1359_v40 = vpack.c.bf16 %v874_v35, %v874_v35  ;;  %v875_v41 = vmax.f32 %v763_v36, 0.0 }
 0x128   : > { %1099 = vst.msk [vmem:[%s1701_s16 + $0x8] sm:$0xf] %vm1096_vm0, %v1333_v38  ;;  %v1334_v42 = vpack.c.bf16 %v849_v39, %v849_v39  ;;  %1125 = vst.msk [vmem:[%s1701_s16 + $0x70] sm:$0xf] %vm1096_vm0, %v1359_v40  ;;  %v1360_v43 = vpack.c.bf16 %v875_v41, %v875_v41 }
 0x129   : > { %v663_v44 = vpop.f32.mrb[8].mxu0  ;;  %v767_v45 = vpop.f32.mrb[8].mxu1 }
 0x12a   : > { %1100 = vst.msk [vmem:[%s1701_s16 + $0xc] sm:$0xf] %vm1096_vm0, %v1334_v42  ;;  %1126 = vst.msk [vmem:[%s1701_s16 + $0x74] sm:$0xf] %vm1096_vm0, %v1360_v43  ;;  %v664_v46 = vadd.f32 %v1691_v3, %v663_v44  ;;  %v665_v47 = vpop.f32.mrb[9].mxu0  ;;  %v768_v48 = vadd.f32 %v1691_v3, %v767_v45  ;;  %v769_v49 = vpop.f32.mrb[9].mxu1 }
 0x12b   : > { %v666_v50 = vpop.f32.mrb[10].mxu0  ;;  %v770_v51 = vpop.f32.mrb[10].mxu1 }
 0x12c   : > { %v850_v52 = vmax.f32 %v664_v46, 0.0  ;;  %v667_v53 = vadd.f32 %v1691_v3, %v666_v50  ;;  %v668_v54 = vpop.f32.mrb[11].mxu0  ;;  %v876_v55 = vmax.f32 %v768_v48, 0.0  ;;  %v771_v56 = vadd.f32 %v1691_v3, %v770_v51  ;;  %v772_v57 = vpop.f32.mrb[11].mxu1 }
 0x12e   : > { %v1335_v58 = vpack.c.bf16 %v850_v52, %v850_v52  ;;  %v851_v59 = vmax.f32 %v667_v53, 0.0  ;;  %v1361_v60 = vpack.c.bf16 %v876_v55, %v876_v55  ;;  %v877_v61 = vmax.f32 %v771_v56, 0.0 }
 0x130   : > { %1101 = vst.msk [vmem:[%s1701_s16 + $0x10] sm:$0xf] %vm1096_vm0, %v1335_v58  ;;  %v1336_v62 = vpack.c.bf16 %v851_v59, %v851_v59  ;;  %1127 = vst.msk [vmem:[%s1701_s16 + $0x78] sm:$0xf] %vm1096_vm0, %v1361_v60  ;;  %v1362_v63 = vpack.c.bf16 %v877_v61, %v877_v61 }
 0x131   : > { %v671_v0 = vpop.f32.mrb[12].mxu0  ;;  %v775_v1 = vpop.f32.mrb[12].mxu1 }
 0x132   : > { %1102 = vst.msk [vmem:[%s1701_s16 + $0x14] sm:$0xf] %vm1096_vm0, %v1336_v62  ;;  %1128 = vst.msk [vmem:[%s1701_s16 + $0x7c] sm:$0xf] %vm1096_vm0, %v1362_v63  ;;  %v672_v2 = vadd.f32 %v1691_v3, %v671_v0  ;;  %v673_v4 = vpop.f32.mrb[13].mxu0  ;;  %v776_v5 = vadd.f32 %v1691_v3, %v775_v1  ;;  %v777_v6 = vpop.f32.mrb[13].mxu1 }
 0x133   : > { %v674_v7 = vpop.f32.mrb[14].mxu0  ;;  %v778_v8 = vpop.f32.mrb[14].mxu1 }
 0x134   : > { %v852_v9 = vmax.f32 %v672_v2, 0.0  ;;  %v675_v10 = vadd.f32 %v1691_v3, %v674_v7  ;;  %v676_v11 = vpop.f32.mrb[15].mxu0  ;;  %v878_v12 = vmax.f32 %v776_v5, 0.0  ;;  %v779_v13 = vadd.f32 %v1691_v3, %v778_v8  ;;  %v780_v14 = vpop.f32.mrb[15].mxu1 }
 0x136   : > { %v1337_v15 = vpack.c.bf16 %v852_v9, %v852_v9  ;;  %v853_v16 = vmax.f32 %v675_v10, 0.0  ;;  %v1363_v17 = vpack.c.bf16 %v878_v12, %v878_v12  ;;  %v879_v18 = vmax.f32 %v779_v13, 0.0 }
 0x138   : > { %1103 = vst.msk [vmem:[%s1701_s16 + $0x18] sm:$0xf] %vm1096_vm0, %v1337_v15  ;;  %v1338_v19 = vpack.c.bf16 %v853_v16, %v853_v16  ;;  %1129 = vst.msk [vmem:[%s1701_s16 + $0x80] sm:$0xf] %vm1096_vm0, %v1363_v17  ;;  %v1364_v20 = vpack.c.bf16 %v879_v18, %v879_v18 }
 0x139   : > { %v679_v21 = vpop.f32.mrb[16].mxu0  ;;  %v783_v22 = vpop.f32.mrb[16].mxu1 }
 0x13a   : > { %1104 = vst.msk [vmem:[%s1701_s16 + $0x1c] sm:$0xf] %vm1096_vm0, %v1338_v19  ;;  %1130 = vst.msk [vmem:[%s1701_s16 + $0x84] sm:$0xf] %vm1096_vm0, %v1364_v20  ;;  %v680_v23 = vadd.f32 %v1691_v3, %v679_v21  ;;  %v681_v24 = vpop.f32.mrb[17].mxu0  ;;  %v784_v25 = vadd.f32 %v1691_v3, %v783_v22  ;;  %v785_v26 = vpop.f32.mrb[17].mxu1 }
 0x13b   : > { %v682_v27 = vpop.f32.mrb[18].mxu0  ;;  %v786_v28 = vpop.f32.mrb[18].mxu1 }
 0x13c   : > { %v854_v29 = vmax.f32 %v680_v23, 0.0  ;;  %v683_v30 = vadd.f32 %v1691_v3, %v682_v27  ;;  %v684_v31 = vpop.f32.mrb[19].mxu0  ;;  %v880_v32 = vmax.f32 %v784_v25, 0.0  ;;  %v787_v33 = vadd.f32 %v1691_v3, %v786_v28  ;;  %v788_v34 = vpop.f32.mrb[19].mxu1 }
 0x13e   : > { %v1339_v35 = vpack.c.bf16 %v854_v29, %v854_v29  ;;  %v855_v36 = vmax.f32 %v683_v30, 0.0  ;;  %v1365_v37 = vpack.c.bf16 %v880_v32, %v880_v32  ;;  %v881_v38 = vmax.f32 %v787_v33, 0.0 }
 0x140   : > { %1105 = vst.msk [vmem:[%s1701_s16 + $0x20] sm:$0xf] %vm1096_vm0, %v1339_v35  ;;  %v1340_v39 = vpack.c.bf16 %v855_v36, %v855_v36  ;;  %1131 = vst.msk [vmem:[%s1701_s16 + $0x88] sm:$0xf] %vm1096_vm0, %v1365_v37  ;;  %v1366_v40 = vpack.c.bf16 %v881_v38, %v881_v38 }
 0x141   : > { %v687_v41 = vpop.f32.mrb[20].mxu0  ;;  %v791_v42 = vpop.f32.mrb[20].mxu1 }
 0x142   : > { %1106 = vst.msk [vmem:[%s1701_s16 + $0x24] sm:$0xf] %vm1096_vm0, %v1340_v39  ;;  %1132 = vst.msk [vmem:[%s1701_s16 + $0x8c] sm:$0xf] %vm1096_vm0, %v1366_v40  ;;  %v688_v43 = vadd.f32 %v1691_v3, %v687_v41  ;;  %v689_v44 = vpop.f32.mrb[21].mxu0  ;;  %v792_v45 = vadd.f32 %v1691_v3, %v791_v42  ;;  %v793_v46 = vpop.f32.mrb[21].mxu1 }
 0x143   : > { %v690_v47 = vpop.f32.mrb[22].mxu0  ;;  %v794_v48 = vpop.f32.mrb[22].mxu1 }
 0x144   : > { %v856_v49 = vmax.f32 %v688_v43, 0.0  ;;  %v691_v50 = vadd.f32 %v1691_v3, %v690_v47  ;;  %v692_v51 = vpop.f32.mrb[23].mxu0  ;;  %v882_v52 = vmax.f32 %v792_v45, 0.0  ;;  %v795_v53 = vadd.f32 %v1691_v3, %v794_v48  ;;  %v796_v54 = vpop.f32.mrb[23].mxu1 }
 0x146   : > { %v1341_v55 = vpack.c.bf16 %v856_v49, %v856_v49  ;;  %v857_v56 = vmax.f32 %v691_v50, 0.0  ;;  %v1367_v57 = vpack.c.bf16 %v882_v52, %v882_v52  ;;  %v883_v58 = vmax.f32 %v795_v53, 0.0 }
 0x148   : > { %1107 = vst.msk [vmem:[%s1701_s16 + $0x28] sm:$0xf] %vm1096_vm0, %v1341_v55  ;;  %v1342_v59 = vpack.c.bf16 %v857_v56, %v857_v56  ;;  %1133 = vst.msk [vmem:[%s1701_s16 + $0x90] sm:$0xf] %vm1096_vm0, %v1367_v57  ;;  %v1368_v60 = vpack.c.bf16 %v883_v58, %v883_v58 }
 0x149   : > { %v695_v61 = vpop.f32.mrb[24].mxu0  ;;  %v799_v62 = vpop.f32.mrb[24].mxu1 }
 0x14a   : > { %1108 = vst.msk [vmem:[%s1701_s16 + $0x2c] sm:$0xf] %vm1096_vm0, %v1342_v59  ;;  %1134 = vst.msk [vmem:[%s1701_s16 + $0x94] sm:$0xf] %vm1096_vm0, %v1368_v60  ;;  %v696_v63 = vadd.f32 %v1691_v3, %v695_v61  ;;  %v697_v0 = vpop.f32.mrb[25].mxu0  ;;  %v800_v1 = vadd.f32 %v1691_v3, %v799_v62  ;;  %v801_v2 = vpop.f32.mrb[25].mxu1 }
 0x14b   : > { %v698_v4 = vpop.f32.mrb[26].mxu0  ;;  %v802_v5 = vpop.f32.mrb[26].mxu1 }
 0x14c   : > { %v858_v6 = vmax.f32 %v696_v63, 0.0  ;;  %v699_v7 = vadd.f32 %v1691_v3, %v698_v4  ;;  %v700_v8 = vpop.f32.mrb[27].mxu0  ;;  %v884_v9 = vmax.f32 %v800_v1, 0.0  ;;  %v803_v10 = vadd.f32 %v1691_v3, %v802_v5  ;;  %v804_v11 = vpop.f32.mrb[27].mxu1 }
 0x14e   : > { %v1343_v12 = vpack.c.bf16 %v858_v6, %v858_v6  ;;  %v859_v13 = vmax.f32 %v699_v7, 0.0  ;;  %v1369_v14 = vpack.c.bf16 %v884_v9, %v884_v9  ;;  %v885_v15 = vmax.f32 %v803_v10, 0.0 }
 0x150   : > { %1109 = vst.msk [vmem:[%s1701_s16 + $0x30] sm:$0xf] %vm1096_vm0, %v1343_v12  ;;  %v1344_v16 = vpack.c.bf16 %v859_v13, %v859_v13  ;;  %1135 = vst.msk [vmem:[%s1701_s16 + $0x98] sm:$0xf] %vm1096_vm0, %v1369_v14  ;;  %v1370_v17 = vpack.c.bf16 %v885_v15, %v885_v15 }
 0x151   : > { %v703_v18 = vpop.f32.mrb[28].mxu0  ;;  %v807_v19 = vpop.f32.mrb[28].mxu1 }
 0x152   : > { %1110 = vst.msk [vmem:[%s1701_s16 + $0x34] sm:$0xf] %vm1096_vm0, %v1344_v16  ;;  %1136 = vst.msk [vmem:[%s1701_s16 + $0x9c] sm:$0xf] %vm1096_vm0, %v1370_v17  ;;  %v704_v20 = vadd.f32 %v1691_v3, %v703_v18  ;;  %v705_v21 = vpop.f32.mrb[29].mxu0  ;;  %v808_v22 = vadd.f32 %v1691_v3, %v807_v19  ;;  %v809_v23 = vpop.f32.mrb[29].mxu1 }
 0x153   : > { %v706_v24 = vpop.f32.mrb[30].mxu0  ;;  %v810_v25 = vpop.f32.mrb[30].mxu1 }
 0x154   : > { %v860_v26 = vmax.f32 %v704_v20, 0.0  ;;  %v707_v27 = vadd.f32 %v1691_v3, %v706_v24  ;;  %v708_v28 = vpop.f32.mrb[31].mxu0  ;;  %v886_v29 = vmax.f32 %v808_v22, 0.0  ;;  %v811_v30 = vadd.f32 %v1691_v3, %v810_v25  ;;  %v812_v31 = vpop.f32.mrb[31].mxu1 }
 0x156   : > { %v1345_v32 = vpack.c.bf16 %v860_v26, %v860_v26  ;;  %v861_v33 = vmax.f32 %v707_v27, 0.0  ;;  %v1371_v34 = vpack.c.bf16 %v886_v29, %v886_v29  ;;  %v887_v35 = vmax.f32 %v811_v30, 0.0 }
 0x158   : > { %1111 = vst.msk [vmem:[%s1701_s16 + $0x38] sm:$0xf] %vm1096_vm0, %v1345_v32  ;;  %v1346_v36 = vpack.c.bf16 %v861_v33, %v861_v33  ;;  %1137 = vst.msk [vmem:[%s1701_s16 + $0xa0] sm:$0xf] %vm1096_vm0, %v1371_v34  ;;  %v1372_v37 = vpack.c.bf16 %v887_v35, %v887_v35 }
 0x159   : > { %v711_v38 = vpop.f32.mrb[32].mxu0  ;;  %v815_v39 = vpop.f32.mrb[32].mxu1 }
 0x15a   : > { %1112 = vst.msk [vmem:[%s1701_s16 + $0x3c] sm:$0xf] %vm1096_vm0, %v1346_v36  ;;  %1138 = vst.msk [vmem:[%s1701_s16 + $0xa4] sm:$0xf] %vm1096_vm0, %v1372_v37  ;;  %v712_v40 = vadd.f32 %v1691_v3, %v711_v38  ;;  %v713_v41 = vpop.f32.mrb[33].mxu0  ;;  %v816_v42 = vadd.f32 %v1691_v3, %v815_v39  ;;  %v817_v43 = vpop.f32.mrb[33].mxu1 }
 0x15b   : > { %v714_v44 = vpop.f32.mrb[34].mxu0  ;;  %v818_v45 = vpop.f32.mrb[34].mxu1 }
 0x15c   : > { %v862_v46 = vmax.f32 %v712_v40, 0.0  ;;  %v715_v47 = vadd.f32 %v1691_v3, %v714_v44  ;;  %v716_v48 = vpop.f32.mrb[35].mxu0  ;;  %v888_v49 = vmax.f32 %v816_v42, 0.0  ;;  %v819_v50 = vadd.f32 %v1691_v3, %v818_v45  ;;  %v820_v51 = vpop.f32.mrb[35].mxu1 }
 0x15e   : > { %v1347_v52 = vpack.c.bf16 %v862_v46, %v862_v46  ;;  %v863_v53 = vmax.f32 %v715_v47, 0.0  ;;  %v1373_v54 = vpack.c.bf16 %v888_v49, %v888_v49  ;;  %v889_v55 = vmax.f32 %v819_v50, 0.0 }
 0x160   : > { %1113 = vst.msk [vmem:[%s1701_s16 + $0x40] sm:$0xf] %vm1096_vm0, %v1347_v52  ;;  %v1348_v56 = vpack.c.bf16 %v863_v53, %v863_v53  ;;  %1139 = vst.msk [vmem:[%s1701_s16 + $0xa8] sm:$0xf] %vm1096_vm0, %v1373_v54  ;;  %v1374_v57 = vpack.c.bf16 %v889_v55, %v889_v55 }
 0x161   : > { %v719_v58 = vpop.f32.mrb[36].mxu0  ;;  %v823_v59 = vpop.f32.mrb[36].mxu1 }
 0x162   : > { %1114 = vst.msk [vmem:[%s1701_s16 + $0x44] sm:$0xf] %vm1096_vm0, %v1348_v56  ;;  %1140 = vst.msk [vmem:[%s1701_s16 + $0xac] sm:$0xf] %vm1096_vm0, %v1374_v57  ;;  %v720_v60 = vadd.f32 %v1691_v3, %v719_v58  ;;  %v721_v61 = vpop.f32.mrb[37].mxu0  ;;  %v824_v62 = vadd.f32 %v1691_v3, %v823_v59  ;;  %v825_v63 = vpop.f32.mrb[37].mxu1 }
 0x163   : > { %v722_v0 = vpop.f32.mrb[38].mxu0  ;;  %v826_v1 = vpop.f32.mrb[38].mxu1 }
 0x164   : > { %v864_v2 = vmax.f32 %v720_v60, 0.0  ;;  %v723_v4 = vadd.f32 %v1691_v3, %v722_v0  ;;  %v724_v5 = vpop.f32.mrb[39].mxu0  ;;  %v890_v6 = vmax.f32 %v824_v62, 0.0  ;;  %v827_v7 = vadd.f32 %v1691_v3, %v826_v1  ;;  %v828_v8 = vpop.f32.mrb[39].mxu1 }
 0x166   : > { %v1349_v9 = vpack.c.bf16 %v864_v2, %v864_v2  ;;  %v865_v10 = vmax.f32 %v723_v4, 0.0  ;;  %v1375_v11 = vpack.c.bf16 %v890_v6, %v890_v6  ;;  %v891_v12 = vmax.f32 %v827_v7, 0.0 }
 0x168   : > { %1115 = vst.msk [vmem:[%s1701_s16 + $0x48] sm:$0xf] %vm1096_vm0, %v1349_v9  ;;  %v1350_v13 = vpack.c.bf16 %v865_v10, %v865_v10  ;;  %1141 = vst.msk [vmem:[%s1701_s16 + $0xb0] sm:$0xf] %vm1096_vm0, %v1375_v11  ;;  %v1376_v14 = vpack.c.bf16 %v891_v12, %v891_v12 }
 0x169   : > { %v727_v15 = vpop.f32.mrb[40].mxu0  ;;  %v831_v16 = vpop.f32.mrb[40].mxu1 }
 0x16a   : > { %1116 = vst.msk [vmem:[%s1701_s16 + $0x4c] sm:$0xf] %vm1096_vm0, %v1350_v13  ;;  %1142 = vst.msk [vmem:[%s1701_s16 + $0xb4] sm:$0xf] %vm1096_vm0, %v1376_v14  ;;  %v728_v17 = vadd.f32 %v1691_v3, %v727_v15  ;;  %v729_v18 = vpop.f32.mrb[41].mxu0  ;;  %v832_v19 = vadd.f32 %v1691_v3, %v831_v16  ;;  %v833_v20 = vpop.f32.mrb[41].mxu1 }
 0x16b   : > { %v730_v21 = vpop.f32.mrb[42].mxu0  ;;  %v834_v22 = vpop.f32.mrb[42].mxu1 }
 0x16c   : > { %v866_v23 = vmax.f32 %v728_v17, 0.0  ;;  %v731_v24 = vadd.f32 %v1691_v3, %v730_v21  ;;  %v732_v25 = vpop.f32.mrb[43].mxu0  ;;  %v892_v26 = vmax.f32 %v832_v19, 0.0  ;;  %v835_v27 = vadd.f32 %v1691_v3, %v834_v22  ;;  %v836_v28 = vpop.f32.mrb[43].mxu1 }
 0x16e   : > { %v1351_v29 = vpack.c.bf16 %v866_v23, %v866_v23  ;;  %v867_v30 = vmax.f32 %v731_v24, 0.0  ;;  %v1377_v31 = vpack.c.bf16 %v892_v26, %v892_v26  ;;  %v893_v32 = vmax.f32 %v835_v27, 0.0 }
 0x170   : > { %1117 = vst.msk [vmem:[%s1701_s16 + $0x50] sm:$0xf] %vm1096_vm0, %v1351_v29  ;;  %v1352_v33 = vpack.c.bf16 %v867_v30, %v867_v30  ;;  %1143 = vst.msk [vmem:[%s1701_s16 + $0xb8] sm:$0xf] %vm1096_vm0, %v1377_v31  ;;  %v1378_v34 = vpack.c.bf16 %v893_v32, %v893_v32 }
 0x171   : > { %v735_v35 = vpop.f32.mrb[44].mxu0  ;;  %v839_v36 = vpop.f32.mrb[44].mxu1 }
 0x172   : > { %1118 = vst.msk [vmem:[%s1701_s16 + $0x54] sm:$0xf] %vm1096_vm0, %v1352_v33  ;;  %1144 = vst.msk [vmem:[%s1701_s16 + $0xbc] sm:$0xf] %vm1096_vm0, %v1378_v34  ;;  %v736_v37 = vadd.f32 %v1691_v3, %v735_v35  ;;  %v737_v38 = vpop.f32.mrb[45].mxu0  ;;  %v840_v39 = vadd.f32 %v1691_v3, %v839_v36  ;;  %v841_v40 = vpop.f32.mrb[45].mxu1 }
 0x173   : > { %v738_v41 = vpop.f32.mrb[46].mxu0  ;;  %v842_v42 = vpop.f32.mrb[46].mxu1 }
 0x174   : > { %v868_v43 = vmax.f32 %v736_v37, 0.0  ;;  %v739_v44 = vadd.f32 %v1691_v3, %v738_v41  ;;  %v740_v45 = vpop.f32.mrb[47].mxu0  ;;  %v894_v46 = vmax.f32 %v840_v39, 0.0  ;;  %v843_v47 = vadd.f32 %v1691_v3, %v842_v42  ;;  %v844_v48 = vpop.f32.mrb[47].mxu1 }
 0x176   : > { %v1353_v49 = vpack.c.bf16 %v868_v43, %v868_v43  ;;  %v869_v50 = vmax.f32 %v739_v44, 0.0  ;;  %v1379_v51 = vpack.c.bf16 %v894_v46, %v894_v46  ;;  %v895_v52 = vmax.f32 %v843_v47, 0.0 }
 0x178   : > { %1119 = vst.msk [vmem:[%s1701_s16 + $0x58] sm:$0xf] %vm1096_vm0, %v1353_v49  ;;  %v1354_v53 = vpack.c.bf16 %v869_v50, %v869_v50  ;;  %1145 = vst.msk [vmem:[%s1701_s16 + $0xc0] sm:$0xf] %vm1096_vm0, %v1379_v51  ;;  %v1380_v54 = vpack.c.bf16 %v895_v52, %v895_v52 }
 0x179   : > { %v743_v55 = vpop.f32.mrb[48].mxu0 }
 0x17a   : > { %1120 = vst.msk [vmem:[%s1701_s16 + $0x5c] sm:$0xf] %vm1096_vm0, %v1354_v53  ;;  %1146 = vst.msk [vmem:[%s1701_s16 + $0xc4] sm:$0xf] %vm1096_vm0, %v1380_v54  ;;  %v744_v56 = vadd.f32 %v1691_v3, %v743_v55  ;;  %v745_v57 = vpop.f32.mrb[49].mxu0 }
 0x17b   : > { %v746_v58 = vpop.f32.mrb[50].mxu0 }
 0x17c   : > { %v870_v59 = vmax.f32 %v744_v56, 0.0  ;;  %v747_v60 = vadd.f32 %v1691_v3, %v746_v58  ;;  %v748_v61 = vpop.f32.mrb[51].mxu0 }
 0x17e   : > { %v1355_v62 = vpack.c.bf16 %v870_v59, %v870_v59  ;;  %v871_v63 = vmax.f32 %v747_v60, 0.0 }
 0x180   : > { %1121 = vst.msk [vmem:[%s1701_s16 + $0x60] sm:$0xf] %vm1096_vm0, %v1355_v62  ;;  %v1356_v0 = vpack.c.bf16 %v871_v63, %v871_v63 }
 0x182   : > { %1122 = vst.msk [vmem:[%s1701_s16 + $0x64] sm:$0xf] %vm1096_vm0, %v1356_v0 }
 0x183 PF: > { %s13_s12 = sadd.s32 1, %s1519_s12  }
 0x184   : > { %p10_p4 = scmp.ge.s32.totalorder %s13_s12, 4  }
 0x186   :  { %12 = sbr.rel (!%p10_p4) target bundleno = 1 (0x1), region = 62 }

// kernel: dqn_forward.5
= control target key start
LH: loop header
LB: loop body
LE: loop exit
PB: predicated region body
PF: predicated region fallthrough
CT: control target
= control target key end

     0   :  { %s1555_s12 = smov 0   ;;  %s1557_s13 = smov 0   ;;  %s1812_s0 = inlined_call_operand.vmem [shape: bf16[162,512], index: 0, kind: input, shape index: {}]   ;;  %s1813_s1 = inlined_call_operand.vmem [shape: bf16[512,64], index: 1, kind: input, shape index: {}]   ;;  %s1814_s2 = inlined_call_operand.vmem [shape: f32[1,64], index: 2, kind: input, shape index: {}]   ;;  %s1815_s3 = inlined_call_operand.vmem [shape: bf16[162,64], index: 3, kind: output, shape index: {}]  }
   0x1   :  { %s1559_s14 = smov 0  }
   0x2 LB: > { %s1568_s15 = sadd.s32 4294967295, %s1501_s14   ;;  %s1570_s16 = sadd.s32 1, %s1501_s14   ;;  %s1501_s14 = sphi %s1559_s14, %s1822_s14   ;;  %s1497_s13 = sphi %s1557_s13, %s1821_s13   ;;  %s1493_s12 = sphi %s1555_s12, %s1820_s12  }
   0x3   : > { %s85_s17 = ssub.s32 %s1501_s14, %s1570_s16  ;;  %s88_s18 = sadd.s32 1, %s1497_s13 }
   0x4   : > { %p86_p0 = scmp.eq.s32.totalorder %s85_s17, 0  ;;  %p98_p1 = scmp.ne.s32.totalorder %s1497_s13, %s1493_s12 }
   0x5   : > { %p99_p2 = scmp.eq.s32.totalorder %s1568_s15, 1  ;;  %p1087_p3 = scmp.ge.s32.totalorder %s1501_s14, 1 }
   0x6   : > { %s1578_s19 = scalar_select %p86_p0, %s1497_s13, %s88_s18  }
   0x7   : > { %p1580_p4 = por %p99_p2, %p98_p1  ;;  %p149_p5 = scmp.lt.s32.totalorder %s1501_s14, 3 }
   0x9   : > { %p150_p6 = pnand %p1087_p3, %p149_p5 }
   0xa   : > { %v1377_v0 = vld [vmem:[%s1813_s1 + $0x40] sm:$0xff] (!%p150_p6)   ;;  %v1381_v4 = vld [vmem:[%s1813_s1 + $0x48] sm:$0xff] (!%p150_p6)   ;;  %v1385_v8 = vld [vmem:[%s1813_s1 + $0x50] sm:$0xff] (!%p150_p6)   ;;  %s1630_s30 = smul.u32 (!%p150_p6), 11, %s1568_s15  ;;  %s175_s5 = sand.u32 (!%p150_p6), 1, %s1493_s12   ;;  %vm816_vm0 = vcmask (!%p150_p6), 519168  }
   0xb   : > { %153 = sbr.rel (%p150_p6) target bundleno = 377 (0x179), region = 32  ;;  %v1378_v1 = vld [vmem:[%s1813_s1 + $0xc0] sm:$0xff] (!%p150_p6)   ;;  %1183 = vmatprep.subr.bf16.mxu0 (!%p150_p6), %v1377_v0  ;;  %v1382_v5 = vld [vmem:[%s1813_s1 + $0xc8] sm:$0xff] (!%p150_p6)   ;;  %v1386_v9 = vld [vmem:[%s1813_s1 + $0xd0] sm:$0xff] (!%p150_p6)  }
   0xc   : > { %v1379_v2 = vld [vmem:[%s1813_s1] sm:$0xff] (!%p150_p6)   ;;  %1235 = vmatprep.subr.bf16.mxu1 (!%p150_p6), %v1378_v1  ;;  %v1383_v6 = vld [vmem:[%s1813_s1 + $0x8] sm:$0xff] (!%p150_p6)   ;;  %v1387_v10 = vld [vmem:[%s1813_s1 + $0x10] sm:$0xff] (!%p150_p6)   ;;  %p184_p7 = scmp.lt.s32.totalorder (!%p150_p6), %s1630_s30, 20  ;;  %s1287_s6 = smul.u32 (!%p150_p6), 44, %s175_s5 }
   0xd   : > { %v1380_v3 = vld [vmem:[%s1813_s1 + $0x80] sm:$0xff] (!%p150_p6)   ;;  %1184 = vmatpush3.bf16.msra.mxu0 (!%p150_p6), %v1379_v2  ;;  %v1384_v7 = vld [vmem:[%s1813_s1 + $0x88] sm:$0xff] (!%p150_p6)   ;;  %v1388_v11 = vld [vmem:[%s1813_s1 + $0x90] sm:$0xff] (!%p150_p6)  }
   0xe   : > { %1236 = vmatpush3.bf16.msra.mxu1 (!%p150_p6), %v1380_v3  ;;  %1185 = vmatprep.subr.bf16.mxu0 (!%p150_p6), %v1381_v4  ;;  %v1389_v12 = vld [vmem:[%s1813_s1 + $0x58] sm:$0xff] (!%p150_p6)   ;;  %v1393_v16 = vld [vmem:[%s1813_s1 + $0x60] sm:$0xff] (!%p150_p6)   ;;  %v1397_v20 = vld [vmem:[%s1813_s1 + $0x68] sm:$0xff] (!%p150_p6)   ;;  %s1720_s12 = scalar_lea.vmem (!%p150_p6), [#allocation2], %s1287_s6  }
   0xf   : > { %1237 = vmatprep.subr.bf16.mxu1 (!%p150_p6), %v1382_v5  ;;  %v1390_v13 = vld [vmem:[%s1813_s1 + $0xd8] sm:$0xff] (!%p150_p6)   ;;  %v1394_v17 = vld [vmem:[%s1813_s1 + $0xe0] sm:$0xff] (!%p150_p6)   ;;  %v1398_v21 = vld [vmem:[%s1813_s1 + $0xe8] sm:$0xff] (!%p150_p6)  }
  0x10   : > { %v1391_v14 = vld [vmem:[%s1813_s1 + $0x18] sm:$0xff] (!%p150_p6)   ;;  %v1395_v18 = vld [vmem:[%s1813_s1 + $0x20] sm:$0xff] (!%p150_p6)   ;;  %v1399_v22 = vld [vmem:[%s1813_s1 + $0x28] sm:$0xff] (!%p150_p6)  }
  0x11   : > { %1186 = vmatpush3.bf16.msra.mxu0 (!%p150_p6), %v1383_v6  ;;  %v1392_v15 = vld [vmem:[%s1813_s1 + $0x98] sm:$0xff] (!%p150_p6)   ;;  %v1396_v19 = vld [vmem:[%s1813_s1 + $0xa0] sm:$0xff] (!%p150_p6)   ;;  %v1400_v23 = vld [vmem:[%s1813_s1 + $0xa8] sm:$0xff] (!%p150_p6)  }
  0x12   : > { %1238 = vmatpush3.bf16.msra.mxu1 %v1384_v7  ;;  %1187 = vmatprep.subr.bf16.mxu0 %v1385_v8  ;;  %s185_s26 = scalar_select %p184_p7, %s1630_s30, 20  ;;  %v1401_v24 = vld [vmem:[%s1813_s1 + $0x70] sm:$0xff]   ;;  %v1405_v28 = vld [vmem:[%s1813_s1 + $0x78] sm:$0xff]   ;;  %v1715_v60 = vld [vmem:[%s1814_s2] ss:$0 sm:$0xff] }
  0x13   : > { %1239 = vmatprep.subr.bf16.mxu1 %v1386_v9  ;;  %v1402_v25 = vld [vmem:[%s1813_s1 + $0xf0] sm:$0xff]   ;;  %v1406_v29 = vld [vmem:[%s1813_s1 + $0xf8] sm:$0xff]   ;;  %s836_s7 = ssub.s32 (%p1580_p4), 21, %s1630_s30  ;;  %s1182_s8 = smul.u32 (%p1580_p4), 44, %s1568_s15 }
  0x14   : > { %v1403_v26 = vld [vmem:[%s1813_s1 + $0x30] sm:$0xff]   ;;  %s1170_s9 = sshll.u32 %s185_s26, 4  ;;  %v1407_v30 = vld [vmem:[%s1813_s1 + $0x38] sm:$0xff]   ;;  %p837_p8 = scmp.lt.s32.totalorder (%p1580_p4), %s836_s7, 11 }
  0x15   : > { %1188 = vmatpush3.bf16.msra.mxu0 %v1387_v10  ;;  %v1404_v27 = vld [vmem:[%s1813_s1 + $0xb0] sm:$0xff]   ;;  %s1682_s24 = scalar_lea.vmem %s1812_s0, %s1170_s9  ;;  %v1408_v31 = vld [vmem:[%s1813_s1 + $0xb8] sm:$0xff]   ;;  %s1760_s11 = scalar_lea.vmem (%p1580_p4), %s1815_s3, %s1182_s8  }
  0x16   : > { %1240 = vmatpush3.bf16.msra.mxu1 %v1388_v11  ;;  %1189 = vmatprep.subr.bf16.mxu0 %v1389_v12  ;;  %v1409_v32 = vld [vmem:[%s1682_s24] ss:$16 sps:$4 sm:$0xff]   ;;  %v1411_v33 = vld [vmem:[%s1682_s24 + $0x4] ss:$16 sps:$4 sm:$0xff]   ;;  %v1412_v34 = vld [vmem:[%s1682_s24 + $0x8] ss:$16 sps:$4 sm:$0xff]  }
  0x17   : > { %1241 = vmatprep.subr.bf16.mxu1 %v1390_v13  ;;  %v1414_v35 = vld [vmem:[%s1682_s24 + $0xc] ss:$16 sps:$4 sm:$0xff]   ;;  %632 = vmatprep.mubr.bf16.mxu0 %v1411_v33  ;;  %v1415_v36 = vld [vmem:[%s1682_s24 + $0x24] ss:$16 sps:$4 sm:$0xff]   ;;  %v1419_v38 = vld [vmem:[%s1682_s24 + $0x20] ss:$16 sps:$4 sm:$0xff]  }
  0x18   : > { %712 = vmatprep.mubr.bf16.mxu1 %v1414_v35  ;;  %v1417_v37 = vld [vmem:[%s1682_s24 + $0x2c] ss:$16 sps:$4 sm:$0xff]   ;;  %v1420_v39 = vld [vmem:[%s1682_s24 + $0x28] ss:$16 sps:$4 sm:$0xff]   ;;  %v1421_v40 = vld [vmem:[%s1682_s24 + $0x44] ss:$16 sps:$4 sm:$0xff]  }
  0x19   : > { %1190 = vmatpush3.bf16.msra.mxu0 %v1391_v14  ;;  %v1423_v41 = vld [vmem:[%s1682_s24 + $0x4c] ss:$16 sps:$4 sm:$0xff]   ;;  %v1425_v42 = vld [vmem:[%s1682_s24 + $0x40] ss:$16 sps:$4 sm:$0xff]   ;;  %v1426_v43 = vld [vmem:[%s1682_s24 + $0x48] ss:$16 sps:$4 sm:$0xff]  }
  0x1a   : > { %1242 = vmatpush3.bf16.msra.mxu1 %v1392_v15  ;;  %1191 = vmatprep.subr.bf16.mxu0 %v1393_v16  ;;  %v1427_v44 = vld [vmem:[%s1682_s24 + $0x64] ss:$16 sps:$4 sm:$0xff]   ;;  %v1429_v45 = vld [vmem:[%s1682_s24 + $0x6c] ss:$16 sps:$4 sm:$0xff]   ;;  %v1431_v46 = vld [vmem:[%s1682_s24 + $0x60] ss:$16 sps:$4 sm:$0xff]  }
  0x1b   : > { %1243 = vmatprep.subr.bf16.mxu1 %v1394_v17  ;;  %v1432_v47 = vld [vmem:[%s1682_s24 + $0x68] ss:$16 sps:$4 sm:$0xff]   ;;  %v1433_v48 = vld [vmem:[%s1682_s24 + $0x84] ss:$16 sps:$4 sm:$0xff]   ;;  %v1435_v49 = vld [vmem:[%s1682_s24 + $0x8c] ss:$16 sps:$4 sm:$0xff]  }
  0x1c   : > { %v221_v50 = vld [vmem:[%s1682_s24 + $0xa0] sm:$0xff]  ;;  %v222_v51 = vld [vmem:[%s1682_s24 + $0xa8] sm:$0xff] }
  0x1d   : > { %1192 = vmatpush3.bf16.msra.mxu0 %v1395_v18  ;;  %v1437_v52 = vld [vmem:[%s1682_s24 + $0x80] ss:$16 sps:$4 sm:$0xff]   ;;  %v1438_v53 = vld [vmem:[%s1682_s24 + $0x88] ss:$16 sps:$4 sm:$0xff]   ;;  %v1112_v54 = vcombine.high %v221_v50, %v221_v50  ;;  %v1114_v55 = vcombine.high %v222_v51, %v222_v51  ;;  %v1111_v56 = vcombine.low %v221_v50, %v221_v50  ;;  %v1113_v57 = vcombine.low %v222_v51, %v222_v51 }
  0x1e   : > { %1244 = vmatpush3.bf16.msra.mxu1 %v1396_v19  ;;  %1193 = vmatprep.subr.bf16.mxu0 %v1397_v20 }
  0x1f   : > { %1245 = vmatprep.subr.bf16.mxu1 %v1398_v21 }
  0x21   : > { %1194 = vmatpush3.bf16.msra.mxu0 %v1399_v22 }
  0x22   : > { %1246 = vmatpush3.bf16.msra.mxu1 %v1400_v23  ;;  %1195 = vmatprep.subr.bf16.mxu0 %v1401_v24 }
  0x23   : > { %1247 = vmatprep.subr.bf16.mxu1 %v1402_v25 }
  0x25   : > { %1196 = vmatpush3.bf16.msra.mxu0 %v1403_v26 }
  0x26   : > { %1248 = vmatpush3.bf16.msra.mxu1 %v1404_v27  ;;  %1197 = vmatprep.subr.bf16.mxu0 %v1405_v28 }
  0x27   : > { %1249 = vmatprep.subr.bf16.mxu1 %v1406_v29 }
  0x29   : > { %1198 = vmatpush3.bf16.msra.mxu0 %v1407_v30 }
  0x2a   : > { %1250 = vmatpush3.bf16.msra.mxu1 %v1408_v31 }
  0x2c   : > { %633 = vmatmul.mubr.bf16.vlgmr.msra.gmra.mrb[0].mxu0 %v1409_v32 }
  0x2d   : > { %713 = vmatmul.mubr.bf16.vlgmr.msra.gmra.mrb[0].mxu1 %v1412_v34  ;;  %640 = vmatprep.mubr.bf16.mxu0 %v1415_v36 }
  0x2e   : > { %720 = vmatprep.mubr.bf16.mxu1 %v1417_v37 }
  0x34   : > { %641 = vmatmul.mubr.bf16.gmra.mrb[4].mxu0 %v1419_v38 }
  0x35   : > { %721 = vmatmul.mubr.bf16.gmra.mrb[4].mxu1 %v1420_v39  ;;  %648 = vmatprep.mubr.bf16.mxu0 %v1421_v40 }
  0x36   : > { %728 = vmatprep.mubr.bf16.mxu1 %v1423_v41 }
  0x3c   : > { %649 = vmatmul.mubr.bf16.gmra.mrb[8].mxu0 %v1425_v42 }
  0x3d   : > { %729 = vmatmul.mubr.bf16.gmra.mrb[8].mxu1 %v1426_v43  ;;  %656 = vmatprep.mubr.bf16.mxu0 %v1427_v44 }
  0x3e   : > { %736 = vmatprep.mubr.bf16.mxu1 %v1429_v45 }
  0x44   : > { %657 = vmatmul.mubr.bf16.gmra.mrb[12].mxu0 %v1431_v46 }
  0x45   : > { %737 = vmatmul.mubr.bf16.gmra.mrb[12].mxu1 %v1432_v47  ;;  %664 = vmatprep.mubr.bf16.mxu0 %v1433_v48 }
  0x46   : > { %744 = vmatprep.mubr.bf16.mxu1 %v1435_v49 }
  0x4c   : > { %665 = vmatmul.mubr.bf16.gmra.mrb[16].mxu0 %v1437_v52 }
  0x4d   : > { %745 = vmatmul.mubr.bf16.gmra.mrb[16].mxu1 %v1438_v53  ;;  %672 = vmatprep.mubr.bf16.mxu0 %v1112_v54 }
  0x4e   : > { %752 = vmatprep.mubr.bf16.mxu1 %v1114_v55 }
  0x54   : > { %673 = vmatmul.mubr.bf16.gmra.mrb[20].mxu0 %v1111_v56 }
  0x55   : > { %753 = vmatmul.mubr.bf16.gmra.mrb[20].mxu1 %v1113_v57 }
  0xff   : > { %v1199_v58 = vpop.f32.mrb[0].mxu0 }
 0x100   : > { %v1251_v59 = vpop.f32.mrb[0].mxu1  ;;  %v1200_v61 = vpop.f32.mrb[1].mxu0 }
 0x101   : > { %v1201_v62 = vadd.f32 %v1200_v61, %v1199_v58  ;;  %v1252_v63 = vpop.f32.mrb[1].mxu1  ;;  %v1202_v0 = vpop.f32.mrb[2].mxu0 }
 0x102   : > { %v1253_v1 = vadd.f32 %v1252_v63, %v1251_v59  ;;  %v1254_v2 = vpop.f32.mrb[2].mxu1  ;;  %v1203_v3 = vpop.f32.mrb[3].mxu0 }
 0x103   : > { %v635_v4 = vadd.f32 %v1201_v62, %v1715_v60  ;;  %v1204_v5 = vadd.f32 %v1203_v3, %v1202_v0  ;;  %v1255_v6 = vpop.f32.mrb[3].mxu1 }
 0x104   : > { %v1256_v7 = vadd.f32 %v1255_v6, %v1254_v2 }
 0x105   : > { %v715_v8 = vadd.f32 %v1253_v1, %v635_v4  ;;  %v638_v9 = vadd.f32 %v1204_v5, %v1715_v60 }
 0x107   : > { %v760_v10 = vmax.f32 %v715_v8, 0.0  ;;  %v718_v11 = vadd.f32 %v1256_v7, %v638_v9  ;;  %v1205_v12 = vpop.f32.mrb[4].mxu0 }
 0x108   : > { %v1257_v13 = vpop.f32.mrb[4].mxu1  ;;  %v1206_v14 = vpop.f32.mrb[5].mxu0 }
 0x109   : > { %v1171_v15 = vpack.c.bf16 %v760_v10, %v760_v10  ;;  %v761_v16 = vmax.f32 %v718_v11, 0.0  ;;  %v1207_v17 = vadd.f32 %v1206_v14, %v1205_v12  ;;  %v1258_v18 = vpop.f32.mrb[5].mxu1  ;;  %v1208_v19 = vpop.f32.mrb[6].mxu0 }
 0x10a   : > { %v1259_v20 = vadd.f32 %v1258_v18, %v1257_v13  ;;  %v1260_v21 = vpop.f32.mrb[6].mxu1  ;;  %v1209_v22 = vpop.f32.mrb[7].mxu0 }
 0x10b   : > { %817 = vst.msk [vmem:[%s1720_s12] sm:$0xf] %vm816_vm0, %v1171_v15  ;;  %v1172_v23 = vpack.c.bf16 %v761_v16, %v761_v16  ;;  %v643_v24 = vadd.f32 %v1207_v17, %v1715_v60  ;;  %v1210_v25 = vadd.f32 %v1209_v22, %v1208_v19  ;;  %v1261_v26 = vpop.f32.mrb[7].mxu1 }
 0x10c   : > { %v1262_v27 = vadd.f32 %v1261_v26, %v1260_v21 }
 0x10d   : > { %818 = vst.msk [vmem:[%s1720_s12 + $0x4] sm:$0xf] %vm816_vm0, %v1172_v23  ;;  %v723_v28 = vadd.f32 %v1259_v20, %v643_v24  ;;  %v646_v29 = vadd.f32 %v1210_v25, %v1715_v60 }
 0x10f   : > { %v762_v30 = vmax.f32 %v723_v28, 0.0  ;;  %v726_v31 = vadd.f32 %v1262_v27, %v646_v29  ;;  %v1211_v32 = vpop.f32.mrb[8].mxu0 }
 0x110   : > { %v1263_v33 = vpop.f32.mrb[8].mxu1  ;;  %v1212_v34 = vpop.f32.mrb[9].mxu0 }
 0x111   : > { %v1173_v35 = vpack.c.bf16 %v762_v30, %v762_v30  ;;  %v763_v36 = vmax.f32 %v726_v31, 0.0  ;;  %v1213_v37 = vadd.f32 %v1212_v34, %v1211_v32  ;;  %v1264_v38 = vpop.f32.mrb[9].mxu1  ;;  %v1214_v39 = vpop.f32.mrb[10].mxu0 }
 0x112   : > { %v1265_v40 = vadd.f32 %v1264_v38, %v1263_v33  ;;  %v1266_v41 = vpop.f32.mrb[10].mxu1  ;;  %v1215_v42 = vpop.f32.mrb[11].mxu0 }
 0x113   : > { %819 = vst.msk [vmem:[%s1720_s12 + $0x8] sm:$0xf] %vm816_vm0, %v1173_v35  ;;  %v1174_v43 = vpack.c.bf16 %v763_v36, %v763_v36  ;;  %v651_v44 = vadd.f32 %v1213_v37, %v1715_v60  ;;  %v1216_v45 = vadd.f32 %v1215_v42, %v1214_v39  ;;  %v1267_v46 = vpop.f32.mrb[11].mxu1 }
 0x114   : > { %v1268_v47 = vadd.f32 %v1267_v46, %v1266_v41 }
 0x115   : > { %820 = vst.msk [vmem:[%s1720_s12 + $0xc] sm:$0xf] %vm816_vm0, %v1174_v43  ;;  %v731_v48 = vadd.f32 %v1265_v40, %v651_v44  ;;  %v654_v49 = vadd.f32 %v1216_v45, %v1715_v60 }
 0x117   : > { %v764_v50 = vmax.f32 %v731_v48, 0.0  ;;  %v734_v51 = vadd.f32 %v1268_v47, %v654_v49  ;;  %v1217_v52 = vpop.f32.mrb[12].mxu0 }
 0x118   : > { %v1269_v53 = vpop.f32.mrb[12].mxu1  ;;  %v1218_v54 = vpop.f32.mrb[13].mxu0 }
 0x119   : > { %v1175_v55 = vpack.c.bf16 %v764_v50, %v764_v50  ;;  %v765_v56 = vmax.f32 %v734_v51, 0.0  ;;  %v1219_v57 = vadd.f32 %v1218_v54, %v1217_v52  ;;  %v1270_v58 = vpop.f32.mrb[13].mxu1  ;;  %v1220_v59 = vpop.f32.mrb[14].mxu0 }
 0x11a   : > { %v1271_v61 = vadd.f32 %v1270_v58, %v1269_v53  ;;  %v1272_v62 = vpop.f32.mrb[14].mxu1  ;;  %v1221_v63 = vpop.f32.mrb[15].mxu0 }
 0x11b   : > { %821 = vst.msk [vmem:[%s1720_s12 + $0x10] sm:$0xf] %vm816_vm0, %v1175_v55  ;;  %v1176_v0 = vpack.c.bf16 %v765_v56, %v765_v56  ;;  %v659_v1 = vadd.f32 %v1219_v57, %v1715_v60  ;;  %v1222_v2 = vadd.f32 %v1221_v63, %v1220_v59  ;;  %v1273_v3 = vpop.f32.mrb[15].mxu1 }
 0x11c   : > { %v1274_v4 = vadd.f32 %v1273_v3, %v1272_v62 }
 0x11d   : > { %822 = vst.msk [vmem:[%s1720_s12 + $0x14] sm:$0xf] %vm816_vm0, %v1176_v0  ;;  %v739_v5 = vadd.f32 %v1271_v61, %v659_v1  ;;  %v662_v6 = vadd.f32 %v1222_v2, %v1715_v60 }
 0x11f   : > { %v766_v7 = vmax.f32 %v739_v5, 0.0  ;;  %v742_v8 = vadd.f32 %v1274_v4, %v662_v6  ;;  %v1223_v9 = vpop.f32.mrb[16].mxu0 }
 0x120   : > { %v1275_v10 = vpop.f32.mrb[16].mxu1  ;;  %v1224_v11 = vpop.f32.mrb[17].mxu0 }
 0x121   : > { %v1177_v12 = vpack.c.bf16 %v766_v7, %v766_v7  ;;  %v767_v13 = vmax.f32 %v742_v8, 0.0  ;;  %v1225_v14 = vadd.f32 %v1224_v11, %v1223_v9  ;;  %v1276_v15 = vpop.f32.mrb[17].mxu1  ;;  %v1226_v16 = vpop.f32.mrb[18].mxu0 }
 0x122   : > { %v1277_v17 = vadd.f32 %v1276_v15, %v1275_v10  ;;  %v1278_v18 = vpop.f32.mrb[18].mxu1  ;;  %v1227_v19 = vpop.f32.mrb[19].mxu0 }
 0x123   : > { %823 = vst.msk [vmem:[%s1720_s12 + $0x18] sm:$0xf] %vm816_vm0, %v1177_v12  ;;  %v1178_v20 = vpack.c.bf16 %v767_v13, %v767_v13  ;;  %v667_v21 = vadd.f32 %v1225_v14, %v1715_v60  ;;  %v1228_v22 = vadd.f32 %v1227_v19, %v1226_v16  ;;  %v1279_v23 = vpop.f32.mrb[19].mxu1 }
 0x124   : > { %v1280_v24 = vadd.f32 %v1279_v23, %v1278_v18 }
 0x125   : > { %824 = vst.msk [vmem:[%s1720_s12 + $0x1c] sm:$0xf] %vm816_vm0, %v1178_v20  ;;  %v747_v25 = vadd.f32 %v1277_v17, %v667_v21  ;;  %v670_v26 = vadd.f32 %v1228_v22, %v1715_v60 }
 0x127   : > { %v768_v27 = vmax.f32 %v747_v25, 0.0  ;;  %v750_v28 = vadd.f32 %v1280_v24, %v670_v26  ;;  %v1229_v29 = vpop.f32.mrb[20].mxu0 }
 0x128   : > { %v1281_v30 = vpop.f32.mrb[20].mxu1  ;;  %v1230_v31 = vpop.f32.mrb[21].mxu0 }
 0x129   : > { %v1179_v32 = vpack.c.bf16 %v768_v27, %v768_v27  ;;  %v769_v33 = vmax.f32 %v750_v28, 0.0  ;;  %v1231_v34 = vadd.f32 %v1230_v31, %v1229_v29  ;;  %v1282_v35 = vpop.f32.mrb[21].mxu1  ;;  %v1232_v36 = vpop.f32.mrb[22].mxu0 }
 0x12a   : > { %v1283_v37 = vadd.f32 %v1282_v35, %v1281_v30  ;;  %v1284_v38 = vpop.f32.mrb[22].mxu1  ;;  %v1233_v39 = vpop.f32.mrb[23].mxu0 }
 0x12b   : > { %825 = vst.msk [vmem:[%s1720_s12 + $0x20] sm:$0xf] %vm816_vm0, %v1179_v32  ;;  %v1180_v40 = vpack.c.bf16 %v769_v33, %v769_v33  ;;  %v675_v41 = vadd.f32 %v1231_v34, %v1715_v60  ;;  %v1285_v42 = vpop.f32.mrb[23].mxu1 }
 0x12d   : > { %826 = vst.msk [vmem:[%s1720_s12 + $0x24] sm:$0xf] %vm816_vm0, %v1180_v40  ;;  %v755_v43 = vadd.f32 %v1283_v37, %v675_v41  ;;  %834 = sbr.rel (!%p1580_p4) target bundleno = 377 (0x179), region = 36 }
 0x12f   : > { %v770_v44 = vmax.f32 %v755_v43, 0.0 }
 0x131   : > { %v1181_v45 = vpack.c.bf16 %v770_v44, %v770_v44 }
 0x133   : > { %827 = vst.msk [vmem:[%s1720_s12 + $0x28] sm:$0xf] %vm816_vm0, %v1181_v45 }
 0x134   : > { %s1824_s7 = smov (!%p837_p8, %s836_s7), 11 }
 0x135   : > { %s1158_s14 = sshll.u32 %s1824_s7, 6 }
 0x136   : > { %p1161_p9 = scmp.eq.s32.totalorder %s1158_s14, 0 }
 0x137   : > { %1443 = sdivrem.u32 (!%p1161_p9), %s1824_s7, 11 }
 0x138   : > { %845 = sbr.rel (%p1161_p9) target bundleno = 377 (0x179), region = 40 }
 0x140   : > { %s1766_s20 = spop.drf %1443 }
 0x141   : > { %p1162_p10 = scmp.le.s32.totalorder %s1766_s20, 0 }
 0x142   : > { %s1817_s15 = smov (!%p1162_p10), %s1760_s11  ;;  %s1818_s30 = smov (!%p1162_p10), %s1720_s12 }
 0x143   : > { %1040 = sbr.rel (%p1162_p10) target bundleno = 348 (0x15c), region = 112  ;;  %s1775_s17 = smov (!%p1162_p10), 0  }
 0x144   : > { %s1777_s18 = smov (!%p1162_p10), 0  }
 0x14a LB: >> { %v862_v60 = vld [vmem:[%s1509_s30] sm:$0xf]  ;;  %v864_v46 = vld [vmem:[%s1509_s30 + $0x4] sm:$0xf]  ;;  %v866_v47 = vld [vmem:[%s1509_s30 + $0x8] sm:$0xf]  ;;  %s1517_s18 = sphi %s1777_s18, %s856_s18   ;;  %s1513_s17 = sphi %s1775_s17, %s1819_s17   ;;  %s1509_s30 = sphi %s1818_s30, %s889_s30   ;;  %s1505_s15 = sphi %s1817_s15, %s890_s15  }
 0x14b   : >> { %863 = vst [vmem:[%s1505_s15] sm:$0xf] %v862_v60  ;;  %865 = vst [vmem:[%s1505_s15 + $0x4] sm:$0xf] %v864_v46  ;;  %v868_v48 = vld [vmem:[%s1509_s30 + $0xc] sm:$0xf]  ;;  %s884_s21 = sadd.s32 1, %s1513_s17 }
 0x14c   : >> { %867 = vst [vmem:[%s1505_s15 + $0x8] sm:$0xf] %v866_v47  ;;  %v870_v49 = vld [vmem:[%s1509_s30 + $0x10] sm:$0xf]  ;;  %v872_v50 = vld [vmem:[%s1509_s30 + $0x14] sm:$0xf]  ;;  %p885_p11 = scmp.ge.s32.totalorder %s884_s21, %s1766_s20 }
 0x14d   : >> { %869 = vst [vmem:[%s1505_s15 + $0xc] sm:$0xf] %v868_v48  ;;  %871 = vst [vmem:[%s1505_s15 + $0x10] sm:$0xf] %v870_v49  ;;  %v874_v51 = vld [vmem:[%s1509_s30 + $0x18] sm:$0xf] }
 0x14e   : >> { %873 = vst [vmem:[%s1505_s15 + $0x14] sm:$0xf] %v872_v50  ;;  %v876_v52 = vld [vmem:[%s1509_s30 + $0x1c] sm:$0xf]  ;;  %v878_v53 = vld [vmem:[%s1509_s30 + $0x20] sm:$0xf] }
 0x14f   : >> { %875 = vst [vmem:[%s1505_s15 + $0x18] sm:$0xf] %v874_v51  ;;  %877 = vst [vmem:[%s1505_s15 + $0x1c] sm:$0xf] %v876_v52  ;;  %v880_v54 = vld [vmem:[%s1509_s30 + $0x24] sm:$0xf] }
 0x150   : >> { %879 = vst [vmem:[%s1505_s15 + $0x20] sm:$0xf] %v878_v53  ;;  %v882_v55 = vld [vmem:[%s1509_s30 + $0x28] sm:$0xf]  ;;  %881 = vst [vmem:[%s1505_s15 + $0x24] sm:$0xf] %v880_v54 }
 0x151   : >> { %883 = vst [vmem:[%s1505_s15 + $0x28] sm:$0xf] %v882_v55  ;;  %s1826_s21 = smov (%p885_p11, %s884_s21), 0  ;;  %s856_s18 = sadd.s32 1, %s1517_s18  }
 0x152   : >> { %s887_s22 = smul.u32 44, %s1826_s21  ;;  %p855_p12 = scmp.ge.s32.totalorder %s856_s18, %s1766_s20 }
 0x153   : >> { %s1819_s17 = smov %s1826_s21 }
 0x154   : >> { %s889_s30 = scalar_lea.vmem %s1720_s12, %s887_s22 [#allocation2]   ;;  %s890_s15 = scalar_lea.vmem %s1760_s11, %s887_s22  }
 0x155   : > { %858 = sbr.rel (!%p855_p12) target bundleno = 330 (0x14a), region = 118 }
 0x15c PF: > { %1445 = sdivrem.u32 %s1824_s7, 11 }
 0x15d   : > { %s1163_s23 = smul.u32 44, %s1766_s20 }
 0x15f   : > { %s895_s24 = scalar_lea.vmem %s1720_s12, %s1163_s23 [#allocation2]   ;;  %s897_s25 = scalar_lea.vmem %s1760_s11, %s1163_s23  }
 0x165   : > { %s1446_s26 = spop.drf %1445 }
 0x166   : > { %p1165_p13 = scmp.le.s32.totalorder %s1446_s26, 0 }
 0x167   : > { %s1519_s27 = smov (!%p1165_p13), %s897_s25   ;;  %s1523_s28 = smov (!%p1165_p13), %s895_s24  }
 0x168   : > { %1054 = sbr.rel (%p1165_p13) target bundleno = 377 (0x179), region = 123  ;;  %s1527_s29 = smov (!%p1165_p13), 0  }
 0x169   : > { %s1531_s4 = smov (!%p1165_p13), 0  }
 0x16f LB: >> { %v907_v56 = vld [vmem:[%s1525_s28] sm:$0xf]  ;;  %s909_s5 = sadd.s32 1, %s1529_s29  ;;  %s901_s4 = sadd.s32 1, %s1533_s4   ;;  %s1533_s4 = sphi %s1531_s4, %s901_s4   ;;  %s1529_s29 = sphi %s1527_s29, %s1528_s29   ;;  %s1525_s28 = sphi %s1523_s28, %s914_s28   ;;  %s1521_s27 = sphi %s1519_s27, %s915_s27  }
 0x170   : >> { %908 = vst [vmem:[%s1521_s27] sm:$0xf] %v907_v56  ;;  %p910_p0 = scmp.ge.s32.totalorder %s909_s5, %s1446_s26  ;;  %p900_p1 = scmp.ge.s32.totalorder %s901_s4, %s1446_s26 }
 0x172   : >> { %s1828_s5 = smov (%p910_p0, %s909_s5), 0  ;;  %903 = sbr.rel (!%p900_p1) target bundleno = 367 (0x16f), region = 129 }
 0x173   : >> { %s1166_s6 = sshll.u32 %s1828_s5, 2  ;;  %s1528_s29 = smov %s1828_s5  }
 0x174   : >> { %s914_s28 = scalar_lea.vmem %s895_s24, %s1166_s6 [#allocation2]   ;;  %s915_s27 = scalar_lea.vmem %s897_s25, %s1166_s6  }
 0x179 PF: > { %p10_p2 = scmp.ge.s32.totalorder %s1570_s16, 4   ;;  %s1820_s12 = smov %s1497_s13 }
 0x17a   : > { %s1821_s13 = smov %s1578_s19  ;;  %s1822_s14 = smov %s1570_s16 }
 0x17b   :  { %12 = sbr.rel (!%p10_p2) target bundleno = 2 (0x2), region = 140 }

// kernel: dqn_forward.6
= control target key start
LH: loop header
LB: loop body
LE: loop exit
PB: predicated region body
PF: predicated region fallthrough
CT: control target
= control target key end

     0   :  { %s1568_s12 = smov 0   ;;  %s1570_s13 = smov 0   ;;  %s1809_s0 = inlined_call_operand.vmem [shape: bf16[98,576], index: 0, kind: input, shape index: {}]   ;;  %s1810_s1 = inlined_call_operand.vmem [shape: bf16[576,64], index: 1, kind: input, shape index: {}]   ;;  %s1811_s2 = inlined_call_operand.vmem [shape: f32[1,64], index: 2, kind: input, shape index: {}]   ;;  %s1812_s3 = inlined_call_operand.vmem [shape: bf16[98,64], index: 3, kind: output, shape index: {}]  }
   0x1   :  { %s1572_s14 = smov 0  }
   0x2 LB: > { %s1581_s15 = sadd.s32 4294967295, %s1514_s14   ;;  %s1583_s16 = sadd.s32 1, %s1514_s14   ;;  %s1514_s14 = sphi %s1572_s14, %s1819_s14   ;;  %s1510_s13 = sphi %s1570_s13, %s1818_s13   ;;  %s1506_s12 = sphi %s1568_s12, %s1817_s12  }
   0x3   : > { %s85_s17 = ssub.s32 %s1514_s14, %s1583_s16  ;;  %s88_s18 = sadd.s32 1, %s1510_s13 }
   0x4   : > { %p86_p0 = scmp.eq.s32.totalorder %s85_s17, 0  ;;  %p98_p1 = scmp.ne.s32.totalorder %s1510_s13, %s1506_s12 }
   0x5   : > { %p99_p2 = scmp.eq.s32.totalorder %s1581_s15, 1  ;;  %p1101_p3 = scmp.ge.s32.totalorder %s1514_s14, 1 }
   0x6   : > { %s1591_s19 = scalar_select %p86_p0, %s1510_s13, %s88_s18  }
   0x7   : > { %p1593_p4 = por %p99_p2, %p98_p1  ;;  %p149_p5 = scmp.lt.s32.totalorder %s1514_s14, 3 }
   0x9   : > { %p150_p6 = pnand %p1101_p3, %p149_p5 }
   0xa   : > { %v1394_v0 = vld [vmem:[%s1810_s1 + $0x40] sm:$0xff] (!%p150_p6)   ;;  %v1398_v4 = vld [vmem:[%s1810_s1 + $0x48] sm:$0xff] (!%p150_p6)   ;;  %v1402_v8 = vld [vmem:[%s1810_s1 + $0x50] sm:$0xff] (!%p150_p6)   ;;  %s1640_s28 = smul.u32 (!%p150_p6), 7, %s1581_s15  ;;  %vm609_vm0 = vcmask (!%p150_p6), 523264   ;;  %s175_s17 = sand.u32 (!%p150_p6), 1, %s1506_s12  }
   0xb   : > { %153 = sbr.rel (%p150_p6) target bundleno = 365 (0x16d), region = 32  ;;  %v1395_v1 = vld [vmem:[%s1810_s1 + $0xc0] sm:$0xff] (!%p150_p6)   ;;  %1191 = vmatprep.subr.bf16.mxu0 (!%p150_p6), %v1394_v0  ;;  %v1399_v5 = vld [vmem:[%s1810_s1 + $0xc8] sm:$0xff] (!%p150_p6)   ;;  %v1403_v9 = vld [vmem:[%s1810_s1 + $0xd0] sm:$0xff] (!%p150_p6)   ;;  %vm850_vm1 = vcmask (!%p150_p6), 519168  }
   0xc   : > { %v1396_v2 = vld [vmem:[%s1810_s1] sm:$0xff] (!%p150_p6)   ;;  %1231 = vmatprep.subr.bf16.mxu1 (!%p150_p6), %v1395_v1  ;;  %v1400_v6 = vld [vmem:[%s1810_s1 + $0x8] sm:$0xff] (!%p150_p6)   ;;  %v1404_v10 = vld [vmem:[%s1810_s1 + $0x10] sm:$0xff] (!%p150_p6)   ;;  %p184_p7 = scmp.lt.s32.totalorder (!%p150_p6), %s1640_s28, 12  ;;  %s1303_s18 = smul.u32 (!%p150_p6), 28, %s175_s17 }
   0xd   : > { %v1397_v3 = vld [vmem:[%s1810_s1 + $0x80] sm:$0xff] (!%p150_p6)   ;;  %1192 = vmatpush3.bf16.msra.mxu0 (!%p150_p6), %v1396_v2  ;;  %v1401_v7 = vld [vmem:[%s1810_s1 + $0x88] sm:$0xff] (!%p150_p6)   ;;  %v1405_v11 = vld [vmem:[%s1810_s1 + $0x90] sm:$0xff] (!%p150_p6)  }
   0xe   : > { %1232 = vmatpush3.bf16.msra.mxu1 (!%p150_p6), %v1397_v3  ;;  %1193 = vmatprep.subr.bf16.mxu0 (!%p150_p6), %v1398_v4  ;;  %v1406_v12 = vld [vmem:[%s1810_s1 + $0x58] sm:$0xff] (!%p150_p6)   ;;  %v1410_v16 = vld [vmem:[%s1810_s1 + $0x60] sm:$0xff] (!%p150_p6)   ;;  %v1414_v20 = vld [vmem:[%s1810_s1 + $0x68] sm:$0xff] (!%p150_p6)   ;;  %s1737_s12 = scalar_lea.vmem (!%p150_p6), [#allocation2], %s1303_s18  }
   0xf   : > { %1233 = vmatprep.subr.bf16.mxu1 (!%p150_p6), %v1399_v5  ;;  %v1407_v13 = vld [vmem:[%s1810_s1 + $0xd8] sm:$0xff] (!%p150_p6)   ;;  %v1411_v17 = vld [vmem:[%s1810_s1 + $0xe0] sm:$0xff] (!%p150_p6)   ;;  %v1415_v21 = vld [vmem:[%s1810_s1 + $0xe8] sm:$0xff] (!%p150_p6)  }
  0x10   : > { %v1408_v14 = vld [vmem:[%s1810_s1 + $0x18] sm:$0xff] (!%p150_p6)   ;;  %v1412_v18 = vld [vmem:[%s1810_s1 + $0x20] sm:$0xff] (!%p150_p6)   ;;  %v1416_v22 = vld [vmem:[%s1810_s1 + $0x28] sm:$0xff] (!%p150_p6)  }
  0x11   : > { %1194 = vmatpush3.bf16.msra.mxu0 (!%p150_p6), %v1400_v6  ;;  %v1409_v15 = vld [vmem:[%s1810_s1 + $0x98] sm:$0xff] (!%p150_p6)   ;;  %v1413_v19 = vld [vmem:[%s1810_s1 + $0xa0] sm:$0xff] (!%p150_p6)   ;;  %v1417_v23 = vld [vmem:[%s1810_s1 + $0xa8] sm:$0xff] (!%p150_p6)  }
  0x12   : > { %1234 = vmatpush3.bf16.msra.mxu1 %v1401_v7  ;;  %1195 = vmatprep.subr.bf16.mxu0 %v1402_v8  ;;  %s185_s24 = scalar_select %p184_p7, %s1640_s28, 12  ;;  %v1418_v24 = vld [vmem:[%s1810_s1 + $0x70] sm:$0xff]   ;;  %v1422_v28 = vld [vmem:[%s1810_s1 + $0x78] sm:$0xff]   ;;  %v1432_v36 = vld [vmem:[%s1810_s1 + $0x100] sm:$0xff]  }
  0x13   : > { %1235 = vmatprep.subr.bf16.mxu1 %v1403_v9  ;;  %v1419_v25 = vld [vmem:[%s1810_s1 + $0xf0] sm:$0xff]   ;;  %v1423_v29 = vld [vmem:[%s1810_s1 + $0xf8] sm:$0xff]   ;;  %v1439_v39 = vld [vmem:[%s1810_s1 + $0x108] sm:$0xff]   ;;  %s866_s21 = ssub.s32 (%p1593_p4), 13, %s1640_s28  ;;  %s1190_s22 = smul.u32 (%p1593_p4), 28, %s1581_s15 }
  0x14   : > { %s1304_s7 = smul.u32 20, %s185_s24  ;;  %v1420_v26 = vld [vmem:[%s1810_s1 + $0x30] sm:$0xff]   ;;  %v1424_v30 = vld [vmem:[%s1810_s1 + $0x38] sm:$0xff]   ;;  %v1103_v60 = vld [vmem:[%s1811_s2] ss:$0 sm:$0xff]  ;;  %p867_p8 = scmp.lt.s32.totalorder (%p1593_p4), %s866_s21, 7 }
  0x15   : > { %1196 = vmatpush3.bf16.msra.mxu0 %v1404_v10  ;;  %v1421_v27 = vld [vmem:[%s1810_s1 + $0xb0] sm:$0xff]   ;;  %v1425_v31 = vld [vmem:[%s1810_s1 + $0xb8] sm:$0xff]   ;;  %s1760_s25 = scalar_lea.vmem (%p1593_p4), %s1812_s3, %s1190_s22  }
  0x16   : > { %1236 = vmatpush3.bf16.msra.mxu1 %v1405_v11  ;;  %1197 = vmatprep.subr.bf16.mxu0 %v1406_v12  ;;  %s1695_s24 = scalar_lea.vmem %s1809_s0, %s1304_s7  ;;  %v1446_v44 = vld [vmem:[%s1810_s1 + $0x110] sm:$0xff]   ;;  %v1451_v45 = vld [vmem:[%s1810_s1 + $0x118] sm:$0xff]  }
  0x17   : > { %1237 = vmatprep.subr.bf16.mxu1 %v1407_v13  ;;  %v1426_v32 = vld [vmem:[%s1695_s24] ss:$20 sps:$4 sm:$0xff]   ;;  %v1428_v33 = vld [vmem:[%s1695_s24 + $0x4] ss:$20 sps:$4 sm:$0xff]   ;;  %v1429_v34 = vld [vmem:[%s1695_s24 + $0x8] ss:$20 sps:$4 sm:$0xff]  }
  0x18   : > { %v1431_v35 = vld [vmem:[%s1695_s24 + $0xc] ss:$20 sps:$4 sm:$0xff]   ;;  %654 = vmatprep.mubr.bf16.mxu0 %v1428_v33  ;;  %v1435_v38 = vld [vmem:[%s1695_s24 + $0x34] ss:$20 sps:$4 sm:$0xff]   ;;  %v1438_v41 = vld [vmem:[%s1695_s24 + $0x30] ss:$20 sps:$4 sm:$0xff]  }
  0x19   : > { %1198 = vmatpush3.bf16.msra.mxu0 %v1408_v14  ;;  %718 = vmatprep.mubr.bf16.mxu1 %v1431_v35  ;;  %v1433_v37 = vld [vmem:[%s1695_s24 + $0x2c] ss:$20 sps:$4 sm:$0xff]   ;;  %v1437_v40 = vld [vmem:[%s1695_s24 + $0x28] ss:$20 sps:$4 sm:$0xff]   ;;  %v1444_v48 = vld [vmem:[%s1695_s24 + $0x50] ss:$20 sps:$4 sm:$0xff]  }
  0x1a   : > { %1238 = vmatpush3.bf16.msra.mxu1 %v1409_v15  ;;  %1199 = vmatprep.subr.bf16.mxu0 %v1410_v16  ;;  %v1440_v42 = vld [vmem:[%s1695_s24 + $0x54] ss:$20 sps:$4 sm:$0xff]   ;;  %v1442_v43 = vld [vmem:[%s1695_s24 + $0x5c] ss:$20 sps:$4 sm:$0xff]   ;;  %v220_v47 = vld [vmem:[%s1695_s24 + $0x80] sm:$0xff] }
  0x1b   : > { %1239 = vmatprep.subr.bf16.mxu1 %v1411_v17  ;;  %v219_v46 = vld [vmem:[%s1695_s24 + $0x78] sm:$0xff]  ;;  %v1122_v51 = vcombine.high %v220_v47, %v220_v47  ;;  %v1121_v53 = vcombine.low %v220_v47, %v220_v47  ;;  %v1452_v54 = vld [vmem:[%s1695_s24 + $0x10] ss:$20 sps:$4 sm:$0xff]   ;;  %v1453_v55 = vld [vmem:[%s1695_s24 + $0x60] ss:$20 sps:$4 sm:$0xff]  }
  0x1c   : > { %v1445_v49 = vld [vmem:[%s1695_s24 + $0x58] ss:$20 sps:$4 sm:$0xff]   ;;  %v1120_v50 = vcombine.high %v219_v46, %v219_v46  ;;  %v1119_v52 = vcombine.low %v219_v46, %v219_v46  ;;  %v1455_v57 = vld [vmem:[%s1695_s24 + $0x88] ss:$0 sps:$4 sm:$0xff]  }
  0x1d   : > { %1200 = vmatpush3.bf16.msra.mxu0 %v1412_v18  ;;  %v1454_v56 = vld [vmem:[%s1695_s24 + $0x38] ss:$20 sps:$4 sm:$0xff]  }
  0x1e   : > { %1240 = vmatpush3.bf16.msra.mxu1 %v1413_v19  ;;  %1201 = vmatprep.subr.bf16.mxu0 %v1414_v20 }
  0x1f   : > { %1241 = vmatprep.subr.bf16.mxu1 %v1415_v21 }
  0x21   : > { %1202 = vmatpush3.bf16.msra.mxu0 %v1416_v22 }
  0x22   : > { %1242 = vmatpush3.bf16.msra.mxu1 %v1417_v23  ;;  %1203 = vmatprep.subr.bf16.mxu0 %v1418_v24 }
  0x23   : > { %1243 = vmatprep.subr.bf16.mxu1 %v1419_v25 }
  0x25   : > { %1204 = vmatpush3.bf16.msra.mxu0 %v1420_v26 }
  0x26   : > { %1244 = vmatpush3.bf16.msra.mxu1 %v1421_v27  ;;  %1205 = vmatprep.subr.bf16.mxu0 %v1422_v28 }
  0x27   : > { %1245 = vmatprep.subr.bf16.mxu1 %v1423_v29 }
  0x29   : > { %1206 = vmatpush3.bf16.msra.mxu0 %v1424_v30 }
  0x2a   : > { %1246 = vmatpush3.bf16.msra.mxu1 %v1425_v31  ;;  %1279 = vmatprep.subr.bf16.mxu0 %v1432_v36 }
  0x2b   : > { %1295 = vmatprep.subr.bf16.mxu1 %v1432_v36 }
  0x2c   : > { %655 = vmatmul.mubr.bf16.vlgmr.msra.gmra.mrb[0].mxu0 %v1426_v32 }
  0x2d   : > { %719 = vmatmul.mubr.bf16.vlgmr.msra.gmra.mrb[0].mxu1 %v1429_v34  ;;  %1280 = vmatpush3.bf16.msra.mxu0 %v1432_v36 }
  0x2e   : > { %1299 = vmatpush3.bf16.msra.mxu1 %v1432_v36  ;;  %662 = vmatprep.mubr.bf16.mxu0 %v1433_v37 }
  0x2f   : > { %726 = vmatprep.mubr.bf16.mxu1 %v1435_v38  ;;  %1281 = vmatprep.subr.bf16.mxu0 %v1439_v39 }
  0x30   : > { %1296 = vmatprep.subr.bf16.mxu1 %v1439_v39 }
  0x31   : > { %1282 = vmatpush3.bf16.msra.mxu0 %v1439_v39 }
  0x32   : > { %1300 = vmatpush3.bf16.msra.mxu1 %v1439_v39  ;;  %1283 = vmatprep.subr.bf16.mxu0 %v1446_v44 }
  0x33   : > { %1297 = vmatprep.subr.bf16.mxu1 %v1446_v44 }
  0x34   : > { %663 = vmatmul.mubr.bf16.gmra.mrb[4].mxu0 %v1437_v40 }
  0x35   : > { %727 = vmatmul.mubr.bf16.gmra.mrb[4].mxu1 %v1438_v41  ;;  %670 = vmatprep.mubr.bf16.mxu0 %v1440_v42 }
  0x36   : > { %734 = vmatprep.mubr.bf16.mxu1 %v1442_v43  ;;  %1284 = vmatpush3.bf16.msra.mxu0 %v1446_v44 }
  0x37   : > { %1301 = vmatpush3.bf16.msra.mxu1 %v1446_v44  ;;  %1285 = vmatprep.subr.bf16.mxu0 %v1451_v45 }
  0x38   : > { %1298 = vmatprep.subr.bf16.mxu1 %v1451_v45 }
  0x3a   : > { %1286 = vmatpush3.bf16.msra.mxu0 %v1451_v45 }
  0x3b   : > { %1302 = vmatpush3.bf16.msra.mxu1 %v1451_v45 }
  0x3c   : > { %671 = vmatmul.mubr.bf16.gmra.mrb[8].mxu0 %v1444_v48 }
  0x3d   : > { %735 = vmatmul.mubr.bf16.gmra.mrb[8].mxu1 %v1445_v49  ;;  %678 = vmatprep.mubr.bf16.mxu0 %v1120_v50 }
  0x3e   : > { %742 = vmatprep.mubr.bf16.mxu1 %v1122_v51 }
  0x44   : > { %679 = vmatmul.mubr.bf16.gmra.mrb[12].mxu0 %v1119_v52 }
  0x45   : > { %743 = vmatmul.mubr.bf16.gmra.mrb[12].mxu1 %v1121_v53  ;;  %1287 = vmatprep.mubr.msk.bf16.mxu0 %vm609_vm0, %v1452_v54 }
  0x46   : > { %1291 = vmatprep.mubr.msk.bf16.mxu1 %vm609_vm0, %v1453_v55 }
  0x4c   : > { %1288 = vmatmul.mubr.msk.bf16.vlgmr.msra.gmra.mrb[16].mxu0 %vm609_vm0, %v1454_v56 }
  0x4d   : > { %1292 = vmatmul.mubr.msk.bf16.vlgmr.msra.gmra.mrb[16].mxu1 %vm609_vm0, %v1455_v57 }
  0xff   : > { %v1207_v58 = vpop.f32.mrb[0].mxu0 }
 0x100   : > { %v1247_v59 = vpop.f32.mrb[0].mxu1  ;;  %v1208_v61 = vpop.f32.mrb[1].mxu0 }
 0x101   : > { %v1209_v62 = vadd.f32 %v1208_v61, %v1207_v58  ;;  %v1248_v63 = vpop.f32.mrb[1].mxu1  ;;  %v1210_v0 = vpop.f32.mrb[2].mxu0 }
 0x102   : > { %v1249_v1 = vadd.f32 %v1248_v63, %v1247_v59  ;;  %v1250_v2 = vpop.f32.mrb[2].mxu1  ;;  %v1211_v3 = vpop.f32.mrb[3].mxu0 }
 0x103   : > { %v657_v4 = vadd.f32 %v1209_v62, %v1103_v60  ;;  %v1212_v5 = vadd.f32 %v1211_v3, %v1210_v0  ;;  %v1251_v6 = vpop.f32.mrb[3].mxu1 }
 0x104   : > { %v1252_v7 = vadd.f32 %v1251_v6, %v1250_v2 }
 0x105   : > { %v660_v8 = vadd.f32 %v1212_v5, %v1103_v60  ;;  %v721_v9 = vadd.f32 %v1249_v1, %v657_v4 }
 0x107   : > { %v1213_v10 = vpop.f32.mrb[4].mxu0  ;;  %v724_v11 = vadd.f32 %v1252_v7, %v660_v8 }
 0x108   : > { %v1253_v12 = vpop.f32.mrb[4].mxu1  ;;  %v1214_v13 = vpop.f32.mrb[5].mxu0 }
 0x109   : > { %v1215_v14 = vadd.f32 %v1214_v13, %v1213_v10  ;;  %v1254_v15 = vpop.f32.mrb[5].mxu1  ;;  %v1216_v16 = vpop.f32.mrb[6].mxu0 }
 0x10a   : > { %v1255_v17 = vadd.f32 %v1254_v15, %v1253_v12  ;;  %v1256_v18 = vpop.f32.mrb[6].mxu1  ;;  %v1217_v19 = vpop.f32.mrb[7].mxu0 }
 0x10b   : > { %v665_v20 = vadd.f32 %v1215_v14, %v1103_v60  ;;  %v1218_v21 = vadd.f32 %v1217_v19, %v1216_v16  ;;  %v1257_v22 = vpop.f32.mrb[7].mxu1 }
 0x10c   : > { %v1258_v23 = vadd.f32 %v1257_v22, %v1256_v18 }
 0x10d   : > { %v668_v24 = vadd.f32 %v1218_v21, %v1103_v60  ;;  %v729_v25 = vadd.f32 %v1255_v17, %v665_v20 }
 0x10f   : > { %v1219_v26 = vpop.f32.mrb[8].mxu0  ;;  %v732_v27 = vadd.f32 %v1258_v23, %v668_v24 }
 0x110   : > { %v1259_v28 = vpop.f32.mrb[8].mxu1  ;;  %v1220_v29 = vpop.f32.mrb[9].mxu0 }
 0x111   : > { %v1221_v30 = vadd.f32 %v1220_v29, %v1219_v26  ;;  %v1260_v31 = vpop.f32.mrb[9].mxu1  ;;  %v1222_v32 = vpop.f32.mrb[10].mxu0 }
 0x112   : > { %v1261_v33 = vadd.f32 %v1260_v31, %v1259_v28  ;;  %v1262_v34 = vpop.f32.mrb[10].mxu1  ;;  %v1223_v35 = vpop.f32.mrb[11].mxu0 }
 0x113   : > { %v673_v36 = vadd.f32 %v1221_v30, %v1103_v60  ;;  %v1224_v37 = vadd.f32 %v1223_v35, %v1222_v32  ;;  %v1263_v38 = vpop.f32.mrb[11].mxu1 }
 0x114   : > { %v1264_v39 = vadd.f32 %v1263_v38, %v1262_v34 }
 0x115   : > { %v676_v40 = vadd.f32 %v1224_v37, %v1103_v60  ;;  %v737_v41 = vadd.f32 %v1261_v33, %v673_v36 }
 0x117   : > { %v1225_v42 = vpop.f32.mrb[12].mxu0  ;;  %v740_v43 = vadd.f32 %v1264_v39, %v676_v40 }
 0x118   : > { %v1265_v44 = vpop.f32.mrb[12].mxu1  ;;  %v1226_v45 = vpop.f32.mrb[13].mxu0 }
 0x119   : > { %v1227_v46 = vadd.f32 %v1226_v45, %v1225_v42  ;;  %v1266_v47 = vpop.f32.mrb[13].mxu1  ;;  %v1228_v48 = vpop.f32.mrb[14].mxu0 }
 0x11a   : > { %v1267_v49 = vadd.f32 %v1266_v47, %v1265_v44  ;;  %v1268_v50 = vpop.f32.mrb[14].mxu1  ;;  %v1229_v51 = vpop.f32.mrb[15].mxu0 }
 0x11b   : > { %v681_v52 = vadd.f32 %v1227_v46, %v1103_v60  ;;  %v1269_v53 = vpop.f32.mrb[15].mxu1 }
 0x11d   : > { %v745_v54 = vadd.f32 %v1267_v49, %v681_v52 }
 0x11f   : > { %v1289_v55 = vpop.f32.mrb[16].mxu0 }
 0x120   : > { %v793_v56 = vadd.f32 %v1289_v55, %v729_v25  ;;  %v1293_v57 = vpop.f32.mrb[16].mxu1  ;;  %v784_v58 = vpop.f32.mrb[17].mxu0 }
 0x121   : > { %v809_v59 = vadd.f32 %v1293_v57, %v745_v54  ;;  %v785_v61 = vadd.f32 %v784_v58, %v721_v9  ;;  %v800_v62 = vpop.f32.mrb[17].mxu1  ;;  %v1290_v63 = vpop.f32.mrb[18].mxu0 }
 0x122   : > { %v816_v0 = vmax.f32 %v793_v56, 0.0  ;;  %v801_v1 = vadd.f32 %v800_v62, %v737_v41  ;;  %v796_v2 = vadd.f32 %v1290_v63, %v732_v27  ;;  %v1294_v3 = vpop.f32.mrb[18].mxu1  ;;  %v787_v4 = vpop.f32.mrb[19].mxu0 }
 0x123   : > { %v820_v5 = vmax.f32 %v809_v59, 0.0  ;;  %v814_v60 = vmax.f32 %v785_v61, 0.0  ;;  %v788_v6 = vadd.f32 %v787_v4, %v724_v11  ;;  %v803_v7 = vpop.f32.mrb[19].mxu1 }
 0x124   : > { %v1185_v8 = vpack.c.bf16 %v816_v0, %v816_v0  ;;  %v818_v10 = vmax.f32 %v801_v1, 0.0  ;;  %v817_v12 = vmax.f32 %v796_v2, 0.0  ;;  %v804_v13 = vadd.f32 %v803_v7, %v740_v43  ;;  %864 = sbr.rel (!%p1593_p4) target bundleno = 365 (0x16d), region = 36 }
 0x125   : > { %v1189_v14 = vpack.c.bf16 %v820_v5, %v820_v5  ;;  %v1183_v15 = vpack.c.bf16 %v814_v60, %v814_v60  ;;  %v815_v16 = vmax.f32 %v788_v6, 0.0 }
 0x126   : > { %853 = vst.msk [vmem:[%s1737_s12 + $0x8] sm:$0xf] %vm850_vm1, %v1185_v8  ;;  %v1187_v9 = vpack.c.bf16 %v818_v10, %v818_v10  ;;  %v1186_v11 = vpack.c.bf16 %v817_v12, %v817_v12  ;;  %v819_v17 = vmax.f32 %v804_v13, 0.0 }
 0x127   : > { %857 = vst.msk [vmem:[%s1737_s12 + $0x18] sm:$0xf] %vm850_vm1, %v1189_v14  ;;  %851 = vst.msk [vmem:[%s1737_s12] sm:$0xf] %vm850_vm1, %v1183_v15  ;;  %v1184_v18 = vpack.c.bf16 %v815_v16, %v815_v16 }
 0x128   : > { %855 = vst.msk [vmem:[%s1737_s12 + $0x10] sm:$0xf] %vm850_vm1, %v1187_v9  ;;  %854 = vst.msk [vmem:[%s1737_s12 + $0xc] sm:$0xf] %vm850_vm1, %v1186_v11  ;;  %v1188_v19 = vpack.c.bf16 %v819_v17, %v819_v17 }
 0x129   : > { %852 = vst.msk [vmem:[%s1737_s12 + $0x4] sm:$0xf] %vm850_vm1, %v1184_v18 }
 0x12a   : > { %856 = vst.msk [vmem:[%s1737_s12 + $0x14] sm:$0xf] %vm850_vm1, %v1188_v19 }
 0x12b   : > { %s1821_s21 = smov (!%p867_p8, %s866_s21), 7 }
 0x12c   : > { %s1171_s26 = sshll.u32 %s1821_s21, 6 }
 0x12d   : > { %p1174_p9 = scmp.eq.s32.totalorder %s1171_s26, 0 }
 0x12e   : > { %1456 = sdivrem.u32 (!%p1174_p9), %s1821_s21, 7 }
 0x12f   : > { %875 = sbr.rel (%p1174_p9) target bundleno = 365 (0x16d), region = 40 }
 0x137   : > { %s1766_s20 = spop.drf %1456 }
 0x138   : > { %p1175_p10 = scmp.le.s32.totalorder %s1766_s20, 0 }
 0x139   : > { %s1814_s15 = smov (!%p1175_p10), %s1760_s25  ;;  %s1815_s28 = smov (!%p1175_p10), %s1737_s12 }
 0x13a   : > { %1054 = sbr.rel (%p1175_p10) target bundleno = 336 (0x150), region = 112  ;;  %s1775_s27 = smov (!%p1175_p10), 0  }
 0x13b   : > { %s1777_s29 = smov (!%p1175_p10), 0  }
 0x141 LB: >> { %v892_v20 = vld [vmem:[%s1522_s28] sm:$0xf]  ;;  %v894_v21 = vld [vmem:[%s1522_s28 + $0x4] sm:$0xf]  ;;  %v896_v22 = vld [vmem:[%s1522_s28 + $0x8] sm:$0xf]  ;;  %s1530_s29 = sphi %s1777_s29, %s886_s29   ;;  %s1526_s27 = sphi %s1775_s27, %s1816_s27   ;;  %s1522_s28 = sphi %s1815_s28, %s911_s28   ;;  %s1518_s15 = sphi %s1814_s15, %s912_s15  }
 0x142   : >> { %893 = vst [vmem:[%s1518_s15] sm:$0xf] %v892_v20  ;;  %895 = vst [vmem:[%s1518_s15 + $0x4] sm:$0xf] %v894_v21  ;;  %v898_v23 = vld [vmem:[%s1522_s28 + $0xc] sm:$0xf]  ;;  %s906_s30 = sadd.s32 1, %s1526_s27 }
 0x143   : >> { %897 = vst [vmem:[%s1518_s15 + $0x8] sm:$0xf] %v896_v22  ;;  %v900_v24 = vld [vmem:[%s1522_s28 + $0x10] sm:$0xf]  ;;  %v902_v25 = vld [vmem:[%s1522_s28 + $0x14] sm:$0xf]  ;;  %p907_p11 = scmp.ge.s32.totalorder %s906_s30, %s1766_s20 }
 0x144   : >> { %899 = vst [vmem:[%s1518_s15 + $0xc] sm:$0xf] %v898_v23  ;;  %901 = vst [vmem:[%s1518_s15 + $0x10] sm:$0xf] %v900_v24  ;;  %v904_v26 = vld [vmem:[%s1522_s28 + $0x18] sm:$0xf] }
 0x145   : >> { %903 = vst [vmem:[%s1518_s15 + $0x14] sm:$0xf] %v902_v25  ;;  %905 = vst [vmem:[%s1518_s15 + $0x18] sm:$0xf] %v904_v26  ;;  %s1823_s30 = smov (%p907_p11, %s906_s30), 0  ;;  %s886_s29 = sadd.s32 1, %s1530_s29  }
 0x146   : >> { %s909_s4 = smul.u32 28, %s1823_s30  ;;  %p885_p12 = scmp.ge.s32.totalorder %s886_s29, %s1766_s20 }
 0x147   : >> { %s1816_s27 = smov %s1823_s30 }
 0x148   : >> { %s911_s28 = scalar_lea.vmem %s1737_s12, %s909_s4 [#allocation2]   ;;  %s912_s15 = scalar_lea.vmem %s1760_s25, %s909_s4  }
 0x149   : > { %888 = sbr.rel (!%p885_p12) target bundleno = 321 (0x141), region = 118 }
 0x150 PF: > { %1458 = sdivrem.u32 %s1821_s21, 7 }
 0x151   : > { %s1176_s5 = smul.u32 28, %s1766_s20 }
 0x153   : > { %s917_s6 = scalar_lea.vmem %s1737_s12, %s1176_s5 [#allocation2]   ;;  %s919_s7 = scalar_lea.vmem %s1760_s25, %s1176_s5  }
 0x159   : > { %s1459_s8 = spop.drf %1458 }
 0x15a   : > { %p1178_p13 = scmp.le.s32.totalorder %s1459_s8, 0 }
 0x15b   : > { %s1532_s9 = smov (!%p1178_p13), %s919_s7   ;;  %s1536_s10 = smov (!%p1178_p13), %s917_s6  }
 0x15c   : > { %1068 = sbr.rel (%p1178_p13) target bundleno = 365 (0x16d), region = 123  ;;  %s1540_s11 = smov (!%p1178_p13), 0  }
 0x15d   : > { %s1544_s14 = smov (!%p1178_p13), 0  }
 0x163 LB: >> { %v929_v27 = vld [vmem:[%s1538_s10] sm:$0xf]  ;;  %s931_s17 = sadd.s32 1, %s1542_s11  ;;  %s923_s14 = sadd.s32 1, %s1546_s14   ;;  %s1546_s14 = sphi %s1544_s14, %s923_s14   ;;  %s1542_s11 = sphi %s1540_s11, %s1541_s11   ;;  %s1538_s10 = sphi %s1536_s10, %s936_s10   ;;  %s1534_s9 = sphi %s1532_s9, %s937_s9  }
 0x164   : >> { %930 = vst [vmem:[%s1534_s9] sm:$0xf] %v929_v27  ;;  %p932_p0 = scmp.ge.s32.totalorder %s931_s17, %s1459_s8  ;;  %p922_p1 = scmp.ge.s32.totalorder %s923_s14, %s1459_s8 }
 0x166   : >> { %s1825_s17 = smov (%p932_p0, %s931_s17), 0  ;;  %925 = sbr.rel (!%p922_p1) target bundleno = 355 (0x163), region = 129 }
 0x167   : >> { %s1179_s18 = sshll.u32 %s1825_s17, 2  ;;  %s1541_s11 = smov %s1825_s17  }
 0x168   : >> { %s936_s10 = scalar_lea.vmem %s917_s6, %s1179_s18 [#allocation2]   ;;  %s937_s9 = scalar_lea.vmem %s919_s7, %s1179_s18  }
 0x16d PF: > { %p10_p2 = scmp.ge.s32.totalorder %s1583_s16, 4   ;;  %s1817_s12 = smov %s1510_s13 }
 0x16e   : > { %s1818_s13 = smov %s1591_s19  ;;  %s1819_s14 = smov %s1583_s16 }
 0x16f   :  { %12 = sbr.rel (!%p10_p2) target bundleno = 2 (0x2), region = 140 }

// kernel: dqn_forward.7
= control target key start
LH: loop header
LB: loop body
LE: loop exit
PB: predicated region body
PF: predicated region fallthrough
CT: control target
= control target key end

     0   :  { %v812_v36 = vlaneseq  ;;  %v8581_v37 = vmov 1966171168   ;;  %s11223_s0 = inlined_call_operand.vmem [shape: bf16[2,3136], index: 0, kind: input, shape index: {}]   ;;  %s11224_s1 = inlined_call_operand.vmem [shape: bf16[3136,512], index: 1, kind: input, shape index: {}]   ;;  %s11225_s2 = inlined_call_operand.vmem [shape: f32[1,512], index: 2, kind: input, shape index: {}]   ;;  %s11226_s3 = inlined_call_operand.vmem [shape: bf16[512,128], index: 3, kind: input, shape index: {}]   ;;  %s11227_s4 = inlined_call_operand.vmem [shape: f32[1,128], index: 4, kind: input, shape index: {}]   ;;  %s11228_s5 = inlined_call_operand.hbm [shape: f32[2,128], index: 5, kind: output, shape index: {}]  }
   0x1   :  { %v7344_v0 = vld [vmem:[%s11224_s1 + $0x4] ss:$16 sps:$4 sm:$0xff]   ;;  %v7346_v1 = vld [vmem:[%s11224_s1 + $0xc] ss:$16 sps:$4 sm:$0xff]   ;;  %v7348_v2 = vld [vmem:[%s11224_s1] ss:$16 sps:$4 sm:$0xff]   ;;  %v838_v38 = vunpack.c.l.s4 %v8581_v37 }
   0x2   :  { %4945 = vmatprep.subr.bf16.mxu0 %v7344_v0  ;;  %v7349_v3 = vld [vmem:[%s11224_s1 + $0x8] ss:$16 sps:$4 sm:$0xff]   ;;  %5478 = vmatprep.subr.bf16.mxu1 %v7346_v1  ;;  %v7350_v4 = vld [vmem:[%s11224_s1 + $0x24] ss:$16 sps:$4 sm:$0xff]   ;;  %v7352_v5 = vld [vmem:[%s11224_s1 + $0x2c] ss:$16 sps:$4 sm:$0xff]  }
   0x3   :  { %4946 = vmatpush1.bf16.msra.mxu0 %v7348_v2  ;;  %5479 = vmatpush1.bf16.msra.mxu1 %v7349_v3  ;;  %v7354_v6 = vld [vmem:[%s11224_s1 + $0x20] ss:$16 sps:$4 sm:$0xff]   ;;  %v7355_v7 = vld [vmem:[%s11224_s1 + $0x28] ss:$16 sps:$4 sm:$0xff]   ;;  %v7356_v8 = vld [vmem:[%s11224_s1 + $0x44] ss:$16 sps:$4 sm:$0xff]   ;;  %v839_v43 = vunpack.c.0.s8 %v838_v38 }
   0x4   :  { %4947 = vmatprep.subr.bf16.mxu0 %v7350_v4  ;;  %5480 = vmatprep.subr.bf16.mxu1 %v7352_v5  ;;  %v7358_v9 = vld [vmem:[%s11224_s1 + $0x4c] ss:$16 sps:$4 sm:$0xff]   ;;  %v7360_v10 = vld [vmem:[%s11224_s1 + $0x40] ss:$16 sps:$4 sm:$0xff]   ;;  %v7361_v11 = vld [vmem:[%s11224_s1 + $0x48] ss:$16 sps:$4 sm:$0xff]  }
   0x5   :  { %v7362_v12 = vld [vmem:[%s11224_s1 + $0x64] ss:$16 sps:$4 sm:$0xff]   ;;  %v7364_v13 = vld [vmem:[%s11224_s1 + $0x6c] ss:$16 sps:$4 sm:$0xff]   ;;  %v7366_v14 = vld [vmem:[%s11224_s1 + $0x60] ss:$16 sps:$4 sm:$0xff]  }
   0x6   :  { %v7367_v15 = vld [vmem:[%s11224_s1 + $0x68] ss:$16 sps:$4 sm:$0xff]   ;;  %v7368_v16 = vld [vmem:[%s11224_s1 + $0x84] ss:$16 sps:$4 sm:$0xff]   ;;  %v7370_v17 = vld [vmem:[%s11224_s1 + $0x8c] ss:$16 sps:$4 sm:$0xff]  }
   0x7   :  { %4948 = vmatpush1.bf16.msra.mxu0 %v7354_v6  ;;  %5481 = vmatpush1.bf16.msra.mxu1 %v7355_v7  ;;  %v7372_v18 = vld [vmem:[%s11224_s1 + $0x80] ss:$16 sps:$4 sm:$0xff]   ;;  %v7373_v19 = vld [vmem:[%s11224_s1 + $0x88] ss:$16 sps:$4 sm:$0xff]   ;;  %v7374_v20 = vld [vmem:[%s11224_s1 + $0xa4] ss:$16 sps:$4 sm:$0xff]  }
   0x8   :  { %4949 = vmatprep.subr.bf16.mxu0 %v7356_v8  ;;  %5482 = vmatprep.subr.bf16.mxu1 %v7358_v9  ;;  %v7376_v21 = vld [vmem:[%s11224_s1 + $0xac] ss:$16 sps:$4 sm:$0xff]   ;;  %v7378_v22 = vld [vmem:[%s11224_s1 + $0xa0] ss:$16 sps:$4 sm:$0xff]   ;;  %v7379_v23 = vld [vmem:[%s11224_s1 + $0xa8] ss:$16 sps:$4 sm:$0xff]  }
   0x9   :  { %v7380_v24 = vld [vmem:[%s11224_s1 + $0xc4] ss:$16 sps:$4 sm:$0xff]   ;;  %v7382_v25 = vld [vmem:[%s11224_s1 + $0xcc] ss:$16 sps:$4 sm:$0xff]   ;;  %v7384_v26 = vld [vmem:[%s11224_s1 + $0xc0] ss:$16 sps:$4 sm:$0xff]  }
   0xa   :  { %v7385_v27 = vld [vmem:[%s11224_s1 + $0xc8] ss:$16 sps:$4 sm:$0xff]   ;;  %v7386_v28 = vld [vmem:[%s11224_s1 + $0xe4] ss:$16 sps:$4 sm:$0xff]   ;;  %v7388_v29 = vld [vmem:[%s11224_s1 + $0xec] ss:$16 sps:$4 sm:$0xff]  }
   0xb   :  { %4950 = vmatpush1.bf16.msra.mxu0 %v7360_v10  ;;  %5483 = vmatpush1.bf16.msra.mxu1 %v7361_v11  ;;  %v7390_v30 = vld [vmem:[%s11224_s1 + $0xe0] ss:$16 sps:$4 sm:$0xff]   ;;  %v7391_v31 = vld [vmem:[%s11224_s1 + $0xe8] ss:$16 sps:$4 sm:$0xff]   ;;  %v7392_v32 = vld [vmem:[%s11224_s1 + $0x104] ss:$16 sps:$4 sm:$0xff]  }
   0xc   :  { %4951 = vmatprep.subr.bf16.mxu0 %v7362_v12  ;;  %5484 = vmatprep.subr.bf16.mxu1 %v7364_v13  ;;  %v7394_v33 = vld [vmem:[%s11224_s1 + $0x10c] ss:$16 sps:$4 sm:$0xff]   ;;  %v7396_v34 = vld [vmem:[%s11224_s1 + $0x100] ss:$16 sps:$4 sm:$0xff]   ;;  %v7397_v35 = vld [vmem:[%s11224_s1 + $0x108] ss:$16 sps:$4 sm:$0xff]  }
   0xd   :  { %v7398_v39 = vld [vmem:[%s11224_s1 + $0x124] ss:$16 sps:$4 sm:$0xff]   ;;  %v7400_v40 = vld [vmem:[%s11224_s1 + $0x12c] ss:$16 sps:$4 sm:$0xff]   ;;  %v7402_v41 = vld [vmem:[%s11224_s1 + $0x120] ss:$16 sps:$4 sm:$0xff]  }
   0xe   :  { %v8731_v42 = vshrl.u32 %v812_v36, 7  ;;  %v7403_v44 = vld [vmem:[%s11224_s1 + $0x128] ss:$16 sps:$4 sm:$0xff]   ;;  %v7404_v45 = vld [vmem:[%s11224_s1 + $0x144] ss:$16 sps:$4 sm:$0xff]  }
   0xf   :  { %4952 = vmatpush1.bf16.msra.mxu0 %v7366_v14  ;;  %5485 = vmatpush1.bf16.msra.mxu1 %v7367_v15  ;;  %v7406_v46 = vld [vmem:[%s11224_s1 + $0x14c] ss:$16 sps:$4 sm:$0xff]   ;;  %v7408_v47 = vld [vmem:[%s11224_s1 + $0x140] ss:$16 sps:$4 sm:$0xff]   ;;  %v7409_v48 = vld [vmem:[%s11224_s1 + $0x148] ss:$16 sps:$4 sm:$0xff]  }
  0x10   :  { %4953 = vmatprep.subr.bf16.mxu0 %v7368_v16  ;;  %5486 = vmatprep.subr.bf16.mxu1 %v7370_v17  ;;  %v8749_v49 = vsub.s32 %v839_v43, %v8731_v42  ;;  %v7410_v50 = vld [vmem:[%s11224_s1 + $0x164] ss:$16 sps:$4 sm:$0xff]   ;;  %v7412_v51 = vld [vmem:[%s11224_s1 + $0x16c] ss:$16 sps:$4 sm:$0xff]   ;;  %v7414_v53 = vld [vmem:[%s11224_s1 + $0x160] ss:$16 sps:$4 sm:$0xff]  }
  0x11   :  { %v8760_v52 = vld [vmem:[%s11223_s0] sm:$0xff]  ;;  %v7415_v55 = vld [vmem:[%s11224_s1 + $0x168] ss:$16 sps:$4 sm:$0xff]   ;;  %v7418_v57 = vld [vmem:[%s11224_s1 + $0x18c] ss:$16 sps:$4 sm:$0xff]  }
  0x12   :  { %v843_v54 = vrot.slane %v8760_v52, %v8749_v49  ;;  %v7416_v56 = vld [vmem:[%s11224_s1 + $0x184] ss:$16 sps:$4 sm:$0xff]   ;;  %v7420_v59 = vld [vmem:[%s11224_s1 + $0x180] ss:$16 sps:$4 sm:$0xff]   ;;  %v7421_v61 = vld [vmem:[%s11224_s1 + $0x188] ss:$16 sps:$4 sm:$0xff]  }
  0x13   :  { %4954 = vmatpush1.bf16.msra.mxu0 %v7372_v18  ;;  %5487 = vmatpush1.bf16.msra.mxu1 %v7373_v19  ;;  %v7422_v62 = vld [vmem:[%s11224_s1 + $0x1a4] ss:$16 sps:$4 sm:$0xff]   ;;  %v7424_v63 = vld [vmem:[%s11224_s1 + $0x1ac] ss:$16 sps:$4 sm:$0xff]   ;;  %v7426_v0 = vld [vmem:[%s11224_s1 + $0x1a0] ss:$16 sps:$4 sm:$0xff]  }
  0x14   :  { %4955 = vmatprep.subr.bf16.mxu0 %v7374_v20  ;;  %5488 = vmatprep.subr.bf16.mxu1 %v7376_v21  ;;  %v851_v58 = vcombine.high %v843_v54, %v843_v54  ;;  %v7427_v1 = vld [vmem:[%s11224_s1 + $0x1a8] ss:$16 sps:$4 sm:$0xff]   ;;  %v7428_v2 = vld [vmem:[%s11224_s1 + $0x1c4] ss:$16 sps:$4 sm:$0xff]   ;;  %v7430_v3 = vld [vmem:[%s11224_s1 + $0x1cc] ss:$16 sps:$4 sm:$0xff]   ;;  %v8829_v13 = vrot.slane %v843_v54, %v8749_v49 }
  0x15   :  { %v7432_v4 = vld [vmem:[%s11224_s1 + $0x1c0] ss:$16 sps:$4 sm:$0xff]   ;;  %v7433_v5 = vld [vmem:[%s11224_s1 + $0x1c8] ss:$16 sps:$4 sm:$0xff]   ;;  %v7434_v6 = vld [vmem:[%s11224_s1 + $0x1e4] ss:$16 sps:$4 sm:$0xff]  }
  0x16   :  { %v873_v60 = vrot.slane %v851_v58, %v8749_v49  ;;  %v7436_v7 = vld [vmem:[%s11224_s1 + $0x1ec] ss:$16 sps:$4 sm:$0xff]   ;;  %v7438_v8 = vld [vmem:[%s11224_s1 + $0x1e0] ss:$16 sps:$4 sm:$0xff]   ;;  %v7439_v9 = vld [vmem:[%s11224_s1 + $0x1e8] ss:$16 sps:$4 sm:$0xff]  }
  0x17   :  { %4956 = vmatpush1.bf16.msra.mxu0 %v7378_v22  ;;  %5489 = vmatpush1.bf16.msra.mxu1 %v7379_v23  ;;  %v7442_v10 = vld [vmem:[%s11224_s1 + $0x204] ss:$16 sps:$4 sm:$0xff]   ;;  %v7445_v11 = vld [vmem:[%s11224_s1 + $0x20c] ss:$16 sps:$4 sm:$0xff]   ;;  %v7440_v12 = vld [vmem:[%s11224_s1 + $0x200] ss:$16 sps:$4 sm:$0xff]  }
  0x18   :  { %4957 = vmatprep.subr.bf16.mxu0 %v7380_v24  ;;  %5490 = vmatprep.subr.bf16.mxu1 %v7382_v25  ;;  %v7443_v14 = vld [vmem:[%s11224_s1 + $0x208] ss:$16 sps:$4 sm:$0xff]   ;;  %v7448_v15 = vld [vmem:[%s11224_s1 + $0x224] ss:$16 sps:$4 sm:$0xff]   ;;  %v7451_v16 = vld [vmem:[%s11224_s1 + $0x22c] ss:$16 sps:$4 sm:$0xff]   ;;  %v883_v17 = vcombine.high %v873_v60, %v873_v60 }
  0x19   :  { %4977 = vmatprep.mubr.bf16.mxu0 %v873_v60  ;;  %5510 = vmatprep.mubr.bf16.mxu1 %v873_v60  ;;  %v7446_v18 = vld [vmem:[%s11224_s1 + $0x220] ss:$16 sps:$4 sm:$0xff]   ;;  %v7449_v19 = vld [vmem:[%s11224_s1 + $0x228] ss:$16 sps:$4 sm:$0xff]   ;;  %v7454_v20 = vld [vmem:[%s11224_s1 + $0x244] ss:$16 sps:$4 sm:$0xff]  }
  0x1a   :  { %v7457_v21 = vld [vmem:[%s11224_s1 + $0x24c] ss:$16 sps:$4 sm:$0xff]   ;;  %v7452_v22 = vld [vmem:[%s11224_s1 + $0x240] ss:$16 sps:$4 sm:$0xff]   ;;  %v7455_v23 = vld [vmem:[%s11224_s1 + $0x248] ss:$16 sps:$4 sm:$0xff]  }
  0x1b   :  { %4958 = vmatpush1.bf16.msra.mxu0 %v7384_v26  ;;  %5491 = vmatpush1.bf16.msra.mxu1 %v7385_v27  ;;  %v7460_v24 = vld [vmem:[%s11224_s1 + $0x264] ss:$16 sps:$4 sm:$0xff]   ;;  %v7463_v25 = vld [vmem:[%s11224_s1 + $0x26c] ss:$16 sps:$4 sm:$0xff]   ;;  %v7458_v26 = vld [vmem:[%s11224_s1 + $0x260] ss:$16 sps:$4 sm:$0xff]  }
  0x1c   :  { %4959 = vmatprep.subr.bf16.mxu0 %v7386_v28  ;;  %5492 = vmatprep.subr.bf16.mxu1 %v7388_v29  ;;  %v7461_v27 = vld [vmem:[%s11224_s1 + $0x268] ss:$16 sps:$4 sm:$0xff]   ;;  %v7466_v28 = vld [vmem:[%s11224_s1 + $0x284] ss:$16 sps:$4 sm:$0xff]   ;;  %v7469_v29 = vld [vmem:[%s11224_s1 + $0x28c] ss:$16 sps:$4 sm:$0xff]  }
  0x1d   :  { %v7478_v36 = vld [vmem:[%s11224_s1 + $0x2c4] ss:$16 sps:$4 sm:$0xff]   ;;  %v7481_v37 = vld [vmem:[%s11224_s1 + $0x2cc] ss:$16 sps:$4 sm:$0xff]   ;;  %v7476_v38 = vld [vmem:[%s11224_s1 + $0x2c0] ss:$16 sps:$4 sm:$0xff]  }
  0x1e   :  { %v7482_v43 = vld [vmem:[%s11224_s1 + $0x2e0] ss:$16 sps:$4 sm:$0xff]   ;;  %v7497_v54 = vld [vmem:[%s11224_s1 + $0x328] ss:$16 sps:$4 sm:$0xff]   ;;  %v7511_v60 = vld [vmem:[%s11224_s1 + $0x36c] ss:$16 sps:$4 sm:$0xff]  }
  0x1f   :  { %4960 = vmatpush1.bf16.msra.mxu0 %v7390_v30  ;;  %5493 = vmatpush1.bf16.msra.mxu1 %v7391_v31  ;;  %v7464_v30 = vld [vmem:[%s11224_s1 + $0x280] ss:$16 sps:$4 sm:$0xff]   ;;  %v7467_v31 = vld [vmem:[%s11224_s1 + $0x288] ss:$16 sps:$4 sm:$0xff]  }
  0x20   :  { %4961 = vmatprep.subr.bf16.mxu0 %v7392_v32  ;;  %5494 = vmatprep.subr.bf16.mxu1 %v7394_v33  ;;  %v7472_v32 = vld [vmem:[%s11224_s1 + $0x2a4] ss:$16 sps:$4 sm:$0xff]   ;;  %v7475_v33 = vld [vmem:[%s11224_s1 + $0x2ac] ss:$16 sps:$4 sm:$0xff]   ;;  %v7503_v58 = vld [vmem:[%s11224_s1 + $0x348] ss:$16 sps:$4 sm:$0xff]  }
  0x23   :  { %4962 = vmatpush1.bf16.msra.mxu0 %v7396_v34  ;;  %5495 = vmatpush1.bf16.msra.mxu1 %v7397_v35  ;;  %v7470_v34 = vld [vmem:[%s11224_s1 + $0x2a0] ss:$16 sps:$4 sm:$0xff]   ;;  %v7473_v35 = vld [vmem:[%s11224_s1 + $0x2a8] ss:$16 sps:$4 sm:$0xff]  }
  0x24   :  { %4963 = vmatprep.subr.bf16.mxu0 %v7398_v39  ;;  %5496 = vmatprep.subr.bf16.mxu1 %v7400_v40  ;;  %v7479_v39 = vld [vmem:[%s11224_s1 + $0x2c8] ss:$16 sps:$4 sm:$0xff]   ;;  %v7484_v40 = vld [vmem:[%s11224_s1 + $0x2e4] ss:$16 sps:$4 sm:$0xff]  }
  0x27   :  { %4964 = vmatpush1.bf16.msra.mxu0 %v7402_v41  ;;  %5497 = vmatpush1.bf16.msra.mxu1 %v7403_v44  ;;  %v7487_v41 = vld [vmem:[%s11224_s1 + $0x2ec] ss:$16 sps:$4 sm:$0xff]   ;;  %v7485_v44 = vld [vmem:[%s11224_s1 + $0x2e8] ss:$16 sps:$4 sm:$0xff]  }
  0x28   :  { %4965 = vmatprep.subr.bf16.mxu0 %v7404_v45  ;;  %5498 = vmatprep.subr.bf16.mxu1 %v7406_v46  ;;  %v7490_v45 = vld [vmem:[%s11224_s1 + $0x304] ss:$16 sps:$4 sm:$0xff]   ;;  %v7493_v46 = vld [vmem:[%s11224_s1 + $0x30c] ss:$16 sps:$4 sm:$0xff]  }
  0x2b   :  { %4966 = vmatpush1.bf16.msra.mxu0 %v7408_v47  ;;  %5499 = vmatpush1.bf16.msra.mxu1 %v7409_v48  ;;  %v7488_v47 = vld [vmem:[%s11224_s1 + $0x300] ss:$16 sps:$4 sm:$0xff]   ;;  %v7491_v48 = vld [vmem:[%s11224_s1 + $0x308] ss:$16 sps:$4 sm:$0xff]  }
  0x2c   :  { %4967 = vmatprep.subr.bf16.mxu0 %v7410_v50  ;;  %5500 = vmatprep.subr.bf16.mxu1 %v7412_v51  ;;  %v7496_v50 = vld [vmem:[%s11224_s1 + $0x324] ss:$16 sps:$4 sm:$0xff]   ;;  %v7499_v51 = vld [vmem:[%s11224_s1 + $0x32c] ss:$16 sps:$4 sm:$0xff]  }
  0x2f   :  { %4968 = vmatpush1.bf16.msra.mxu0 %v7414_v53  ;;  %5501 = vmatpush1.bf16.msra.mxu1 %v7415_v55  ;;  %v7494_v53 = vld [vmem:[%s11224_s1 + $0x320] ss:$16 sps:$4 sm:$0xff]   ;;  %v7502_v55 = vld [vmem:[%s11224_s1 + $0x344] ss:$16 sps:$4 sm:$0xff]  }
  0x30   :  { %4969 = vmatprep.subr.bf16.mxu0 %v7416_v56  ;;  %5502 = vmatprep.subr.bf16.mxu1 %v7418_v57  ;;  %v7505_v56 = vld [vmem:[%s11224_s1 + $0x34c] ss:$16 sps:$4 sm:$0xff]   ;;  %v7500_v57 = vld [vmem:[%s11224_s1 + $0x340] ss:$16 sps:$4 sm:$0xff]  }
  0x33   :  { %4970 = vmatpush1.bf16.msra.mxu0 %v7420_v59  ;;  %5503 = vmatpush1.bf16.msra.mxu1 %v7421_v61  ;;  %v7508_v59 = vld [vmem:[%s11224_s1 + $0x364] ss:$16 sps:$4 sm:$0xff]   ;;  %v7506_v61 = vld [vmem:[%s11224_s1 + $0x360] ss:$16 sps:$4 sm:$0xff]  }
  0x34   :  { %4971 = vmatprep.subr.bf16.mxu0 %v7422_v62  ;;  %5504 = vmatprep.subr.bf16.mxu1 %v7424_v63  ;;  %v7509_v62 = vld [vmem:[%s11224_s1 + $0x368] ss:$16 sps:$4 sm:$0xff]   ;;  %v7514_v63 = vld [vmem:[%s11224_s1 + $0x384] ss:$16 sps:$4 sm:$0xff]  }
  0x37   :  { %4972 = vmatpush1.bf16.msra.mxu0 %v7426_v0  ;;  %5505 = vmatpush1.bf16.msra.mxu1 %v7427_v1  ;;  %v7517_v0 = vld [vmem:[%s11224_s1 + $0x38c] ss:$16 sps:$4 sm:$0xff]   ;;  %v7512_v1 = vld [vmem:[%s11224_s1 + $0x380] ss:$16 sps:$4 sm:$0xff]  }
  0x38   :  { %4973 = vmatprep.subr.bf16.mxu0 %v7428_v2  ;;  %5506 = vmatprep.subr.bf16.mxu1 %v7430_v3  ;;  %v7515_v2 = vld [vmem:[%s11224_s1 + $0x388] ss:$16 sps:$4 sm:$0xff]   ;;  %v7520_v3 = vld [vmem:[%s11224_s1 + $0x3a4] ss:$16 sps:$4 sm:$0xff]  }
  0x3b   :  { %4974 = vmatpush1.bf16.msra.mxu0 %v7432_v4  ;;  %5507 = vmatpush1.bf16.msra.mxu1 %v7433_v5  ;;  %v7523_v4 = vld [vmem:[%s11224_s1 + $0x3ac] ss:$16 sps:$4 sm:$0xff]   ;;  %v7518_v5 = vld [vmem:[%s11224_s1 + $0x3a0] ss:$16 sps:$4 sm:$0xff]  }
  0x3c   :  { %4975 = vmatprep.subr.bf16.mxu0 %v7434_v6  ;;  %5508 = vmatprep.subr.bf16.mxu1 %v7436_v7  ;;  %v7521_v6 = vld [vmem:[%s11224_s1 + $0x3a8] ss:$16 sps:$4 sm:$0xff]   ;;  %v7526_v7 = vld [vmem:[%s11224_s1 + $0x3c4] ss:$16 sps:$4 sm:$0xff]  }
  0x3f   :  { %4976 = vmatpush1.bf16.msra.mxu0 %v7438_v8  ;;  %5509 = vmatpush1.bf16.msra.mxu1 %v7439_v9  ;;  %v7529_v8 = vld [vmem:[%s11224_s1 + $0x3cc] ss:$16 sps:$4 sm:$0xff]   ;;  %v836_v9 = vcombine.high %v8760_v52, %v8760_v52 }
  0x40   :  { %4986 = vmatprep.subr.bf16.mxu0 %v7442_v10  ;;  %5519 = vmatprep.subr.bf16.mxu1 %v7445_v11  ;;  %v7524_v10 = vld [vmem:[%s11224_s1 + $0x3c0] ss:$16 sps:$4 sm:$0xff]   ;;  %v7527_v11 = vld [vmem:[%s11224_s1 + $0x3c8] ss:$16 sps:$4 sm:$0xff]   ;;  %v7535_v52 = vld [vmem:[%s11224_s1 + $0x3ec] ss:$16 sps:$4 sm:$0xff]  }
  0x42   :  { %4978 = vmatmul.mubr.bf16.vlgmr.msra.gmra.mrb[0].mxu0 %v8829_v13  ;;  %5511 = vmatmul.mubr.bf16.vlgmr.msra.gmra.mrb[0].mxu1 %v8829_v13 }
  0x43   :  { %4987 = vmatpush1.bf16.msra.mxu0 %v7440_v12  ;;  %5520 = vmatpush1.bf16.msra.mxu1 %v7443_v14  ;;  %v7532_v12 = vld [vmem:[%s11224_s1 + $0x3e4] ss:$16 sps:$4 sm:$0xff]   ;;  %v9013_v14 = vrot.slane %v836_v9, %v8749_v49  ;;  %v7611_v9 = vld [vmem:[%s11224_s1 + $0x588] ss:$16 sps:$4 sm:$0xff]  }
  0x44   :  { %4988 = vmatprep.subr.bf16.mxu0 %v7448_v15  ;;  %5521 = vmatprep.subr.bf16.mxu1 %v7451_v16  ;;  %v7530_v15 = vld [vmem:[%s11224_s1 + $0x3e0] ss:$16 sps:$4 sm:$0xff]   ;;  %v7533_v16 = vld [vmem:[%s11224_s1 + $0x3e8] ss:$16 sps:$4 sm:$0xff]  }
  0x45   :  { %5018 = vmatprep.mubr.bf16.mxu0 %v883_v17  ;;  %5551 = vmatprep.mubr.bf16.mxu1 %v883_v17  ;;  %v7538_v17 = vld [vmem:[%s11224_s1 + $0x404] ss:$16 sps:$4 sm:$0xff]  }
  0x47   :  { %4989 = vmatpush1.bf16.msra.mxu0 %v7446_v18  ;;  %5522 = vmatpush1.bf16.msra.mxu1 %v7449_v19  ;;  %v7541_v18 = vld [vmem:[%s11224_s1 + $0x40c] ss:$16 sps:$4 sm:$0xff]   ;;  %v852_v19 = vcombine.high %v9013_v14, %v9013_v14 }
  0x48   :  { %4990 = vmatprep.subr.bf16.mxu0 %v7454_v20  ;;  %5523 = vmatprep.subr.bf16.mxu1 %v7457_v21  ;;  %v7536_v20 = vld [vmem:[%s11224_s1 + $0x400] ss:$16 sps:$4 sm:$0xff]   ;;  %v881_v21 = vcombine.high %v8829_v13, %v8829_v13 }
  0x49   :  { %v7542_v13 = vld [vmem:[%s11224_s1 + $0x420] ss:$16 sps:$4 sm:$0xff]  }
  0x4b   :  { %4991 = vmatpush1.bf16.msra.mxu0 %v7452_v22  ;;  %5524 = vmatpush1.bf16.msra.mxu1 %v7455_v23  ;;  %v7539_v22 = vld [vmem:[%s11224_s1 + $0x408] ss:$16 sps:$4 sm:$0xff]   ;;  %v7544_v23 = vld [vmem:[%s11224_s1 + $0x424] ss:$16 sps:$4 sm:$0xff]  }
  0x4c   :  { %4992 = vmatprep.subr.bf16.mxu0 %v7460_v24  ;;  %5525 = vmatprep.subr.bf16.mxu1 %v7463_v25  ;;  %v7547_v24 = vld [vmem:[%s11224_s1 + $0x42c] ss:$16 sps:$4 sm:$0xff]   ;;  %v9044_v25 = vrot.slane %v852_v19, %v8749_v49  ;;  %v7628_v19 = vld [vmem:[%s11224_s1 + $0x5e4] ss:$16 sps:$4 sm:$0xff]  }
  0x4f   :  { %4993 = vmatpush1.bf16.msra.mxu0 %v7458_v26  ;;  %5526 = vmatpush1.bf16.msra.mxu1 %v7461_v27  ;;  %v7545_v26 = vld [vmem:[%s11224_s1 + $0x428] ss:$16 sps:$4 sm:$0xff]   ;;  %v7550_v27 = vld [vmem:[%s11224_s1 + $0x444] ss:$16 sps:$4 sm:$0xff]  }
  0x50   :  { %4994 = vmatprep.subr.bf16.mxu0 %v7466_v28  ;;  %5527 = vmatprep.subr.bf16.mxu1 %v7469_v29  ;;  %v7553_v28 = vld [vmem:[%s11224_s1 + $0x44c] ss:$16 sps:$4 sm:$0xff]   ;;  %v7548_v29 = vld [vmem:[%s11224_s1 + $0x440] ss:$16 sps:$4 sm:$0xff]  }
  0x53   :  { %4995 = vmatpush1.bf16.msra.mxu0 %v7464_v30  ;;  %5528 = vmatpush1.bf16.msra.mxu1 %v7467_v31  ;;  %v7551_v30 = vld [vmem:[%s11224_s1 + $0x448] ss:$16 sps:$4 sm:$0xff]   ;;  %v7556_v31 = vld [vmem:[%s11224_s1 + $0x464] ss:$16 sps:$4 sm:$0xff]  }
  0x54   :  { %4996 = vmatprep.subr.bf16.mxu0 %v7472_v32  ;;  %5529 = vmatprep.subr.bf16.mxu1 %v7475_v33  ;;  %v7559_v32 = vld [vmem:[%s11224_s1 + $0x46c] ss:$16 sps:$4 sm:$0xff]   ;;  %v7554_v33 = vld [vmem:[%s11224_s1 + $0x460] ss:$16 sps:$4 sm:$0xff]  }
  0x57   :  { %4997 = vmatpush1.bf16.msra.mxu0 %v7470_v34  ;;  %5530 = vmatpush1.bf16.msra.mxu1 %v7473_v35  ;;  %v7557_v34 = vld [vmem:[%s11224_s1 + $0x468] ss:$16 sps:$4 sm:$0xff]   ;;  %v7562_v35 = vld [vmem:[%s11224_s1 + $0x484] ss:$16 sps:$4 sm:$0xff]  }
  0x58   :  { %4998 = vmatprep.subr.bf16.mxu0 %v7478_v36  ;;  %5531 = vmatprep.subr.bf16.mxu1 %v7481_v37  ;;  %v7565_v36 = vld [vmem:[%s11224_s1 + $0x48c] ss:$16 sps:$4 sm:$0xff]   ;;  %v7560_v37 = vld [vmem:[%s11224_s1 + $0x480] ss:$16 sps:$4 sm:$0xff]  }
  0x5b   :  { %4999 = vmatpush1.bf16.msra.mxu0 %v7476_v38  ;;  %5532 = vmatpush1.bf16.msra.mxu1 %v7479_v39  ;;  %v7563_v38 = vld [vmem:[%s11224_s1 + $0x488] ss:$16 sps:$4 sm:$0xff]   ;;  %v7568_v39 = vld [vmem:[%s11224_s1 + $0x4a4] ss:$16 sps:$4 sm:$0xff]  }
  0x5c   :  { %5000 = vmatprep.subr.bf16.mxu0 %v7484_v40  ;;  %5533 = vmatprep.subr.bf16.mxu1 %v7487_v41  ;;  %v7571_v40 = vld [vmem:[%s11224_s1 + $0x4ac] ss:$16 sps:$4 sm:$0xff]   ;;  %v7566_v41 = vld [vmem:[%s11224_s1 + $0x4a0] ss:$16 sps:$4 sm:$0xff]  }
  0x5f   :  { %5001 = vmatpush1.bf16.msra.mxu0 %v7482_v43  ;;  %5534 = vmatpush1.bf16.msra.mxu1 %v7485_v44  ;;  %v7569_v43 = vld [vmem:[%s11224_s1 + $0x4a8] ss:$16 sps:$4 sm:$0xff]   ;;  %v7574_v44 = vld [vmem:[%s11224_s1 + $0x4c4] ss:$16 sps:$4 sm:$0xff]  }
  0x60   :  { %5002 = vmatprep.subr.bf16.mxu0 %v7490_v45  ;;  %5535 = vmatprep.subr.bf16.mxu1 %v7493_v46  ;;  %v7577_v45 = vld [vmem:[%s11224_s1 + $0x4cc] ss:$16 sps:$4 sm:$0xff]   ;;  %v7572_v46 = vld [vmem:[%s11224_s1 + $0x4c0] ss:$16 sps:$4 sm:$0xff]  }
  0x63   :  { %5003 = vmatpush1.bf16.msra.mxu0 %v7488_v47  ;;  %5536 = vmatpush1.bf16.msra.mxu1 %v7491_v48  ;;  %v7575_v47 = vld [vmem:[%s11224_s1 + $0x4c8] ss:$16 sps:$4 sm:$0xff]   ;;  %v7580_v48 = vld [vmem:[%s11224_s1 + $0x4e4] ss:$16 sps:$4 sm:$0xff]  }
  0x64   :  { %5004 = vmatprep.subr.bf16.mxu0 %v7496_v50  ;;  %5537 = vmatprep.subr.bf16.mxu1 %v7499_v51  ;;  %v7583_v50 = vld [vmem:[%s11224_s1 + $0x4ec] ss:$16 sps:$4 sm:$0xff]   ;;  %v7578_v51 = vld [vmem:[%s11224_s1 + $0x4e0] ss:$16 sps:$4 sm:$0xff]  }
  0x67   :  { %5005 = vmatpush1.bf16.msra.mxu0 %v7494_v53  ;;  %5538 = vmatpush1.bf16.msra.mxu1 %v7497_v54  ;;  %v7581_v53 = vld [vmem:[%s11224_s1 + $0x4e8] ss:$16 sps:$4 sm:$0xff]   ;;  %v7586_v54 = vld [vmem:[%s11224_s1 + $0x504] ss:$16 sps:$4 sm:$0xff]  }
  0x68   :  { %5006 = vmatprep.subr.bf16.mxu0 %v7502_v55  ;;  %5539 = vmatprep.subr.bf16.mxu1 %v7505_v56  ;;  %v7589_v55 = vld [vmem:[%s11224_s1 + $0x50c] ss:$16 sps:$4 sm:$0xff]   ;;  %v7584_v56 = vld [vmem:[%s11224_s1 + $0x500] ss:$16 sps:$4 sm:$0xff]  }
  0x6b   :  { %5007 = vmatpush1.bf16.msra.mxu0 %v7500_v57  ;;  %5540 = vmatpush1.bf16.msra.mxu1 %v7503_v58  ;;  %v7587_v57 = vld [vmem:[%s11224_s1 + $0x508] ss:$16 sps:$4 sm:$0xff]   ;;  %v7592_v58 = vld [vmem:[%s11224_s1 + $0x524] ss:$16 sps:$4 sm:$0xff]  }
  0x6c   :  { %5008 = vmatprep.subr.bf16.mxu0 %v7508_v59  ;;  %5541 = vmatprep.subr.bf16.mxu1 %v7511_v60  ;;  %v7595_v59 = vld [vmem:[%s11224_s1 + $0x52c] ss:$16 sps:$4 sm:$0xff]   ;;  %v7590_v60 = vld [vmem:[%s11224_s1 + $0x520] ss:$16 sps:$4 sm:$0xff]  }
  0x6f   :  { %5009 = vmatpush1.bf16.msra.mxu0 %v7506_v61  ;;  %5542 = vmatpush1.bf16.msra.mxu1 %v7509_v62  ;;  %v7593_v61 = vld [vmem:[%s11224_s1 + $0x528] ss:$16 sps:$4 sm:$0xff]   ;;  %v7598_v62 = vld [vmem:[%s11224_s1 + $0x544] ss:$16 sps:$4 sm:$0xff]  }
  0x70   :  { %5010 = vmatprep.subr.bf16.mxu0 %v7514_v63  ;;  %5543 = vmatprep.subr.bf16.mxu1 %v7517_v0  ;;  %v7601_v63 = vld [vmem:[%s11224_s1 + $0x54c] ss:$16 sps:$4 sm:$0xff]   ;;  %v7596_v0 = vld [vmem:[%s11224_s1 + $0x540] ss:$16 sps:$4 sm:$0xff]  }
  0x73   :  { %5011 = vmatpush1.bf16.msra.mxu0 %v7512_v1  ;;  %5544 = vmatpush1.bf16.msra.mxu1 %v7515_v2  ;;  %v7599_v1 = vld [vmem:[%s11224_s1 + $0x548] ss:$16 sps:$4 sm:$0xff]   ;;  %v7604_v2 = vld [vmem:[%s11224_s1 + $0x564] ss:$16 sps:$4 sm:$0xff]  }
  0x74   :  { %5012 = vmatprep.subr.bf16.mxu0 %v7520_v3  ;;  %5545 = vmatprep.subr.bf16.mxu1 %v7523_v4  ;;  %v7607_v3 = vld [vmem:[%s11224_s1 + $0x56c] ss:$16 sps:$4 sm:$0xff]   ;;  %v7602_v4 = vld [vmem:[%s11224_s1 + $0x560] ss:$16 sps:$4 sm:$0xff]  }
  0x77   :  { %5013 = vmatpush1.bf16.msra.mxu0 %v7518_v5  ;;  %5546 = vmatpush1.bf16.msra.mxu1 %v7521_v6  ;;  %v7605_v5 = vld [vmem:[%s11224_s1 + $0x568] ss:$16 sps:$4 sm:$0xff]   ;;  %v7610_v6 = vld [vmem:[%s11224_s1 + $0x584] ss:$16 sps:$4 sm:$0xff]  }
  0x78   :  { %5014 = vmatprep.subr.bf16.mxu0 %v7526_v7  ;;  %5547 = vmatprep.subr.bf16.mxu1 %v7529_v8  ;;  %v7613_v7 = vld [vmem:[%s11224_s1 + $0x58c] ss:$16 sps:$4 sm:$0xff]   ;;  %v7608_v8 = vld [vmem:[%s11224_s1 + $0x580] ss:$16 sps:$4 sm:$0xff]  }
  0x7b   :  { %5015 = vmatpush1.bf16.msra.mxu0 %v7524_v10  ;;  %5548 = vmatpush1.bf16.msra.mxu1 %v7527_v11  ;;  %v7616_v10 = vld [vmem:[%s11224_s1 + $0x5a4] ss:$16 sps:$4 sm:$0xff]   ;;  %v7619_v11 = vld [vmem:[%s11224_s1 + $0x5ac] ss:$16 sps:$4 sm:$0xff]  }
  0x7c   :  { %5016 = vmatprep.subr.bf16.mxu0 %v7532_v12  ;;  %5549 = vmatprep.subr.bf16.mxu1 %v7535_v52  ;;  %v7614_v12 = vld [vmem:[%s11224_s1 + $0x5a0] ss:$16 sps:$4 sm:$0xff]   ;;  %v7617_v52 = vld [vmem:[%s11224_s1 + $0x5a8] ss:$16 sps:$4 sm:$0xff]  }
  0x7f   :  { %5017 = vmatpush1.bf16.msra.mxu0 %v7530_v15  ;;  %5550 = vmatpush1.bf16.msra.mxu1 %v7533_v16  ;;  %v7622_v15 = vld [vmem:[%s11224_s1 + $0x5c4] ss:$16 sps:$4 sm:$0xff]   ;;  %v7625_v16 = vld [vmem:[%s11224_s1 + $0x5cc] ss:$16 sps:$4 sm:$0xff]  }
  0x80   :  { %5027 = vmatprep.subr.bf16.mxu0 %v7538_v17  ;;  %5560 = vmatprep.subr.bf16.mxu1 %v7541_v18  ;;  %v7620_v17 = vld [vmem:[%s11224_s1 + $0x5c0] ss:$16 sps:$4 sm:$0xff]   ;;  %v7623_v18 = vld [vmem:[%s11224_s1 + $0x5c8] ss:$16 sps:$4 sm:$0xff]  }
  0x82   :  { %5019 = vmatmul.mubr.bf16.vlgmr.msra.gmra.mrb[0].mxu0 %v881_v21  ;;  %5552 = vmatmul.mubr.bf16.vlgmr.msra.gmra.mrb[0].mxu1 %v881_v21  ;;  %v7626_v21 = vld [vmem:[%s11224_s1 + $0x5e0] ss:$16 sps:$4 sm:$0xff]  }
  0x83   :  { %5028 = vmatpush1.bf16.msra.mxu0 %v7536_v20  ;;  %5561 = vmatpush1.bf16.msra.mxu1 %v7539_v22  ;;  %v7631_v20 = vld [vmem:[%s11224_s1 + $0x5ec] ss:$16 sps:$4 sm:$0xff]   ;;  %v7629_v22 = vld [vmem:[%s11224_s1 + $0x5e8] ss:$16 sps:$4 sm:$0xff]  }
  0x84   :  { %5029 = vmatprep.subr.bf16.mxu0 %v7544_v23  ;;  %5562 = vmatprep.subr.bf16.mxu1 %v7547_v24  ;;  %v7635_v23 = vld [vmem:[%s11224_s1 + $0x604] ss:$16 sps:$4 sm:$0xff]   ;;  %v7638_v24 = vld [vmem:[%s11224_s1 + $0x60c] ss:$16 sps:$4 sm:$0xff]  }
  0x85   :  { %5059 = vmatprep.mubr.bf16.mxu0 %v9044_v25  ;;  %5592 = vmatprep.mubr.bf16.mxu1 %v9044_v25 }
  0x87   :  { %5030 = vmatpush1.bf16.msra.mxu0 %v7542_v13  ;;  %5563 = vmatpush1.bf16.msra.mxu1 %v7545_v26  ;;  %v7633_v13 = vld [vmem:[%s11224_s1 + $0x600] ss:$16 sps:$4 sm:$0xff]   ;;  %v9233_v26 = vrot.slane %v9013_v14, %v8749_v49  ;;  %v884_v14 = vcombine.high %v9044_v25, %v9044_v25  ;;  %v7647_v25 = vld [vmem:[%s11224_s1 + $0x644] ss:$16 sps:$4 sm:$0xff]  }
  0x88   :  { %5031 = vmatprep.subr.bf16.mxu0 %v7550_v27  ;;  %5564 = vmatprep.subr.bf16.mxu1 %v7553_v28  ;;  %v7636_v27 = vld [vmem:[%s11224_s1 + $0x608] ss:$16 sps:$4 sm:$0xff]   ;;  %v7641_v28 = vld [vmem:[%s11224_s1 + $0x624] ss:$16 sps:$4 sm:$0xff]  }
  0x8b   :  { %5032 = vmatpush1.bf16.msra.mxu0 %v7548_v29  ;;  %5565 = vmatpush1.bf16.msra.mxu1 %v7551_v30  ;;  %v7644_v29 = vld [vmem:[%s11224_s1 + $0x62c] ss:$16 sps:$4 sm:$0xff]   ;;  %v7639_v30 = vld [vmem:[%s11224_s1 + $0x620] ss:$16 sps:$4 sm:$0xff]  }
  0x8c   :  { %5033 = vmatprep.subr.bf16.mxu0 %v7556_v31  ;;  %5566 = vmatprep.subr.bf16.mxu1 %v7559_v32  ;;  %v7642_v31 = vld [vmem:[%s11224_s1 + $0x628] ss:$16 sps:$4 sm:$0xff]   ;;  %v7650_v32 = vld [vmem:[%s11224_s1 + $0x64c] ss:$16 sps:$4 sm:$0xff]  }
  0x8f   :  { %5034 = vmatpush1.bf16.msra.mxu0 %v7554_v33  ;;  %5567 = vmatpush1.bf16.msra.mxu1 %v7557_v34  ;;  %v7645_v33 = vld [vmem:[%s11224_s1 + $0x640] ss:$16 sps:$4 sm:$0xff]   ;;  %v7648_v34 = vld [vmem:[%s11224_s1 + $0x648] ss:$16 sps:$4 sm:$0xff]  }
  0x90   :  { %5035 = vmatprep.subr.bf16.mxu0 %v7562_v35  ;;  %5568 = vmatprep.subr.bf16.mxu1 %v7565_v36  ;;  %v7653_v35 = vld [vmem:[%s11224_s1 + $0x664] ss:$16 sps:$4 sm:$0xff]   ;;  %v7656_v36 = vld [vmem:[%s11224_s1 + $0x66c] ss:$16 sps:$4 sm:$0xff]  }
  0x93   :  { %5036 = vmatpush1.bf16.msra.mxu0 %v7560_v37  ;;  %5569 = vmatpush1.bf16.msra.mxu1 %v7563_v38  ;;  %v7651_v37 = vld [vmem:[%s11224_s1 + $0x660] ss:$16 sps:$4 sm:$0xff]   ;;  %v7654_v38 = vld [vmem:[%s11224_s1 + $0x668] ss:$16 sps:$4 sm:$0xff]  }
  0x94   :  { %5037 = vmatprep.subr.bf16.mxu0 %v7568_v39  ;;  %5570 = vmatprep.subr.bf16.mxu1 %v7571_v40  ;;  %v7659_v39 = vld [vmem:[%s11224_s1 + $0x684] ss:$16 sps:$4 sm:$0xff]   ;;  %v7662_v40 = vld [vmem:[%s11224_s1 + $0x68c] ss:$16 sps:$4 sm:$0xff]  }
  0x97   :  { %5038 = vmatpush1.bf16.msra.mxu0 %v7566_v41  ;;  %5571 = vmatpush1.bf16.msra.mxu1 %v7569_v43  ;;  %v7657_v41 = vld [vmem:[%s11224_s1 + $0x680] ss:$16 sps:$4 sm:$0xff]   ;;  %v7660_v43 = vld [vmem:[%s11224_s1 + $0x688] ss:$16 sps:$4 sm:$0xff]  }
  0x98   :  { %5039 = vmatprep.subr.bf16.mxu0 %v7574_v44  ;;  %5572 = vmatprep.subr.bf16.mxu1 %v7577_v45  ;;  %v7665_v44 = vld [vmem:[%s11224_s1 + $0x6a4] ss:$16 sps:$4 sm:$0xff]   ;;  %v7668_v45 = vld [vmem:[%s11224_s1 + $0x6ac] ss:$16 sps:$4 sm:$0xff]  }
  0x9b   :  { %5040 = vmatpush1.bf16.msra.mxu0 %v7572_v46  ;;  %5573 = vmatpush1.bf16.msra.mxu1 %v7575_v47  ;;  %v7663_v46 = vld [vmem:[%s11224_s1 + $0x6a0] ss:$16 sps:$4 sm:$0xff]   ;;  %v7666_v47 = vld [vmem:[%s11224_s1 + $0x6a8] ss:$16 sps:$4 sm:$0xff]  }
  0x9c   :  { %5041 = vmatprep.subr.bf16.mxu0 %v7580_v48  ;;  %5574 = vmatprep.subr.bf16.mxu1 %v7583_v50  ;;  %v7671_v48 = vld [vmem:[%s11224_s1 + $0x6c4] ss:$16 sps:$4 sm:$0xff]   ;;  %v7674_v50 = vld [vmem:[%s11224_s1 + $0x6cc] ss:$16 sps:$4 sm:$0xff]  }
  0x9f   :  { %5042 = vmatpush1.bf16.msra.mxu0 %v7578_v51  ;;  %5575 = vmatpush1.bf16.msra.mxu1 %v7581_v53  ;;  %v7669_v51 = vld [vmem:[%s11224_s1 + $0x6c0] ss:$16 sps:$4 sm:$0xff]   ;;  %v7672_v53 = vld [vmem:[%s11224_s1 + $0x6c8] ss:$16 sps:$4 sm:$0xff]  }
  0xa0   :  { %5043 = vmatprep.subr.bf16.mxu0 %v7586_v54  ;;  %5576 = vmatprep.subr.bf16.mxu1 %v7589_v55  ;;  %v7677_v54 = vld [vmem:[%s11224_s1 + $0x6e4] ss:$16 sps:$4 sm:$0xff]   ;;  %v7680_v55 = vld [vmem:[%s11224_s1 + $0x6ec] ss:$16 sps:$4 sm:$0xff]  }
  0xa3   :  { %5044 = vmatpush1.bf16.msra.mxu0 %v7584_v56  ;;  %5577 = vmatpush1.bf16.msra.mxu1 %v7587_v57  ;;  %v7675_v56 = vld [vmem:[%s11224_s1 + $0x6e0] ss:$16 sps:$4 sm:$0xff]   ;;  %v7678_v57 = vld [vmem:[%s11224_s1 + $0x6e8] ss:$16 sps:$4 sm:$0xff]  }
  0xa4   :  { %5045 = vmatprep.subr.bf16.mxu0 %v7592_v58  ;;  %5578 = vmatprep.subr.bf16.mxu1 %v7595_v59  ;;  %v7683_v58 = vld [vmem:[%s11224_s1 + $0x704] ss:$16 sps:$4 sm:$0xff]   ;;  %v7686_v59 = vld [vmem:[%s11224_s1 + $0x70c] ss:$16 sps:$4 sm:$0xff]  }
  0xa7   :  { %5046 = vmatpush1.bf16.msra.mxu0 %v7590_v60  ;;  %5579 = vmatpush1.bf16.msra.mxu1 %v7593_v61  ;;  %v7681_v60 = vld [vmem:[%s11224_s1 + $0x700] ss:$16 sps:$4 sm:$0xff]   ;;  %v7684_v61 = vld [vmem:[%s11224_s1 + $0x708] ss:$16 sps:$4 sm:$0xff]  }
  0xa8   :  { %5047 = vmatprep.subr.bf16.mxu0 %v7598_v62  ;;  %5580 = vmatprep.subr.bf16.mxu1 %v7601_v63  ;;  %v7689_v62 = vld [vmem:[%s11224_s1 + $0x724] ss:$16 sps:$4 sm:$0xff]   ;;  %v7692_v63 = vld [vmem:[%s11224_s1 + $0x72c] ss:$16 sps:$4 sm:$0xff]  }
  0xab   :  { %5048 = vmatpush1.bf16.msra.mxu0 %v7596_v0  ;;  %5581 = vmatpush1.bf16.msra.mxu1 %v7599_v1  ;;  %v7687_v0 = vld [vmem:[%s11224_s1 + $0x720] ss:$16 sps:$4 sm:$0xff]   ;;  %v7690_v1 = vld [vmem:[%s11224_s1 + $0x728] ss:$16 sps:$4 sm:$0xff]  }
  0xac   :  { %5049 = vmatprep.subr.bf16.mxu0 %v7604_v2  ;;  %5582 = vmatprep.subr.bf16.mxu1 %v7607_v3  ;;  %v7695_v2 = vld [vmem:[%s11224_s1 + $0x744] ss:$16 sps:$4 sm:$0xff]   ;;  %v7698_v3 = vld [vmem:[%s11224_s1 + $0x74c] ss:$16 sps:$4 sm:$0xff]  }
  0xaf   :  { %5050 = vmatpush1.bf16.msra.mxu0 %v7602_v4  ;;  %5583 = vmatpush1.bf16.msra.mxu1 %v7605_v5  ;;  %v7693_v4 = vld [vmem:[%s11224_s1 + $0x740] ss:$16 sps:$4 sm:$0xff]   ;;  %v7696_v5 = vld [vmem:[%s11224_s1 + $0x748] ss:$16 sps:$4 sm:$0xff]  }
  0xb0   :  { %5051 = vmatprep.subr.bf16.mxu0 %v7610_v6  ;;  %5584 = vmatprep.subr.bf16.mxu1 %v7613_v7  ;;  %v7701_v6 = vld [vmem:[%s11224_s1 + $0x764] ss:$16 sps:$4 sm:$0xff]   ;;  %v7704_v7 = vld [vmem:[%s11224_s1 + $0x76c] ss:$16 sps:$4 sm:$0xff]  }
  0xb3   :  { %5052 = vmatpush1.bf16.msra.mxu0 %v7608_v8  ;;  %5585 = vmatpush1.bf16.msra.mxu1 %v7611_v9  ;;  %v7699_v8 = vld [vmem:[%s11224_s1 + $0x760] ss:$16 sps:$4 sm:$0xff]   ;;  %v7702_v9 = vld [vmem:[%s11224_s1 + $0x768] ss:$16 sps:$4 sm:$0xff]  }
  0xb4   :  { %5053 = vmatprep.subr.bf16.mxu0 %v7616_v10  ;;  %5586 = vmatprep.subr.bf16.mxu1 %v7619_v11  ;;  %v7707_v10 = vld [vmem:[%s11224_s1 + $0x784] ss:$16 sps:$4 sm:$0xff]   ;;  %v7710_v11 = vld [vmem:[%s11224_s1 + $0x78c] ss:$16 sps:$4 sm:$0xff]  }
  0xb7   :  { %5054 = vmatpush1.bf16.msra.mxu0 %v7614_v12  ;;  %5587 = vmatpush1.bf16.msra.mxu1 %v7617_v52  ;;  %v7705_v12 = vld [vmem:[%s11224_s1 + $0x780] ss:$16 sps:$4 sm:$0xff]   ;;  %v7708_v52 = vld [vmem:[%s11224_s1 + $0x788] ss:$16 sps:$4 sm:$0xff]  }
  0xb8   :  { %5055 = vmatprep.subr.bf16.mxu0 %v7622_v15  ;;  %5588 = vmatprep.subr.bf16.mxu1 %v7625_v16  ;;  %v7713_v15 = vld [vmem:[%s11224_s1 + $0x7a4] ss:$16 sps:$4 sm:$0xff]   ;;  %v7716_v16 = vld [vmem:[%s11224_s1 + $0x7ac] ss:$16 sps:$4 sm:$0xff]  }
  0xbb   :  { %5056 = vmatpush1.bf16.msra.mxu0 %v7620_v17  ;;  %5589 = vmatpush1.bf16.msra.mxu1 %v7623_v18  ;;  %v7711_v17 = vld [vmem:[%s11224_s1 + $0x7a0] ss:$16 sps:$4 sm:$0xff]   ;;  %v7714_v18 = vld [vmem:[%s11224_s1 + $0x7a8] ss:$16 sps:$4 sm:$0xff]  }
  0xbc   :  { %5057 = vmatprep.subr.bf16.mxu0 %v7628_v19  ;;  %5590 = vmatprep.subr.bf16.mxu1 %v7631_v20  ;;  %v7719_v19 = vld [vmem:[%s11224_s1 + $0x7c4] ss:$16 sps:$4 sm:$0xff]   ;;  %v7722_v20 = vld [vmem:[%s11224_s1 + $0x7cc] ss:$16 sps:$4 sm:$0xff]  }
  0xbf   :  { %5058 = vmatpush1.bf16.msra.mxu0 %v7626_v21  ;;  %5591 = vmatpush1.bf16.msra.mxu1 %v7629_v22  ;;  %v9407_v21 = vld.sshfl [vmem:[%s11223_s0 + $0x8] sm:$0xff pattern:$0x75316420]  ;;  %v7717_v22 = vld [vmem:[%s11224_s1 + $0x7c0] ss:$16 sps:$4 sm:$0xff]  }
  0xc0   :  { %5068 = vmatprep.subr.bf16.mxu0 %v7635_v23  ;;  %5601 = vmatprep.subr.bf16.mxu1 %v7638_v24  ;;  %v7720_v23 = vld [vmem:[%s11224_s1 + $0x7c8] ss:$16 sps:$4 sm:$0xff]   ;;  %v7725_v24 = vld [vmem:[%s11224_s1 + $0x7e4] ss:$16 sps:$4 sm:$0xff]  }
  0xc2   :  { %5060 = vmatmul.mubr.bf16.vlgmr.msra.gmra.mrb[0].mxu0 %v9233_v26  ;;  %5593 = vmatmul.mubr.bf16.vlgmr.msra.gmra.mrb[0].mxu1 %v9233_v26 }
  0xc3   :  { %5069 = vmatpush1.bf16.msra.mxu0 %v7633_v13  ;;  %5602 = vmatpush1.bf16.msra.mxu1 %v7636_v27  ;;  %v7728_v13 = vld [vmem:[%s11224_s1 + $0x7ec] ss:$16 sps:$4 sm:$0xff]   ;;  %v7723_v27 = vld [vmem:[%s11224_s1 + $0x7e0] ss:$16 sps:$4 sm:$0xff]  }
  0xc4   :  { %5070 = vmatprep.subr.bf16.mxu0 %v7641_v28  ;;  %5603 = vmatprep.subr.bf16.mxu1 %v7644_v29  ;;  %v7726_v28 = vld [vmem:[%s11224_s1 + $0x7e8] ss:$16 sps:$4 sm:$0xff]   ;;  %v7731_v29 = vld [vmem:[%s11224_s1 + $0x804] ss:$16 sps:$4 sm:$0xff]  }
  0xc5   :  { %5100 = vmatprep.mubr.bf16.mxu0 %v884_v14  ;;  %5633 = vmatprep.mubr.bf16.mxu1 %v884_v14  ;;  %v7734_v14 = vld [vmem:[%s11224_s1 + $0x80c] ss:$16 sps:$4 sm:$0xff]  }
  0xc7   :  { %5071 = vmatpush1.bf16.msra.mxu0 %v7639_v30  ;;  %5604 = vmatpush1.bf16.msra.mxu1 %v7642_v31  ;;  %v900_v30 = vcombine.high %v9407_v21, %v9407_v21  ;;  %v882_v31 = vcombine.high %v9233_v26, %v9233_v26  ;;  %v7740_v26 = vld [vmem:[%s11224_s1 + $0x82c] ss:$16 sps:$4 sm:$0xff]  }
  0xc8   :  { %5072 = vmatprep.subr.bf16.mxu0 %v7647_v25  ;;  %5605 = vmatprep.subr.bf16.mxu1 %v7650_v32  ;;  %v7729_v25 = vld [vmem:[%s11224_s1 + $0x800] ss:$16 sps:$4 sm:$0xff]   ;;  %v7732_v32 = vld [vmem:[%s11224_s1 + $0x808] ss:$16 sps:$4 sm:$0xff]  }
  0xcb   :  { %5073 = vmatpush1.bf16.msra.mxu0 %v7645_v33  ;;  %5606 = vmatpush1.bf16.msra.mxu1 %v7648_v34  ;;  %v7737_v33 = vld [vmem:[%s11224_s1 + $0x824] ss:$16 sps:$4 sm:$0xff]   ;;  %v9450_v34 = vrot.slane %v900_v30, %v8749_v49 }
  0xcc   :  { %5074 = vmatprep.subr.bf16.mxu0 %v7653_v35  ;;  %5607 = vmatprep.subr.bf16.mxu1 %v7656_v36  ;;  %v7735_v35 = vld [vmem:[%s11224_s1 + $0x820] ss:$16 sps:$4 sm:$0xff]   ;;  %v7738_v36 = vld [vmem:[%s11224_s1 + $0x828] ss:$16 sps:$4 sm:$0xff]   ;;  %v7821_v30 = vld [vmem:[%s11224_s1 + $0x9e4] ss:$16 sps:$4 sm:$0xff]  }
  0xcf   :  { %5075 = vmatpush1.bf16.msra.mxu0 %v7651_v37  ;;  %5608 = vmatpush1.bf16.msra.mxu1 %v7654_v38  ;;  %v7743_v37 = vld [vmem:[%s11224_s1 + $0x844] ss:$16 sps:$4 sm:$0xff]   ;;  %v7746_v38 = vld [vmem:[%s11224_s1 + $0x84c] ss:$16 sps:$4 sm:$0xff]  }
  0xd0   :  { %5076 = vmatprep.subr.bf16.mxu0 %v7659_v39  ;;  %5609 = vmatprep.subr.bf16.mxu1 %v7662_v40  ;;  %v7741_v39 = vld [vmem:[%s11224_s1 + $0x840] ss:$16 sps:$4 sm:$0xff]   ;;  %v7744_v40 = vld [vmem:[%s11224_s1 + $0x848] ss:$16 sps:$4 sm:$0xff]  }
  0xd3   :  { %5077 = vmatpush1.bf16.msra.mxu0 %v7657_v41  ;;  %5610 = vmatpush1.bf16.msra.mxu1 %v7660_v43  ;;  %v7749_v41 = vld [vmem:[%s11224_s1 + $0x864] ss:$16 sps:$4 sm:$0xff]   ;;  %v7752_v43 = vld [vmem:[%s11224_s1 + $0x86c] ss:$16 sps:$4 sm:$0xff]  }
  0xd4   :  { %5078 = vmatprep.subr.bf16.mxu0 %v7665_v44  ;;  %5611 = vmatprep.subr.bf16.mxu1 %v7668_v45  ;;  %v7747_v44 = vld [vmem:[%s11224_s1 + $0x860] ss:$16 sps:$4 sm:$0xff]   ;;  %v7750_v45 = vld [vmem:[%s11224_s1 + $0x868] ss:$16 sps:$4 sm:$0xff]  }
  0xd7   :  { %5079 = vmatpush1.bf16.msra.mxu0 %v7663_v46  ;;  %5612 = vmatpush1.bf16.msra.mxu1 %v7666_v47  ;;  %v7755_v46 = vld [vmem:[%s11224_s1 + $0x884] ss:$16 sps:$4 sm:$0xff]   ;;  %v7758_v47 = vld [vmem:[%s11224_s1 + $0x88c] ss:$16 sps:$4 sm:$0xff]  }
  0xd8   :  { %5080 = vmatprep.subr.bf16.mxu0 %v7671_v48  ;;  %5613 = vmatprep.subr.bf16.mxu1 %v7674_v50  ;;  %v7753_v48 = vld [vmem:[%s11224_s1 + $0x880] ss:$16 sps:$4 sm:$0xff]   ;;  %v7756_v50 = vld [vmem:[%s11224_s1 + $0x888] ss:$16 sps:$4 sm:$0xff]  }
  0xdb   :  { %5081 = vmatpush1.bf16.msra.mxu0 %v7669_v51  ;;  %5614 = vmatpush1.bf16.msra.mxu1 %v7672_v53  ;;  %v7761_v51 = vld [vmem:[%s11224_s1 + $0x8a4] ss:$16 sps:$4 sm:$0xff]   ;;  %v7764_v53 = vld [vmem:[%s11224_s1 + $0x8ac] ss:$16 sps:$4 sm:$0xff]  }
  0xdc   :  { %5082 = vmatprep.subr.bf16.mxu0 %v7677_v54  ;;  %5615 = vmatprep.subr.bf16.mxu1 %v7680_v55  ;;  %v7759_v54 = vld [vmem:[%s11224_s1 + $0x8a0] ss:$16 sps:$4 sm:$0xff]   ;;  %v7762_v55 = vld [vmem:[%s11224_s1 + $0x8a8] ss:$16 sps:$4 sm:$0xff]  }
  0xdf   :  { %5083 = vmatpush1.bf16.msra.mxu0 %v7675_v56  ;;  %5616 = vmatpush1.bf16.msra.mxu1 %v7678_v57  ;;  %v7767_v56 = vld [vmem:[%s11224_s1 + $0x8c4] ss:$16 sps:$4 sm:$0xff]   ;;  %v7770_v57 = vld [vmem:[%s11224_s1 + $0x8cc] ss:$16 sps:$4 sm:$0xff]  }
  0xe0   :  { %5084 = vmatprep.subr.bf16.mxu0 %v7683_v58  ;;  %5617 = vmatprep.subr.bf16.mxu1 %v7686_v59  ;;  %v7765_v58 = vld [vmem:[%s11224_s1 + $0x8c0] ss:$16 sps:$4 sm:$0xff]   ;;  %v7768_v59 = vld [vmem:[%s11224_s1 + $0x8c8] ss:$16 sps:$4 sm:$0xff]  }
  0xe3   :  { %5085 = vmatpush1.bf16.msra.mxu0 %v7681_v60  ;;  %5618 = vmatpush1.bf16.msra.mxu1 %v7684_v61  ;;  %v7773_v60 = vld [vmem:[%s11224_s1 + $0x8e4] ss:$16 sps:$4 sm:$0xff]   ;;  %v7776_v61 = vld [vmem:[%s11224_s1 + $0x8ec] ss:$16 sps:$4 sm:$0xff]  }
  0xe4   :  { %5086 = vmatprep.subr.bf16.mxu0 %v7689_v62  ;;  %5619 = vmatprep.subr.bf16.mxu1 %v7692_v63  ;;  %v7771_v62 = vld [vmem:[%s11224_s1 + $0x8e0] ss:$16 sps:$4 sm:$0xff]   ;;  %v7774_v63 = vld [vmem:[%s11224_s1 + $0x8e8] ss:$16 sps:$4 sm:$0xff]  }
  0xe7   :  { %5087 = vmatpush1.bf16.msra.mxu0 %v7687_v0  ;;  %5620 = vmatpush1.bf16.msra.mxu1 %v7690_v1  ;;  %v7779_v0 = vld [vmem:[%s11224_s1 + $0x904] ss:$16 sps:$4 sm:$0xff]   ;;  %v7782_v1 = vld [vmem:[%s11224_s1 + $0x90c] ss:$16 sps:$4 sm:$0xff]  }
  0xe8   :  { %5088 = vmatprep.subr.bf16.mxu0 %v7695_v2  ;;  %5621 = vmatprep.subr.bf16.mxu1 %v7698_v3  ;;  %v7777_v2 = vld [vmem:[%s11224_s1 + $0x900] ss:$16 sps:$4 sm:$0xff]   ;;  %v7780_v3 = vld [vmem:[%s11224_s1 + $0x908] ss:$16 sps:$4 sm:$0xff]  }
  0xeb   :  { %5089 = vmatpush1.bf16.msra.mxu0 %v7693_v4  ;;  %5622 = vmatpush1.bf16.msra.mxu1 %v7696_v5  ;;  %v7785_v4 = vld [vmem:[%s11224_s1 + $0x924] ss:$16 sps:$4 sm:$0xff]   ;;  %v7788_v5 = vld [vmem:[%s11224_s1 + $0x92c] ss:$16 sps:$4 sm:$0xff]  }
  0xec   :  { %5090 = vmatprep.subr.bf16.mxu0 %v7701_v6  ;;  %5623 = vmatprep.subr.bf16.mxu1 %v7704_v7  ;;  %v7783_v6 = vld [vmem:[%s11224_s1 + $0x920] ss:$16 sps:$4 sm:$0xff]   ;;  %v7786_v7 = vld [vmem:[%s11224_s1 + $0x928] ss:$16 sps:$4 sm:$0xff]  }
  0xef   :  { %5091 = vmatpush1.bf16.msra.mxu0 %v7699_v8  ;;  %5624 = vmatpush1.bf16.msra.mxu1 %v7702_v9  ;;  %v7791_v8 = vld [vmem:[%s11224_s1 + $0x944] ss:$16 sps:$4 sm:$0xff]   ;;  %v7794_v9 = vld [vmem:[%s11224_s1 + $0x94c] ss:$16 sps:$4 sm:$0xff]  }
  0xf0   :  { %5092 = vmatprep.subr.bf16.mxu0 %v7707_v10  ;;  %5625 = vmatprep.subr.bf16.mxu1 %v7710_v11  ;;  %v7789_v10 = vld [vmem:[%s11224_s1 + $0x940] ss:$16 sps:$4 sm:$0xff]   ;;  %v7792_v11 = vld [vmem:[%s11224_s1 + $0x948] ss:$16 sps:$4 sm:$0xff]  }
  0xf3   :  { %5093 = vmatpush1.bf16.msra.mxu0 %v7705_v12  ;;  %5626 = vmatpush1.bf16.msra.mxu1 %v7708_v52  ;;  %v7797_v12 = vld [vmem:[%s11224_s1 + $0x964] ss:$16 sps:$4 sm:$0xff]   ;;  %v7800_v52 = vld [vmem:[%s11224_s1 + $0x96c] ss:$16 sps:$4 sm:$0xff]  }
  0xf4   :  { %5094 = vmatprep.subr.bf16.mxu0 %v7713_v15  ;;  %5627 = vmatprep.subr.bf16.mxu1 %v7716_v16  ;;  %v7795_v15 = vld [vmem:[%s11224_s1 + $0x960] ss:$16 sps:$4 sm:$0xff]   ;;  %v7798_v16 = vld [vmem:[%s11224_s1 + $0x968] ss:$16 sps:$4 sm:$0xff]  }
  0xf7   :  { %5095 = vmatpush1.bf16.msra.mxu0 %v7711_v17  ;;  %5628 = vmatpush1.bf16.msra.mxu1 %v7714_v18  ;;  %v7803_v17 = vld [vmem:[%s11224_s1 + $0x984] ss:$16 sps:$4 sm:$0xff]   ;;  %v7806_v18 = vld [vmem:[%s11224_s1 + $0x98c] ss:$16 sps:$4 sm:$0xff]  }
  0xf8   :  { %5096 = vmatprep.subr.bf16.mxu0 %v7719_v19  ;;  %5629 = vmatprep.subr.bf16.mxu1 %v7722_v20  ;;  %v7801_v19 = vld [vmem:[%s11224_s1 + $0x980] ss:$16 sps:$4 sm:$0xff]   ;;  %v7804_v20 = vld [vmem:[%s11224_s1 + $0x988] ss:$16 sps:$4 sm:$0xff]  }
  0xfb   :  { %5097 = vmatpush1.bf16.msra.mxu0 %v7717_v22  ;;  %5630 = vmatpush1.bf16.msra.mxu1 %v7720_v23  ;;  %v7809_v22 = vld [vmem:[%s11224_s1 + $0x9a4] ss:$16 sps:$4 sm:$0xff]   ;;  %v7812_v23 = vld [vmem:[%s11224_s1 + $0x9ac] ss:$16 sps:$4 sm:$0xff]  }
  0xfc   :  { %5098 = vmatprep.subr.bf16.mxu0 %v7725_v24  ;;  %5631 = vmatprep.subr.bf16.mxu1 %v7728_v13  ;;  %v7807_v24 = vld [vmem:[%s11224_s1 + $0x9a0] ss:$16 sps:$4 sm:$0xff]   ;;  %v7810_v13 = vld [vmem:[%s11224_s1 + $0x9a8] ss:$16 sps:$4 sm:$0xff]  }
  0xff   :  { %5099 = vmatpush1.bf16.msra.mxu0 %v7723_v27  ;;  %5632 = vmatpush1.bf16.msra.mxu1 %v7726_v28  ;;  %v7815_v27 = vld [vmem:[%s11224_s1 + $0x9c4] ss:$16 sps:$4 sm:$0xff]   ;;  %v7818_v28 = vld [vmem:[%s11224_s1 + $0x9cc] ss:$16 sps:$4 sm:$0xff]  }
 0x100   :  { %5109 = vmatprep.subr.bf16.mxu0 %v7731_v29  ;;  %5642 = vmatprep.subr.bf16.mxu1 %v7734_v14  ;;  %v7813_v29 = vld [vmem:[%s11224_s1 + $0x9c0] ss:$16 sps:$4 sm:$0xff]   ;;  %v7816_v14 = vld [vmem:[%s11224_s1 + $0x9c8] ss:$16 sps:$4 sm:$0xff]  }
 0x102   :  { %5101 = vmatmul.mubr.bf16.vlgmr.msra.gmra.mrb[0].mxu0 %v882_v31  ;;  %5634 = vmatmul.mubr.bf16.vlgmr.msra.gmra.mrb[0].mxu1 %v882_v31  ;;  %v7824_v31 = vld [vmem:[%s11224_s1 + $0x9ec] ss:$16 sps:$4 sm:$0xff]  }
 0x103   :  { %5110 = vmatpush1.bf16.msra.mxu0 %v7729_v25  ;;  %5643 = vmatpush1.bf16.msra.mxu1 %v7732_v32  ;;  %v7819_v25 = vld [vmem:[%s11224_s1 + $0x9e0] ss:$16 sps:$4 sm:$0xff]   ;;  %v7822_v32 = vld [vmem:[%s11224_s1 + $0x9e8] ss:$16 sps:$4 sm:$0xff]  }
 0x104   :  { %5111 = vmatprep.subr.bf16.mxu0 %v7737_v33  ;;  %5644 = vmatprep.subr.bf16.mxu1 %v7740_v26  ;;  %v7827_v33 = vld [vmem:[%s11224_s1 + $0xa04] ss:$16 sps:$4 sm:$0xff]   ;;  %v7830_v26 = vld [vmem:[%s11224_s1 + $0xa0c] ss:$16 sps:$4 sm:$0xff]  }
 0x105   :  { %5141 = vmatprep.mubr.bf16.mxu0 %v9450_v34  ;;  %5674 = vmatprep.mubr.bf16.mxu1 %v9450_v34 }
 0x107   :  { %5112 = vmatpush1.bf16.msra.mxu0 %v7735_v35  ;;  %5645 = vmatpush1.bf16.msra.mxu1 %v7738_v36  ;;  %v9636_v35 = vrot.slane %v9407_v21, %v8749_v49  ;;  %v7825_v36 = vld [vmem:[%s11224_s1 + $0xa00] ss:$16 sps:$4 sm:$0xff]   ;;  %v7836_v21 = vld [vmem:[%s11224_s1 + $0xa2c] ss:$16 sps:$4 sm:$0xff]  }
 0x108   :  { %5113 = vmatprep.subr.bf16.mxu0 %v7743_v37  ;;  %5646 = vmatprep.subr.bf16.mxu1 %v7746_v38  ;;  %v7828_v37 = vld [vmem:[%s11224_s1 + $0xa08] ss:$16 sps:$4 sm:$0xff]   ;;  %v7833_v38 = vld [vmem:[%s11224_s1 + $0xa24] ss:$16 sps:$4 sm:$0xff]  }
 0x10b   :  { %5114 = vmatpush1.bf16.msra.mxu0 %v7741_v39  ;;  %5647 = vmatpush1.bf16.msra.mxu1 %v7744_v40  ;;  %v932_v39 = vcombine.high %v9450_v34, %v9450_v34  ;;  %v7831_v40 = vld [vmem:[%s11224_s1 + $0xa20] ss:$16 sps:$4 sm:$0xff]   ;;  %v7839_v34 = vld [vmem:[%s11224_s1 + $0xa44] ss:$16 sps:$4 sm:$0xff]  }
 0x10c   :  { %5115 = vmatprep.subr.bf16.mxu0 %v7749_v41  ;;  %5648 = vmatprep.subr.bf16.mxu1 %v7752_v43  ;;  %v7834_v41 = vld [vmem:[%s11224_s1 + $0xa28] ss:$16 sps:$4 sm:$0xff]   ;;  %v7842_v43 = vld [vmem:[%s11224_s1 + $0xa4c] ss:$16 sps:$4 sm:$0xff]  }
 0x10f   :  { %5116 = vmatpush1.bf16.msra.mxu0 %v7747_v44  ;;  %5649 = vmatpush1.bf16.msra.mxu1 %v7750_v45  ;;  %v7837_v44 = vld [vmem:[%s11224_s1 + $0xa40] ss:$16 sps:$4 sm:$0xff]   ;;  %v7840_v45 = vld [vmem:[%s11224_s1 + $0xa48] ss:$16 sps:$4 sm:$0xff]  }
 0x110   :  { %5117 = vmatprep.subr.bf16.mxu0 %v7755_v46  ;;  %5650 = vmatprep.subr.bf16.mxu1 %v7758_v47  ;;  %v7845_v46 = vld [vmem:[%s11224_s1 + $0xa64] ss:$16 sps:$4 sm:$0xff]   ;;  %v7848_v47 = vld [vmem:[%s11224_s1 + $0xa6c] ss:$16 sps:$4 sm:$0xff]  }
 0x113   :  { %5118 = vmatpush1.bf16.msra.mxu0 %v7753_v48  ;;  %5651 = vmatpush1.bf16.msra.mxu1 %v7756_v50  ;;  %v7843_v48 = vld [vmem:[%s11224_s1 + $0xa60] ss:$16 sps:$4 sm:$0xff]   ;;  %v7846_v50 = vld [vmem:[%s11224_s1 + $0xa68] ss:$16 sps:$4 sm:$0xff]  }
 0x114   :  { %5119 = vmatprep.subr.bf16.mxu0 %v7761_v51  ;;  %5652 = vmatprep.subr.bf16.mxu1 %v7764_v53  ;;  %v7851_v51 = vld [vmem:[%s11224_s1 + $0xa84] ss:$16 sps:$4 sm:$0xff]   ;;  %v7854_v53 = vld [vmem:[%s11224_s1 + $0xa8c] ss:$16 sps:$4 sm:$0xff]  }
 0x117   :  { %5120 = vmatpush1.bf16.msra.mxu0 %v7759_v54  ;;  %5653 = vmatpush1.bf16.msra.mxu1 %v7762_v55  ;;  %v7849_v54 = vld [vmem:[%s11224_s1 + $0xa80] ss:$16 sps:$4 sm:$0xff]   ;;  %v7852_v55 = vld [vmem:[%s11224_s1 + $0xa88] ss:$16 sps:$4 sm:$0xff]  }
 0x118   :  { %5121 = vmatprep.subr.bf16.mxu0 %v7767_v56  ;;  %5654 = vmatprep.subr.bf16.mxu1 %v7770_v57  ;;  %v7857_v56 = vld [vmem:[%s11224_s1 + $0xaa4] ss:$16 sps:$4 sm:$0xff]   ;;  %v7860_v57 = vld [vmem:[%s11224_s1 + $0xaac] ss:$16 sps:$4 sm:$0xff]  }
 0x11b   :  { %5122 = vmatpush1.bf16.msra.mxu0 %v7765_v58  ;;  %5655 = vmatpush1.bf16.msra.mxu1 %v7768_v59  ;;  %v7855_v58 = vld [vmem:[%s11224_s1 + $0xaa0] ss:$16 sps:$4 sm:$0xff]   ;;  %v7858_v59 = vld [vmem:[%s11224_s1 + $0xaa8] ss:$16 sps:$4 sm:$0xff]  }
 0x11c   :  { %5123 = vmatprep.subr.bf16.mxu0 %v7773_v60  ;;  %5656 = vmatprep.subr.bf16.mxu1 %v7776_v61  ;;  %v7863_v60 = vld [vmem:[%s11224_s1 + $0xac4] ss:$16 sps:$4 sm:$0xff]   ;;  %v7866_v61 = vld [vmem:[%s11224_s1 + $0xacc] ss:$16 sps:$4 sm:$0xff]  }
 0x11f   :  { %5124 = vmatpush1.bf16.msra.mxu0 %v7771_v62  ;;  %5657 = vmatpush1.bf16.msra.mxu1 %v7774_v63  ;;  %v7861_v62 = vld [vmem:[%s11224_s1 + $0xac0] ss:$16 sps:$4 sm:$0xff]   ;;  %v7864_v63 = vld [vmem:[%s11224_s1 + $0xac8] ss:$16 sps:$4 sm:$0xff]  }
 0x120   :  { %5125 = vmatprep.subr.bf16.mxu0 %v7779_v0  ;;  %5658 = vmatprep.subr.bf16.mxu1 %v7782_v1  ;;  %v7869_v0 = vld [vmem:[%s11224_s1 + $0xae4] ss:$16 sps:$4 sm:$0xff]   ;;  %v7872_v1 = vld [vmem:[%s11224_s1 + $0xaec] ss:$16 sps:$4 sm:$0xff]  }
 0x123   :  { %5126 = vmatpush1.bf16.msra.mxu0 %v7777_v2  ;;  %5659 = vmatpush1.bf16.msra.mxu1 %v7780_v3  ;;  %v7867_v2 = vld [vmem:[%s11224_s1 + $0xae0] ss:$16 sps:$4 sm:$0xff]   ;;  %v7870_v3 = vld [vmem:[%s11224_s1 + $0xae8] ss:$16 sps:$4 sm:$0xff]  }
 0x124   :  { %5127 = vmatprep.subr.bf16.mxu0 %v7785_v4  ;;  %5660 = vmatprep.subr.bf16.mxu1 %v7788_v5  ;;  %v7875_v4 = vld [vmem:[%s11224_s1 + $0xb04] ss:$16 sps:$4 sm:$0xff]   ;;  %v7878_v5 = vld [vmem:[%s11224_s1 + $0xb0c] ss:$16 sps:$4 sm:$0xff]  }
 0x127   :  { %5128 = vmatpush1.bf16.msra.mxu0 %v7783_v6  ;;  %5661 = vmatpush1.bf16.msra.mxu1 %v7786_v7  ;;  %v7873_v6 = vld [vmem:[%s11224_s1 + $0xb00] ss:$16 sps:$4 sm:$0xff]   ;;  %v7876_v7 = vld [vmem:[%s11224_s1 + $0xb08] ss:$16 sps:$4 sm:$0xff]  }
 0x128   :  { %5129 = vmatprep.subr.bf16.mxu0 %v7791_v8  ;;  %5662 = vmatprep.subr.bf16.mxu1 %v7794_v9  ;;  %v7881_v8 = vld [vmem:[%s11224_s1 + $0xb24] ss:$16 sps:$4 sm:$0xff]   ;;  %v7884_v9 = vld [vmem:[%s11224_s1 + $0xb2c] ss:$16 sps:$4 sm:$0xff]  }
 0x12b   :  { %5130 = vmatpush1.bf16.msra.mxu0 %v7789_v10  ;;  %5663 = vmatpush1.bf16.msra.mxu1 %v7792_v11  ;;  %v7879_v10 = vld [vmem:[%s11224_s1 + $0xb20] ss:$16 sps:$4 sm:$0xff]   ;;  %v7882_v11 = vld [vmem:[%s11224_s1 + $0xb28] ss:$16 sps:$4 sm:$0xff]  }
 0x12c   :  { %5131 = vmatprep.subr.bf16.mxu0 %v7797_v12  ;;  %5664 = vmatprep.subr.bf16.mxu1 %v7800_v52  ;;  %v7887_v12 = vld [vmem:[%s11224_s1 + $0xb44] ss:$16 sps:$4 sm:$0xff]   ;;  %v7890_v52 = vld [vmem:[%s11224_s1 + $0xb4c] ss:$16 sps:$4 sm:$0xff]  }
 0x12f   :  { %5132 = vmatpush1.bf16.msra.mxu0 %v7795_v15  ;;  %5665 = vmatpush1.bf16.msra.mxu1 %v7798_v16  ;;  %v7885_v15 = vld [vmem:[%s11224_s1 + $0xb40] ss:$16 sps:$4 sm:$0xff]   ;;  %v7888_v16 = vld [vmem:[%s11224_s1 + $0xb48] ss:$16 sps:$4 sm:$0xff]  }
 0x130   :  { %5133 = vmatprep.subr.bf16.mxu0 %v7803_v17  ;;  %5666 = vmatprep.subr.bf16.mxu1 %v7806_v18  ;;  %v7893_v17 = vld [vmem:[%s11224_s1 + $0xb64] ss:$16 sps:$4 sm:$0xff]   ;;  %v7896_v18 = vld [vmem:[%s11224_s1 + $0xb6c] ss:$16 sps:$4 sm:$0xff]  }
 0x133   :  { %5134 = vmatpush1.bf16.msra.mxu0 %v7801_v19  ;;  %5667 = vmatpush1.bf16.msra.mxu1 %v7804_v20  ;;  %v7891_v19 = vld [vmem:[%s11224_s1 + $0xb60] ss:$16 sps:$4 sm:$0xff]   ;;  %v7894_v20 = vld [vmem:[%s11224_s1 + $0xb68] ss:$16 sps:$4 sm:$0xff]  }
 0x134   :  { %5135 = vmatprep.subr.bf16.mxu0 %v7809_v22  ;;  %5668 = vmatprep.subr.bf16.mxu1 %v7812_v23  ;;  %v7899_v22 = vld [vmem:[%s11224_s1 + $0xb84] ss:$16 sps:$4 sm:$0xff]   ;;  %v7902_v23 = vld [vmem:[%s11224_s1 + $0xb8c] ss:$16 sps:$4 sm:$0xff]  }
 0x137   :  { %5136 = vmatpush1.bf16.msra.mxu0 %v7807_v24  ;;  %5669 = vmatpush1.bf16.msra.mxu1 %v7810_v13  ;;  %v7897_v24 = vld [vmem:[%s11224_s1 + $0xb80] ss:$16 sps:$4 sm:$0xff]   ;;  %v7900_v13 = vld [vmem:[%s11224_s1 + $0xb88] ss:$16 sps:$4 sm:$0xff]  }
 0x138   :  { %5137 = vmatprep.subr.bf16.mxu0 %v7815_v27  ;;  %5670 = vmatprep.subr.bf16.mxu1 %v7818_v28  ;;  %v7905_v27 = vld [vmem:[%s11224_s1 + $0xba4] ss:$16 sps:$4 sm:$0xff]   ;;  %v7908_v28 = vld [vmem:[%s11224_s1 + $0xbac] ss:$16 sps:$4 sm:$0xff]  }
 0x13b   :  { %5138 = vmatpush1.bf16.msra.mxu0 %v7813_v29  ;;  %5671 = vmatpush1.bf16.msra.mxu1 %v7816_v14  ;;  %v7903_v29 = vld [vmem:[%s11224_s1 + $0xba0] ss:$16 sps:$4 sm:$0xff]   ;;  %v7906_v14 = vld [vmem:[%s11224_s1 + $0xba8] ss:$16 sps:$4 sm:$0xff]  }
 0x13c   :  { %5139 = vmatprep.subr.bf16.mxu0 %v7821_v30  ;;  %5672 = vmatprep.subr.bf16.mxu1 %v7824_v31  ;;  %v7911_v30 = vld [vmem:[%s11224_s1 + $0xbc4] ss:$16 sps:$4 sm:$0xff]   ;;  %v7914_v31 = vld [vmem:[%s11224_s1 + $0xbcc] ss:$16 sps:$4 sm:$0xff]  }
 0x13f   :  { %5140 = vmatpush1.bf16.msra.mxu0 %v7819_v25  ;;  %5673 = vmatpush1.bf16.msra.mxu1 %v7822_v32  ;;  %v8555_v25 = vld [vmem:[%s11223_s0 + $0x8] sm:$0xff] }
 0x140   :  { %5150 = vmatprep.subr.bf16.mxu0 %v7827_v33  ;;  %5683 = vmatprep.subr.bf16.mxu1 %v7830_v26  ;;  %v885_v32 = vcombine.high %v8555_v25, %v8555_v25  ;;  %v7909_v33 = vld [vmem:[%s11224_s1 + $0xbc0] ss:$16 sps:$4 sm:$0xff]   ;;  %v7912_v26 = vld [vmem:[%s11224_s1 + $0xbc8] ss:$16 sps:$4 sm:$0xff]  }
 0x141   :  { %v7993_v25 = vld [vmem:[%s11224_s1 + $0xd80] ss:$16 sps:$4 sm:$0xff]  }
 0x142   :  { %5142 = vmatmul.mubr.bf16.vlgmr.msra.gmra.mrb[0].mxu0 %v9636_v35  ;;  %5675 = vmatmul.mubr.bf16.vlgmr.msra.gmra.mrb[0].mxu1 %v9636_v35 }
 0x143   :  { %5151 = vmatpush1.bf16.msra.mxu0 %v7825_v36  ;;  %5684 = vmatpush1.bf16.msra.mxu1 %v7828_v37  ;;  %v7917_v36 = vld [vmem:[%s11224_s1 + $0xbe4] ss:$16 sps:$4 sm:$0xff]   ;;  %v7920_v37 = vld [vmem:[%s11224_s1 + $0xbec] ss:$16 sps:$4 sm:$0xff]  }
 0x144   :  { %5152 = vmatprep.subr.bf16.mxu0 %v7833_v38  ;;  %5685 = vmatprep.subr.bf16.mxu1 %v7836_v21  ;;  %v9826_v38 = vrot.slane %v885_v32, %v8749_v49  ;;  %v7915_v21 = vld [vmem:[%s11224_s1 + $0xbe0] ss:$16 sps:$4 sm:$0xff]   ;;  %v7996_v32 = vld [vmem:[%s11224_s1 + $0xd88] ss:$16 sps:$4 sm:$0xff]  }
 0x145   :  { %5182 = vmatprep.mubr.bf16.mxu0 %v932_v39  ;;  %5715 = vmatprep.mubr.bf16.mxu1 %v932_v39  ;;  %v7918_v39 = vld [vmem:[%s11224_s1 + $0xbe8] ss:$16 sps:$4 sm:$0xff]  }
 0x147   :  { %5153 = vmatpush1.bf16.msra.mxu0 %v7831_v40  ;;  %5686 = vmatpush1.bf16.msra.mxu1 %v7834_v41  ;;  %v7923_v40 = vld [vmem:[%s11224_s1 + $0xc04] ss:$16 sps:$4 sm:$0xff]   ;;  %v7926_v41 = vld [vmem:[%s11224_s1 + $0xc0c] ss:$16 sps:$4 sm:$0xff]  }
 0x148   :  { %5154 = vmatprep.subr.bf16.mxu0 %v7839_v34  ;;  %5687 = vmatprep.subr.bf16.mxu1 %v7842_v43  ;;  %v901_v34 = vcombine.high %v9826_v38, %v9826_v38  ;;  %v930_v43 = vcombine.high %v9636_v35, %v9636_v35  ;;  %v7932_v35 = vld [vmem:[%s11224_s1 + $0xc2c] ss:$16 sps:$4 sm:$0xff]  }
 0x14b   :  { %5155 = vmatpush1.bf16.msra.mxu0 %v7837_v44  ;;  %5688 = vmatpush1.bf16.msra.mxu1 %v7840_v45  ;;  %v7921_v44 = vld [vmem:[%s11224_s1 + $0xc00] ss:$16 sps:$4 sm:$0xff]   ;;  %v7924_v45 = vld [vmem:[%s11224_s1 + $0xc08] ss:$16 sps:$4 sm:$0xff]  }
 0x14c   :  { %5156 = vmatprep.subr.bf16.mxu0 %v7845_v46  ;;  %5689 = vmatprep.subr.bf16.mxu1 %v7848_v47  ;;  %v7929_v46 = vld [vmem:[%s11224_s1 + $0xc24] ss:$16 sps:$4 sm:$0xff]   ;;  %v9857_v47 = vrot.slane %v901_v34, %v8749_v49 }
 0x14d   :  { %v8013_v34 = vld [vmem:[%s11224_s1 + $0xde4] ss:$16 sps:$4 sm:$0xff]  }
 0x14f   :  { %5157 = vmatpush1.bf16.msra.mxu0 %v7843_v48  ;;  %5690 = vmatpush1.bf16.msra.mxu1 %v7846_v50  ;;  %v7927_v48 = vld [vmem:[%s11224_s1 + $0xc20] ss:$16 sps:$4 sm:$0xff]   ;;  %v7930_v50 = vld [vmem:[%s11224_s1 + $0xc28] ss:$16 sps:$4 sm:$0xff]  }
 0x150   :  { %5158 = vmatprep.subr.bf16.mxu0 %v7851_v51  ;;  %5691 = vmatprep.subr.bf16.mxu1 %v7854_v53  ;;  %v7935_v51 = vld [vmem:[%s11224_s1 + $0xc44] ss:$16 sps:$4 sm:$0xff]   ;;  %v7938_v53 = vld [vmem:[%s11224_s1 + $0xc4c] ss:$16 sps:$4 sm:$0xff]  }
 0x153   :  { %5159 = vmatpush1.bf16.msra.mxu0 %v7849_v54  ;;  %5692 = vmatpush1.bf16.msra.mxu1 %v7852_v55  ;;  %v7933_v54 = vld [vmem:[%s11224_s1 + $0xc40] ss:$16 sps:$4 sm:$0xff]   ;;  %v7936_v55 = vld [vmem:[%s11224_s1 + $0xc48] ss:$16 sps:$4 sm:$0xff]  }
 0x154   :  { %5160 = vmatprep.subr.bf16.mxu0 %v7857_v56  ;;  %5693 = vmatprep.subr.bf16.mxu1 %v7860_v57  ;;  %v7941_v56 = vld [vmem:[%s11224_s1 + $0xc64] ss:$16 sps:$4 sm:$0xff]   ;;  %v7944_v57 = vld [vmem:[%s11224_s1 + $0xc6c] ss:$16 sps:$4 sm:$0xff]  }
 0x157   :  { %5161 = vmatpush1.bf16.msra.mxu0 %v7855_v58  ;;  %5694 = vmatpush1.bf16.msra.mxu1 %v7858_v59  ;;  %v7939_v58 = vld [vmem:[%s11224_s1 + $0xc60] ss:$16 sps:$4 sm:$0xff]   ;;  %v7942_v59 = vld [vmem:[%s11224_s1 + $0xc68] ss:$16 sps:$4 sm:$0xff]  }
 0x158   :  { %5162 = vmatprep.subr.bf16.mxu0 %v7863_v60  ;;  %5695 = vmatprep.subr.bf16.mxu1 %v7866_v61  ;;  %v7947_v60 = vld [vmem:[%s11224_s1 + $0xc84] ss:$16 sps:$4 sm:$0xff]   ;;  %v7950_v61 = vld [vmem:[%s11224_s1 + $0xc8c] ss:$16 sps:$4 sm:$0xff]  }
 0x15b   :  { %5163 = vmatpush1.bf16.msra.mxu0 %v7861_v62  ;;  %5696 = vmatpush1.bf16.msra.mxu1 %v7864_v63  ;;  %v7945_v62 = vld [vmem:[%s11224_s1 + $0xc80] ss:$16 sps:$4 sm:$0xff]   ;;  %v7948_v63 = vld [vmem:[%s11224_s1 + $0xc88] ss:$16 sps:$4 sm:$0xff]  }
 0x15c   :  { %5164 = vmatprep.subr.bf16.mxu0 %v7869_v0  ;;  %5697 = vmatprep.subr.bf16.mxu1 %v7872_v1  ;;  %v7953_v0 = vld [vmem:[%s11224_s1 + $0xca4] ss:$16 sps:$4 sm:$0xff]   ;;  %v7956_v1 = vld [vmem:[%s11224_s1 + $0xcac] ss:$16 sps:$4 sm:$0xff]  }
 0x15f   :  { %5165 = vmatpush1.bf16.msra.mxu0 %v7867_v2  ;;  %5698 = vmatpush1.bf16.msra.mxu1 %v7870_v3  ;;  %v7951_v2 = vld [vmem:[%s11224_s1 + $0xca0] ss:$16 sps:$4 sm:$0xff]   ;;  %v7954_v3 = vld [vmem:[%s11224_s1 + $0xca8] ss:$16 sps:$4 sm:$0xff]  }
 0x160   :  { %5166 = vmatprep.subr.bf16.mxu0 %v7875_v4  ;;  %5699 = vmatprep.subr.bf16.mxu1 %v7878_v5  ;;  %v7959_v4 = vld [vmem:[%s11224_s1 + $0xcc4] ss:$16 sps:$4 sm:$0xff]   ;;  %v7962_v5 = vld [vmem:[%s11224_s1 + $0xccc] ss:$16 sps:$4 sm:$0xff]  }
 0x163   :  { %5167 = vmatpush1.bf16.msra.mxu0 %v7873_v6  ;;  %5700 = vmatpush1.bf16.msra.mxu1 %v7876_v7  ;;  %v7957_v6 = vld [vmem:[%s11224_s1 + $0xcc0] ss:$16 sps:$4 sm:$0xff]   ;;  %v7960_v7 = vld [vmem:[%s11224_s1 + $0xcc8] ss:$16 sps:$4 sm:$0xff]  }
 0x164   :  { %5168 = vmatprep.subr.bf16.mxu0 %v7881_v8  ;;  %5701 = vmatprep.subr.bf16.mxu1 %v7884_v9  ;;  %v7965_v8 = vld [vmem:[%s11224_s1 + $0xce4] ss:$16 sps:$4 sm:$0xff]   ;;  %v7968_v9 = vld [vmem:[%s11224_s1 + $0xcec] ss:$16 sps:$4 sm:$0xff]  }
 0x167   :  { %5169 = vmatpush1.bf16.msra.mxu0 %v7879_v10  ;;  %5702 = vmatpush1.bf16.msra.mxu1 %v7882_v11  ;;  %v7963_v10 = vld [vmem:[%s11224_s1 + $0xce0] ss:$16 sps:$4 sm:$0xff]   ;;  %v7966_v11 = vld [vmem:[%s11224_s1 + $0xce8] ss:$16 sps:$4 sm:$0xff]  }
 0x168   :  { %5170 = vmatprep.subr.bf16.mxu0 %v7887_v12  ;;  %5703 = vmatprep.subr.bf16.mxu1 %v7890_v52  ;;  %v7971_v12 = vld [vmem:[%s11224_s1 + $0xd04] ss:$16 sps:$4 sm:$0xff]   ;;  %v7974_v52 = vld [vmem:[%s11224_s1 + $0xd0c] ss:$16 sps:$4 sm:$0xff]  }
 0x16b   :  { %5171 = vmatpush1.bf16.msra.mxu0 %v7885_v15  ;;  %5704 = vmatpush1.bf16.msra.mxu1 %v7888_v16  ;;  %v7969_v15 = vld [vmem:[%s11224_s1 + $0xd00] ss:$16 sps:$4 sm:$0xff]   ;;  %v7972_v16 = vld [vmem:[%s11224_s1 + $0xd08] ss:$16 sps:$4 sm:$0xff]  }
 0x16c   :  { %5172 = vmatprep.subr.bf16.mxu0 %v7893_v17  ;;  %5705 = vmatprep.subr.bf16.mxu1 %v7896_v18  ;;  %v7977_v17 = vld [vmem:[%s11224_s1 + $0xd24] ss:$16 sps:$4 sm:$0xff]   ;;  %v7980_v18 = vld [vmem:[%s11224_s1 + $0xd2c] ss:$16 sps:$4 sm:$0xff]  }
 0x16f   :  { %5173 = vmatpush1.bf16.msra.mxu0 %v7891_v19  ;;  %5706 = vmatpush1.bf16.msra.mxu1 %v7894_v20  ;;  %v7975_v19 = vld [vmem:[%s11224_s1 + $0xd20] ss:$16 sps:$4 sm:$0xff]   ;;  %v7978_v20 = vld [vmem:[%s11224_s1 + $0xd28] ss:$16 sps:$4 sm:$0xff]  }
 0x170   :  { %5174 = vmatprep.subr.bf16.mxu0 %v7899_v22  ;;  %5707 = vmatprep.subr.bf16.mxu1 %v7902_v23  ;;  %v7983_v22 = vld [vmem:[%s11224_s1 + $0xd44] ss:$16 sps:$4 sm:$0xff]   ;;  %v7986_v23 = vld [vmem:[%s11224_s1 + $0xd4c] ss:$16 sps:$4 sm:$0xff]  }
 0x173   :  { %5175 = vmatpush1.bf16.msra.mxu0 %v7897_v24  ;;  %5708 = vmatpush1.bf16.msra.mxu1 %v7900_v13  ;;  %v7981_v24 = vld [vmem:[%s11224_s1 + $0xd40] ss:$16 sps:$4 sm:$0xff]   ;;  %v7984_v13 = vld [vmem:[%s11224_s1 + $0xd48] ss:$16 sps:$4 sm:$0xff]  }
 0x174   :  { %5176 = vmatprep.subr.bf16.mxu0 %v7905_v27  ;;  %5709 = vmatprep.subr.bf16.mxu1 %v7908_v28  ;;  %v7989_v27 = vld [vmem:[%s11224_s1 + $0xd64] ss:$16 sps:$4 sm:$0xff]   ;;  %v7992_v28 = vld [vmem:[%s11224_s1 + $0xd6c] ss:$16 sps:$4 sm:$0xff]  }
 0x177   :  { %5177 = vmatpush1.bf16.msra.mxu0 %v7903_v29  ;;  %5710 = vmatpush1.bf16.msra.mxu1 %v7906_v14  ;;  %v7987_v29 = vld [vmem:[%s11224_s1 + $0xd60] ss:$16 sps:$4 sm:$0xff]   ;;  %v7990_v14 = vld [vmem:[%s11224_s1 + $0xd68] ss:$16 sps:$4 sm:$0xff]  }
 0x178   :  { %5178 = vmatprep.subr.bf16.mxu0 %v7911_v30  ;;  %5711 = vmatprep.subr.bf16.mxu1 %v7914_v31  ;;  %v7995_v30 = vld [vmem:[%s11224_s1 + $0xd84] ss:$16 sps:$4 sm:$0xff]   ;;  %v7998_v31 = vld [vmem:[%s11224_s1 + $0xd8c] ss:$16 sps:$4 sm:$0xff]  }
 0x17b   :  { %5179 = vmatpush1.bf16.msra.mxu0 %v7909_v33  ;;  %5712 = vmatpush1.bf16.msra.mxu1 %v7912_v26  ;;  %v8001_v33 = vld [vmem:[%s11224_s1 + $0xda4] ss:$16 sps:$4 sm:$0xff]   ;;  %v8004_v26 = vld [vmem:[%s11224_s1 + $0xdac] ss:$16 sps:$4 sm:$0xff]  }
 0x17c   :  { %5180 = vmatprep.subr.bf16.mxu0 %v7917_v36  ;;  %5713 = vmatprep.subr.bf16.mxu1 %v7920_v37  ;;  %v7999_v36 = vld [vmem:[%s11224_s1 + $0xda0] ss:$16 sps:$4 sm:$0xff]   ;;  %v8002_v37 = vld [vmem:[%s11224_s1 + $0xda8] ss:$16 sps:$4 sm:$0xff]  }
 0x17f   :  { %5181 = vmatpush1.bf16.msra.mxu0 %v7915_v21  ;;  %5714 = vmatpush1.bf16.msra.mxu1 %v7918_v39  ;;  %v8007_v21 = vld [vmem:[%s11224_s1 + $0xdc4] ss:$16 sps:$4 sm:$0xff]   ;;  %v8010_v39 = vld [vmem:[%s11224_s1 + $0xdcc] ss:$16 sps:$4 sm:$0xff]  }
 0x180   :  { %5191 = vmatprep.subr.bf16.mxu0 %v7923_v40  ;;  %5724 = vmatprep.subr.bf16.mxu1 %v7926_v41  ;;  %v8005_v40 = vld [vmem:[%s11224_s1 + $0xdc0] ss:$16 sps:$4 sm:$0xff]   ;;  %v8008_v41 = vld [vmem:[%s11224_s1 + $0xdc8] ss:$16 sps:$4 sm:$0xff]  }
 0x182   :  { %5183 = vmatmul.mubr.bf16.vlgmr.msra.gmra.mrb[0].mxu0 %v930_v43  ;;  %5716 = vmatmul.mubr.bf16.vlgmr.msra.gmra.mrb[0].mxu1 %v930_v43  ;;  %v8016_v43 = vld [vmem:[%s11224_s1 + $0xdec] ss:$16 sps:$4 sm:$0xff]  }
 0x183   :  { %5192 = vmatpush1.bf16.msra.mxu0 %v7921_v44  ;;  %5725 = vmatpush1.bf16.msra.mxu1 %v7924_v45  ;;  %v8011_v44 = vld [vmem:[%s11224_s1 + $0xde0] ss:$16 sps:$4 sm:$0xff]   ;;  %v8014_v45 = vld [vmem:[%s11224_s1 + $0xde8] ss:$16 sps:$4 sm:$0xff]  }
 0x184   :  { %5193 = vmatprep.subr.bf16.mxu0 %v7929_v46  ;;  %5726 = vmatprep.subr.bf16.mxu1 %v7932_v35  ;;  %v8020_v46 = vld [vmem:[%s11224_s1 + $0xe04] ss:$16 sps:$4 sm:$0xff]   ;;  %v8023_v35 = vld [vmem:[%s11224_s1 + $0xe0c] ss:$16 sps:$4 sm:$0xff]  }
 0x185   :  { %5223 = vmatprep.mubr.bf16.mxu0 %v9857_v47  ;;  %5756 = vmatprep.mubr.bf16.mxu1 %v9857_v47 }
 0x187   :  { %5194 = vmatpush1.bf16.msra.mxu0 %v7927_v48  ;;  %5727 = vmatpush1.bf16.msra.mxu1 %v7930_v50  ;;  %v10043_v48 = vrot.slane %v9826_v38, %v8749_v49  ;;  %v8018_v50 = vld [vmem:[%s11224_s1 + $0xe00] ss:$16 sps:$4 sm:$0xff]   ;;  %v8029_v38 = vld [vmem:[%s11224_s1 + $0xe2c] ss:$16 sps:$4 sm:$0xff]  }
 0x188   :  { %5195 = vmatprep.subr.bf16.mxu0 %v7935_v51  ;;  %5728 = vmatprep.subr.bf16.mxu1 %v7938_v53  ;;  %v8021_v51 = vld [vmem:[%s11224_s1 + $0xe08] ss:$16 sps:$4 sm:$0xff]   ;;  %v8026_v53 = vld [vmem:[%s11224_s1 + $0xe24] ss:$16 sps:$4 sm:$0xff]  }
 0x18b   :  { %5196 = vmatpush1.bf16.msra.mxu0 %v7933_v54  ;;  %5729 = vmatpush1.bf16.msra.mxu1 %v7936_v55  ;;  %v933_v54 = vcombine.high %v9857_v47, %v9857_v47  ;;  %v8024_v55 = vld [vmem:[%s11224_s1 + $0xe20] ss:$16 sps:$4 sm:$0xff]   ;;  %v8032_v47 = vld [vmem:[%s11224_s1 + $0xe44] ss:$16 sps:$4 sm:$0xff]  }
 0x18c   :  { %5197 = vmatprep.subr.bf16.mxu0 %v7941_v56  ;;  %5730 = vmatprep.subr.bf16.mxu1 %v7944_v57  ;;  %v8027_v56 = vld [vmem:[%s11224_s1 + $0xe28] ss:$16 sps:$4 sm:$0xff]   ;;  %v8035_v57 = vld [vmem:[%s11224_s1 + $0xe4c] ss:$16 sps:$4 sm:$0xff]  }
 0x18f   :  { %5198 = vmatpush1.bf16.msra.mxu0 %v7939_v58  ;;  %5731 = vmatpush1.bf16.msra.mxu1 %v7942_v59  ;;  %v8030_v58 = vld [vmem:[%s11224_s1 + $0xe40] ss:$16 sps:$4 sm:$0xff]   ;;  %v8033_v59 = vld [vmem:[%s11224_s1 + $0xe48] ss:$16 sps:$4 sm:$0xff]  }
 0x190   :  { %5199 = vmatprep.subr.bf16.mxu0 %v7947_v60  ;;  %5732 = vmatprep.subr.bf16.mxu1 %v7950_v61  ;;  %v8038_v60 = vld [vmem:[%s11224_s1 + $0xe64] ss:$16 sps:$4 sm:$0xff]   ;;  %v8041_v61 = vld [vmem:[%s11224_s1 + $0xe6c] ss:$16 sps:$4 sm:$0xff]  }
 0x193   :  { %5200 = vmatpush1.bf16.msra.mxu0 %v7945_v62  ;;  %5733 = vmatpush1.bf16.msra.mxu1 %v7948_v63  ;;  %v8036_v62 = vld [vmem:[%s11224_s1 + $0xe60] ss:$16 sps:$4 sm:$0xff]   ;;  %v8039_v63 = vld [vmem:[%s11224_s1 + $0xe68] ss:$16 sps:$4 sm:$0xff]  }
 0x194   :  { %5201 = vmatprep.subr.bf16.mxu0 %v7953_v0  ;;  %5734 = vmatprep.subr.bf16.mxu1 %v7956_v1  ;;  %v8044_v0 = vld [vmem:[%s11224_s1 + $0xe84] ss:$16 sps:$4 sm:$0xff]   ;;  %v8047_v1 = vld [vmem:[%s11224_s1 + $0xe8c] ss:$16 sps:$4 sm:$0xff]  }
 0x197   :  { %5202 = vmatpush1.bf16.msra.mxu0 %v7951_v2  ;;  %5735 = vmatpush1.bf16.msra.mxu1 %v7954_v3  ;;  %v8042_v2 = vld [vmem:[%s11224_s1 + $0xe80] ss:$16 sps:$4 sm:$0xff]   ;;  %v8045_v3 = vld [vmem:[%s11224_s1 + $0xe88] ss:$16 sps:$4 sm:$0xff]  }
 0x198   :  { %5203 = vmatprep.subr.bf16.mxu0 %v7959_v4  ;;  %5736 = vmatprep.subr.bf16.mxu1 %v7962_v5  ;;  %v8050_v4 = vld [vmem:[%s11224_s1 + $0xea4] ss:$16 sps:$4 sm:$0xff]   ;;  %v8053_v5 = vld [vmem:[%s11224_s1 + $0xeac] ss:$16 sps:$4 sm:$0xff]  }
 0x19b   :  { %5204 = vmatpush1.bf16.msra.mxu0 %v7957_v6  ;;  %5737 = vmatpush1.bf16.msra.mxu1 %v7960_v7  ;;  %v8048_v6 = vld [vmem:[%s11224_s1 + $0xea0] ss:$16 sps:$4 sm:$0xff]   ;;  %v8051_v7 = vld [vmem:[%s11224_s1 + $0xea8] ss:$16 sps:$4 sm:$0xff]  }
 0x19c   :  { %5205 = vmatprep.subr.bf16.mxu0 %v7965_v8  ;;  %5738 = vmatprep.subr.bf16.mxu1 %v7968_v9  ;;  %v8056_v8 = vld [vmem:[%s11224_s1 + $0xec4] ss:$16 sps:$4 sm:$0xff]   ;;  %v8059_v9 = vld [vmem:[%s11224_s1 + $0xecc] ss:$16 sps:$4 sm:$0xff]  }
 0x19f   :  { %5206 = vmatpush1.bf16.msra.mxu0 %v7963_v10  ;;  %5739 = vmatpush1.bf16.msra.mxu1 %v7966_v11  ;;  %v8054_v10 = vld [vmem:[%s11224_s1 + $0xec0] ss:$16 sps:$4 sm:$0xff]   ;;  %v8057_v11 = vld [vmem:[%s11224_s1 + $0xec8] ss:$16 sps:$4 sm:$0xff]  }
 0x1a0   :  { %5207 = vmatprep.subr.bf16.mxu0 %v7971_v12  ;;  %5740 = vmatprep.subr.bf16.mxu1 %v7974_v52  ;;  %v8062_v12 = vld [vmem:[%s11224_s1 + $0xee4] ss:$16 sps:$4 sm:$0xff]   ;;  %v8065_v52 = vld [vmem:[%s11224_s1 + $0xeec] ss:$16 sps:$4 sm:$0xff]  }
 0x1a3   :  { %5208 = vmatpush1.bf16.msra.mxu0 %v7969_v15  ;;  %5741 = vmatpush1.bf16.msra.mxu1 %v7972_v16  ;;  %v8060_v15 = vld [vmem:[%s11224_s1 + $0xee0] ss:$16 sps:$4 sm:$0xff]   ;;  %v8063_v16 = vld [vmem:[%s11224_s1 + $0xee8] ss:$16 sps:$4 sm:$0xff]  }
 0x1a4   :  { %5209 = vmatprep.subr.bf16.mxu0 %v7977_v17  ;;  %5742 = vmatprep.subr.bf16.mxu1 %v7980_v18  ;;  %v8068_v17 = vld [vmem:[%s11224_s1 + $0xf04] ss:$16 sps:$4 sm:$0xff]   ;;  %v8071_v18 = vld [vmem:[%s11224_s1 + $0xf0c] ss:$16 sps:$4 sm:$0xff]  }
 0x1a7   :  { %5210 = vmatpush1.bf16.msra.mxu0 %v7975_v19  ;;  %5743 = vmatpush1.bf16.msra.mxu1 %v7978_v20  ;;  %v8066_v19 = vld [vmem:[%s11224_s1 + $0xf00] ss:$16 sps:$4 sm:$0xff]   ;;  %v8069_v20 = vld [vmem:[%s11224_s1 + $0xf08] ss:$16 sps:$4 sm:$0xff]  }
 0x1a8   :  { %5211 = vmatprep.subr.bf16.mxu0 %v7983_v22  ;;  %5744 = vmatprep.subr.bf16.mxu1 %v7986_v23  ;;  %v8074_v22 = vld [vmem:[%s11224_s1 + $0xf24] ss:$16 sps:$4 sm:$0xff]   ;;  %v8077_v23 = vld [vmem:[%s11224_s1 + $0xf2c] ss:$16 sps:$4 sm:$0xff]  }
 0x1ab   :  { %5212 = vmatpush1.bf16.msra.mxu0 %v7981_v24  ;;  %5745 = vmatpush1.bf16.msra.mxu1 %v7984_v13  ;;  %v8072_v24 = vld [vmem:[%s11224_s1 + $0xf20] ss:$16 sps:$4 sm:$0xff]   ;;  %v8075_v13 = vld [vmem:[%s11224_s1 + $0xf28] ss:$16 sps:$4 sm:$0xff]  }
 0x1ac   :  { %5213 = vmatprep.subr.bf16.mxu0 %v7989_v27  ;;  %5746 = vmatprep.subr.bf16.mxu1 %v7992_v28  ;;  %v8080_v27 = vld [vmem:[%s11224_s1 + $0xf44] ss:$16 sps:$4 sm:$0xff]   ;;  %v8083_v28 = vld [vmem:[%s11224_s1 + $0xf4c] ss:$16 sps:$4 sm:$0xff]  }
 0x1af   :  { %5214 = vmatpush1.bf16.msra.mxu0 %v7987_v29  ;;  %5747 = vmatpush1.bf16.msra.mxu1 %v7990_v14  ;;  %v8078_v29 = vld [vmem:[%s11224_s1 + $0xf40] ss:$16 sps:$4 sm:$0xff]   ;;  %v8081_v14 = vld [vmem:[%s11224_s1 + $0xf48] ss:$16 sps:$4 sm:$0xff]  }
 0x1b0   :  { %5215 = vmatprep.subr.bf16.mxu0 %v7995_v30  ;;  %5748 = vmatprep.subr.bf16.mxu1 %v7998_v31  ;;  %v8086_v30 = vld [vmem:[%s11224_s1 + $0xf64] ss:$16 sps:$4 sm:$0xff]   ;;  %v8089_v31 = vld [vmem:[%s11224_s1 + $0xf6c] ss:$16 sps:$4 sm:$0xff]  }
 0x1b3   :  { %5216 = vmatpush1.bf16.msra.mxu0 %v7993_v25  ;;  %5749 = vmatpush1.bf16.msra.mxu1 %v7996_v32 }
 0x1b4   :  { %5217 = vmatprep.subr.bf16.mxu0 %v8001_v33  ;;  %5750 = vmatprep.subr.bf16.mxu1 %v8004_v26 }
 0x1b7   :  { %5218 = vmatpush1.bf16.msra.mxu0 %v7999_v36  ;;  %5751 = vmatpush1.bf16.msra.mxu1 %v8002_v37 }
 0x1b8   :  { %5219 = vmatprep.subr.bf16.mxu0 %v8007_v21  ;;  %5752 = vmatprep.subr.bf16.mxu1 %v8010_v39 }
 0x1bb   :  { %5220 = vmatpush1.bf16.msra.mxu0 %v8005_v40  ;;  %5753 = vmatpush1.bf16.msra.mxu1 %v8008_v41 }
 0x1bc   :  { %5221 = vmatprep.subr.bf16.mxu0 %v8013_v34  ;;  %5754 = vmatprep.subr.bf16.mxu1 %v8016_v43 }
 0x1bf   :  { %5222 = vmatpush1.bf16.msra.mxu0 %v8011_v44  ;;  %5755 = vmatpush1.bf16.msra.mxu1 %v8014_v45 }
 0x1c0   :  { %5232 = vmatprep.subr.bf16.mxu0 %v8020_v46  ;;  %5765 = vmatprep.subr.bf16.mxu1 %v8023_v35 }
 0x1c2   :  { %5224 = vmatmul.mubr.bf16.vlgmr.msra.gmra.mrb[0].mxu0 %v10043_v48  ;;  %5757 = vmatmul.mubr.bf16.vlgmr.msra.gmra.mrb[0].mxu1 %v10043_v48 }
 0x1c3   :  { %5233 = vmatpush1.bf16.msra.mxu0 %v8018_v50  ;;  %5766 = vmatpush1.bf16.msra.mxu1 %v8021_v51 }
 0x1c4   :  { %5234 = vmatprep.subr.bf16.mxu0 %v8026_v53  ;;  %5767 = vmatprep.subr.bf16.mxu1 %v8029_v38 }
 0x1c5   :  { %5264 = vmatprep.mubr.bf16.mxu0 %v933_v54  ;;  %5797 = vmatprep.mubr.bf16.mxu1 %v933_v54 }
 0x1c7   :  { %5235 = vmatpush1.bf16.msra.mxu0 %v8024_v55  ;;  %5768 = vmatpush1.bf16.msra.mxu1 %v8027_v56 }
 0x1c8   :  { %5236 = vmatprep.subr.bf16.mxu0 %v8032_v47  ;;  %5769 = vmatprep.subr.bf16.mxu1 %v8035_v57 }
 0x1cb   :  { %5237 = vmatpush1.bf16.msra.mxu0 %v8030_v58  ;;  %5770 = vmatpush1.bf16.msra.mxu1 %v8033_v59 }
 0x1cc   :  { %5238 = vmatprep.subr.bf16.mxu0 %v8038_v60  ;;  %5771 = vmatprep.subr.bf16.mxu1 %v8041_v61 }
 0x1cf   :  { %5239 = vmatpush1.bf16.msra.mxu0 %v8036_v62  ;;  %5772 = vmatpush1.bf16.msra.mxu1 %v8039_v63 }
 0x1d0   :  { %5240 = vmatprep.subr.bf16.mxu0 %v8044_v0  ;;  %5773 = vmatprep.subr.bf16.mxu1 %v8047_v1 }
 0x1d3   :  { %5241 = vmatpush1.bf16.msra.mxu0 %v8042_v2  ;;  %5774 = vmatpush1.bf16.msra.mxu1 %v8045_v3 }
 0x1d4   :  { %5242 = vmatprep.subr.bf16.mxu0 %v8050_v4  ;;  %5775 = vmatprep.subr.bf16.mxu1 %v8053_v5 }
 0x1d7   :  { %5243 = vmatpush1.bf16.msra.mxu0 %v8048_v6  ;;  %5776 = vmatpush1.bf16.msra.mxu1 %v8051_v7 }
 0x1d8   :  { %5244 = vmatprep.subr.bf16.mxu0 %v8056_v8  ;;  %5777 = vmatprep.subr.bf16.mxu1 %v8059_v9 }
 0x1db   :  { %5245 = vmatpush1.bf16.msra.mxu0 %v8054_v10  ;;  %5778 = vmatpush1.bf16.msra.mxu1 %v8057_v11 }
 0x1dc   :  { %5246 = vmatprep.subr.bf16.mxu0 %v8062_v12  ;;  %5779 = vmatprep.subr.bf16.mxu1 %v8065_v52 }
 0x1df   :  { %5247 = vmatpush1.bf16.msra.mxu0 %v8060_v15  ;;  %5780 = vmatpush1.bf16.msra.mxu1 %v8063_v16 }
 0x1e0   :  { %5248 = vmatprep.subr.bf16.mxu0 %v8068_v17  ;;  %5781 = vmatprep.subr.bf16.mxu1 %v8071_v18 }
 0x1e3   :  { %5249 = vmatpush1.bf16.msra.mxu0 %v8066_v19  ;;  %5782 = vmatpush1.bf16.msra.mxu1 %v8069_v20 }
 0x1e4   :  { %5250 = vmatprep.subr.bf16.mxu0 %v8074_v22  ;;  %5783 = vmatprep.subr.bf16.mxu1 %v8077_v23 }
 0x1e7   :  { %5251 = vmatpush1.bf16.msra.mxu0 %v8072_v24  ;;  %5784 = vmatpush1.bf16.msra.mxu1 %v8075_v13 }
 0x1e8   :  { %5252 = vmatprep.subr.bf16.mxu0 %v8080_v27  ;;  %5785 = vmatprep.subr.bf16.mxu1 %v8083_v28 }
 0x1e9   :  { %10 = vsyncpa [#allocation3], 0  ;;  %v8084_v25 = vld [vmem:[%s11224_s1 + $0xf60] ss:$16 sps:$4 sm:$0xff]   ;;  %v8087_v32 = vld [vmem:[%s11224_s1 + $0xf68] ss:$16 sps:$4 sm:$0xff]   ;;  %v931_v47 = vcombine.high %v10043_v48, %v10043_v48 }
 0x1ea   :  { %v8092_v33 = vld [vmem:[%s11224_s1 + $0xf84] ss:$16 sps:$4 sm:$0xff]   ;;  %v8095_v26 = vld [vmem:[%s11224_s1 + $0xf8c] ss:$16 sps:$4 sm:$0xff]   ;;  %v8090_v36 = vld [vmem:[%s11224_s1 + $0xf80] ss:$16 sps:$4 sm:$0xff]  }
 0x1eb   :  { %5253 = vmatpush1.bf16.msra.mxu0 %v8078_v29  ;;  %5786 = vmatpush1.bf16.msra.mxu1 %v8081_v14  ;;  %v8093_v37 = vld [vmem:[%s11224_s1 + $0xf88] ss:$16 sps:$4 sm:$0xff]   ;;  %v8098_v21 = vld [vmem:[%s11224_s1 + $0xfa4] ss:$16 sps:$4 sm:$0xff]   ;;  %v8101_v39 = vld [vmem:[%s11224_s1 + $0xfac] ss:$16 sps:$4 sm:$0xff]  }
 0x1ec   :  { %5254 = vmatprep.subr.bf16.mxu0 %v8086_v30  ;;  %5787 = vmatprep.subr.bf16.mxu1 %v8089_v31  ;;  %v8096_v40 = vld [vmem:[%s11224_s1 + $0xfa0] ss:$16 sps:$4 sm:$0xff]   ;;  %v8099_v41 = vld [vmem:[%s11224_s1 + $0xfa8] ss:$16 sps:$4 sm:$0xff]   ;;  %v8104_v34 = vld [vmem:[%s11224_s1 + $0xfc4] ss:$16 sps:$4 sm:$0xff]  }
 0x1ed   :  { %v8107_v43 = vld [vmem:[%s11224_s1 + $0xfcc] ss:$16 sps:$4 sm:$0xff]   ;;  %v10220_v44 = vld [vmem:[%s11223_s0 + $0x10] sm:$0xff]  ;;  %v8105_v46 = vld [vmem:[%s11224_s1 + $0xfc8] ss:$16 sps:$4 sm:$0xff]   ;;  %vm4941_vm0 = vcmask 523264  }
 0x1ee   :  { %v8102_v45 = vld [vmem:[%s11224_s1 + $0xfc0] ss:$16 sps:$4 sm:$0xff]   ;;  %v8110_v35 = vld [vmem:[%s11224_s1 + $0xfe4] ss:$16 sps:$4 sm:$0xff]   ;;  %v8113_v50 = vld [vmem:[%s11224_s1 + $0xfec] ss:$16 sps:$4 sm:$0xff]   ;;  %v10236_v51 = vrot.slane %v10220_v44, %v8749_v49 }
 0x1ef   :  { %5255 = vmatpush1.bf16.msra.mxu0 %v8084_v25  ;;  %5788 = vmatpush1.bf16.msra.mxu1 %v8087_v32  ;;  %v8108_v53 = vld [vmem:[%s11224_s1 + $0xfe0] ss:$16 sps:$4 sm:$0xff]   ;;  %v8111_v38 = vld [vmem:[%s11224_s1 + $0xfe8] ss:$16 sps:$4 sm:$0xff]   ;;  %v8116_v54 = vld [vmem:[%s11224_s1 + $0x1004] ss:$16 sps:$4 sm:$0xff]  }
 0x1f0   :  { %5256 = vmatprep.subr.bf16.mxu0 %v8092_v33  ;;  %5789 = vmatprep.subr.bf16.mxu1 %v8095_v26  ;;  %v8119_v55 = vld [vmem:[%s11224_s1 + $0x100c] ss:$16 sps:$4 sm:$0xff]   ;;  %v949_v56 = vcombine.high %v10236_v51, %v10236_v51  ;;  %v8114_v57 = vld [vmem:[%s11224_s1 + $0x1000] ss:$16 sps:$4 sm:$0xff]   ;;  %v8117_v58 = vld [vmem:[%s11224_s1 + $0x1008] ss:$16 sps:$4 sm:$0xff]  }
 0x1f1   :  { %v8122_v59 = vld [vmem:[%s11224_s1 + $0x1024] ss:$16 sps:$4 sm:$0xff]   ;;  %v8125_v48 = vld [vmem:[%s11224_s1 + $0x102c] ss:$16 sps:$4 sm:$0xff]   ;;  %v8120_v61 = vld [vmem:[%s11224_s1 + $0x1020] ss:$16 sps:$4 sm:$0xff]  }
 0x1f2   :  { %v10267_v60 = vrot.slane %v949_v56, %v8749_v49  ;;  %v8123_v62 = vld [vmem:[%s11224_s1 + $0x1028] ss:$16 sps:$4 sm:$0xff]   ;;  %v8128_v63 = vld [vmem:[%s11224_s1 + $0x1044] ss:$16 sps:$4 sm:$0xff]   ;;  %v8131_v0 = vld [vmem:[%s11224_s1 + $0x104c] ss:$16 sps:$4 sm:$0xff]  }
 0x1f3   :  { %5257 = vmatpush1.bf16.msra.mxu0 %v8090_v36  ;;  %5790 = vmatpush1.bf16.msra.mxu1 %v8093_v37  ;;  %v8126_v1 = vld [vmem:[%s11224_s1 + $0x1040] ss:$16 sps:$4 sm:$0xff]   ;;  %v8129_v2 = vld [vmem:[%s11224_s1 + $0x1048] ss:$16 sps:$4 sm:$0xff]   ;;  %v8134_v3 = vld [vmem:[%s11224_s1 + $0x1064] ss:$16 sps:$4 sm:$0xff]  }
 0x1f4   :  { %5258 = vmatprep.subr.bf16.mxu0 %v8098_v21  ;;  %5791 = vmatprep.subr.bf16.mxu1 %v8101_v39  ;;  %v8137_v4 = vld [vmem:[%s11224_s1 + $0x106c] ss:$16 sps:$4 sm:$0xff]   ;;  %v8132_v5 = vld [vmem:[%s11224_s1 + $0x1060] ss:$16 sps:$4 sm:$0xff]   ;;  %v8135_v6 = vld [vmem:[%s11224_s1 + $0x1068] ss:$16 sps:$4 sm:$0xff]  }
 0x1f5   :  { %v8140_v7 = vld [vmem:[%s11224_s1 + $0x1084] ss:$16 sps:$4 sm:$0xff]   ;;  %v8143_v8 = vld [vmem:[%s11224_s1 + $0x108c] ss:$16 sps:$4 sm:$0xff]   ;;  %v8138_v9 = vld [vmem:[%s11224_s1 + $0x1080] ss:$16 sps:$4 sm:$0xff]  }
 0x1f6   :  { %v8141_v10 = vld [vmem:[%s11224_s1 + $0x1088] ss:$16 sps:$4 sm:$0xff]   ;;  %v8146_v11 = vld [vmem:[%s11224_s1 + $0x10a4] ss:$16 sps:$4 sm:$0xff]   ;;  %v8149_v12 = vld [vmem:[%s11224_s1 + $0x10ac] ss:$16 sps:$4 sm:$0xff]  }
 0x1f7   :  { %5259 = vmatpush1.bf16.msra.mxu0 %v8096_v40  ;;  %5792 = vmatpush1.bf16.msra.mxu1 %v8099_v41  ;;  %v8144_v52 = vld [vmem:[%s11224_s1 + $0x10a0] ss:$16 sps:$4 sm:$0xff]   ;;  %v8147_v15 = vld [vmem:[%s11224_s1 + $0x10a8] ss:$16 sps:$4 sm:$0xff]   ;;  %v8152_v16 = vld [vmem:[%s11224_s1 + $0x10c4] ss:$16 sps:$4 sm:$0xff]  }
 0x1f8   :  { %5260 = vmatprep.subr.bf16.mxu0 %v8104_v34  ;;  %5793 = vmatprep.subr.bf16.mxu1 %v8107_v43  ;;  %v8155_v17 = vld [vmem:[%s11224_s1 + $0x10cc] ss:$16 sps:$4 sm:$0xff]   ;;  %v8150_v18 = vld [vmem:[%s11224_s1 + $0x10c0] ss:$16 sps:$4 sm:$0xff]   ;;  %v8153_v19 = vld [vmem:[%s11224_s1 + $0x10c8] ss:$16 sps:$4 sm:$0xff]  }
 0x1f9   :  { %v8158_v20 = vld [vmem:[%s11224_s1 + $0x10e4] ss:$16 sps:$4 sm:$0xff]   ;;  %v8161_v22 = vld [vmem:[%s11224_s1 + $0x10ec] ss:$16 sps:$4 sm:$0xff]   ;;  %v8156_v23 = vld [vmem:[%s11224_s1 + $0x10e0] ss:$16 sps:$4 sm:$0xff]  }
 0x1fa   :  { %v8159_v24 = vld [vmem:[%s11224_s1 + $0x10e8] ss:$16 sps:$4 sm:$0xff]   ;;  %v8164_v13 = vld [vmem:[%s11224_s1 + $0x1104] ss:$16 sps:$4 sm:$0xff]   ;;  %v8167_v27 = vld [vmem:[%s11224_s1 + $0x110c] ss:$16 sps:$4 sm:$0xff]  }
 0x1fb   :  { %5261 = vmatpush1.bf16.msra.mxu0 %v8102_v45  ;;  %5794 = vmatpush1.bf16.msra.mxu1 %v8105_v46  ;;  %v8162_v28 = vld [vmem:[%s11224_s1 + $0x1100] ss:$16 sps:$4 sm:$0xff]   ;;  %v8165_v29 = vld [vmem:[%s11224_s1 + $0x1108] ss:$16 sps:$4 sm:$0xff]   ;;  %v8170_v14 = vld [vmem:[%s11224_s1 + $0x1124] ss:$16 sps:$4 sm:$0xff]  }
 0x1fc   :  { %5262 = vmatprep.subr.bf16.mxu0 %v8110_v35  ;;  %5795 = vmatprep.subr.bf16.mxu1 %v8113_v50  ;;  %v8173_v30 = vld [vmem:[%s11224_s1 + $0x112c] ss:$16 sps:$4 sm:$0xff]   ;;  %v8168_v31 = vld [vmem:[%s11224_s1 + $0x1120] ss:$16 sps:$4 sm:$0xff]   ;;  %v8171_v25 = vld [vmem:[%s11224_s1 + $0x1128] ss:$16 sps:$4 sm:$0xff]  }
 0x1fd   :  { %v8176_v32 = vld [vmem:[%s11224_s1 + $0x1144] ss:$16 sps:$4 sm:$0xff]   ;;  %v8179_v33 = vld [vmem:[%s11224_s1 + $0x114c] ss:$16 sps:$4 sm:$0xff]   ;;  %v8174_v26 = vld [vmem:[%s11224_s1 + $0x1140] ss:$16 sps:$4 sm:$0xff]  }
 0x1fe   :  { %v8177_v36 = vld [vmem:[%s11224_s1 + $0x1148] ss:$16 sps:$4 sm:$0xff]   ;;  %v8182_v37 = vld [vmem:[%s11224_s1 + $0x1164] ss:$16 sps:$4 sm:$0xff]   ;;  %v8185_v21 = vld [vmem:[%s11224_s1 + $0x116c] ss:$16 sps:$4 sm:$0xff]  }
 0x1ff   :  { %5263 = vmatpush1.bf16.msra.mxu0 %v8108_v53  ;;  %5796 = vmatpush1.bf16.msra.mxu1 %v8111_v38  ;;  %v8180_v39 = vld [vmem:[%s11224_s1 + $0x1160] ss:$16 sps:$4 sm:$0xff]   ;;  %v8183_v40 = vld [vmem:[%s11224_s1 + $0x1168] ss:$16 sps:$4 sm:$0xff]   ;;  %v8188_v41 = vld [vmem:[%s11224_s1 + $0x1184] ss:$16 sps:$4 sm:$0xff]  }
 0x200   :  { %5273 = vmatprep.subr.bf16.mxu0 %v8116_v54  ;;  %5806 = vmatprep.subr.bf16.mxu1 %v8119_v55  ;;  %v8191_v34 = vld [vmem:[%s11224_s1 + $0x118c] ss:$16 sps:$4 sm:$0xff]   ;;  %v8186_v43 = vld [vmem:[%s11224_s1 + $0x1180] ss:$16 sps:$4 sm:$0xff]   ;;  %v8189_v45 = vld [vmem:[%s11224_s1 + $0x1188] ss:$16 sps:$4 sm:$0xff]  }
 0x201   :  { %v8194_v46 = vld [vmem:[%s11224_s1 + $0x11a4] ss:$16 sps:$4 sm:$0xff]   ;;  %v8197_v35 = vld [vmem:[%s11224_s1 + $0x11ac] ss:$16 sps:$4 sm:$0xff]   ;;  %v8192_v50 = vld [vmem:[%s11224_s1 + $0x11a0] ss:$16 sps:$4 sm:$0xff]  }
 0x202   :  { %5265 = vmatmul.mubr.bf16.vlgmr.msra.gmra.mrb[0].mxu0 %v931_v47  ;;  %5798 = vmatmul.mubr.bf16.vlgmr.msra.gmra.mrb[0].mxu1 %v931_v47  ;;  %v8195_v53 = vld [vmem:[%s11224_s1 + $0x11a8] ss:$16 sps:$4 sm:$0xff]   ;;  %v8200_v38 = vld [vmem:[%s11224_s1 + $0x11c4] ss:$16 sps:$4 sm:$0xff]   ;;  %v8203_v54 = vld [vmem:[%s11224_s1 + $0x11cc] ss:$16 sps:$4 sm:$0xff]  }
 0x203   :  { %5274 = vmatpush1.bf16.msra.mxu0 %v8114_v57  ;;  %5807 = vmatpush1.bf16.msra.mxu1 %v8117_v58  ;;  %v8198_v55 = vld [vmem:[%s11224_s1 + $0x11c0] ss:$16 sps:$4 sm:$0xff]   ;;  %v8201_v56 = vld [vmem:[%s11224_s1 + $0x11c8] ss:$16 sps:$4 sm:$0xff]   ;;  %v8206_v47 = vld [vmem:[%s11224_s1 + $0x11e4] ss:$16 sps:$4 sm:$0xff]  }
 0x204   :  { %5275 = vmatprep.subr.bf16.mxu0 %v8122_v59  ;;  %5808 = vmatprep.subr.bf16.mxu1 %v8125_v48  ;;  %v8209_v57 = vld [vmem:[%s11224_s1 + $0x11ec] ss:$16 sps:$4 sm:$0xff]   ;;  %v8204_v58 = vld [vmem:[%s11224_s1 + $0x11e0] ss:$16 sps:$4 sm:$0xff]   ;;  %v8207_v59 = vld [vmem:[%s11224_s1 + $0x11e8] ss:$16 sps:$4 sm:$0xff]  }
 0x205   :  { %5305 = vmatprep.mubr.bf16.mxu0 %v10267_v60  ;;  %5838 = vmatprep.mubr.bf16.mxu1 %v10267_v60  ;;  %v8212_v48 = vld [vmem:[%s11224_s1 + $0x1204] ss:$16 sps:$4 sm:$0xff]   ;;  %s8583_s6 = smov [#allocation2]  }
 0x206   :  { %s6369_s7 = sshll.u32 %s8583_s6, 4  ;;  %s6370_s7 = int_to_ptr.vmem [resolvable:$true] %s6369_s7 }
 0x207   :  { %5276 = vmatpush1.bf16.msra.mxu0 %v8120_v61  ;;  %5809 = vmatpush1.bf16.msra.mxu1 %v8123_v62  ;;  %v8215_v61 = vld [vmem:[%s11224_s1 + $0x120c] ss:$16 sps:$4 sm:$0xff]   ;;  %v10453_v62 = vrot.slane %v10236_v51, %v8749_v49  ;;  %s8557_s8 = scalar_lea.vmem %s6370_s7, 32  ;;  %p8562_p1 = scmp.lt.s32.totalorder %s6370_s7, %s6370_s7 }
 0x208   :  { %5277 = vmatprep.subr.bf16.mxu0 %v8128_v63  ;;  %5810 = vmatprep.subr.bf16.mxu1 %v8131_v0  ;;  %v8210_v63 = vld [vmem:[%s11224_s1 + $0x1200] ss:$16 sps:$4 sm:$0xff]   ;;  %v8213_v0 = vld [vmem:[%s11224_s1 + $0x1208] ss:$16 sps:$4 sm:$0xff]   ;;  %v8221_v51 = vld [vmem:[%s11224_s1 + $0x122c] ss:$16 sps:$4 sm:$0xff]   ;;  %p8558_p0 = scmp.ne.s32.totalorder %s6370_s7, %s8557_s8  ;;  %p8563_p2 = scmp.lt.s32.totalorder %s8557_s8, %s8557_s8 }
 0x20a   :  { %p8564_p3 = por %p8563_p2, %p8562_p1 }
 0x20b   :  { %5278 = vmatpush1.bf16.msra.mxu0 %v8126_v1  ;;  %5811 = vmatpush1.bf16.msra.mxu1 %v8129_v2  ;;  %v8218_v1 = vld [vmem:[%s11224_s1 + $0x1224] ss:$16 sps:$4 sm:$0xff]   ;;  %v981_v2 = vcombine.high %v10267_v60, %v10267_v60 }
 0x20c   :  { %5279 = vmatprep.subr.bf16.mxu0 %v8134_v3  ;;  %5812 = vmatprep.subr.bf16.mxu1 %v8137_v4  ;;  %v8216_v3 = vld [vmem:[%s11224_s1 + $0x1220] ss:$16 sps:$4 sm:$0xff]   ;;  %v8219_v4 = vld [vmem:[%s11224_s1 + $0x1228] ss:$16 sps:$4 sm:$0xff]   ;;  %v8224_v60 = vld [vmem:[%s11224_s1 + $0x1244] ss:$16 sps:$4 sm:$0xff]   ;;  %p8565_p4 = pnand %p8564_p3, %p8558_p0 }
 0x20f   :  { %5280 = vmatpush1.bf16.msra.mxu0 %v8132_v5  ;;  %5813 = vmatpush1.bf16.msra.mxu1 %v8135_v6  ;;  %v8227_v5 = vld [vmem:[%s11224_s1 + $0x124c] ss:$16 sps:$4 sm:$0xff]   ;;  %v8222_v6 = vld [vmem:[%s11224_s1 + $0x1240] ss:$16 sps:$4 sm:$0xff]  }
 0x210   :  { %5281 = vmatprep.subr.bf16.mxu0 %v8140_v7  ;;  %5814 = vmatprep.subr.bf16.mxu1 %v8143_v8  ;;  %v8225_v7 = vld [vmem:[%s11224_s1 + $0x1248] ss:$16 sps:$4 sm:$0xff]   ;;  %v8230_v8 = vld [vmem:[%s11224_s1 + $0x1264] ss:$16 sps:$4 sm:$0xff]  }
 0x213   :  { %5282 = vmatpush1.bf16.msra.mxu0 %v8138_v9  ;;  %5815 = vmatpush1.bf16.msra.mxu1 %v8141_v10  ;;  %v8233_v9 = vld [vmem:[%s11224_s1 + $0x126c] ss:$16 sps:$4 sm:$0xff]   ;;  %v8228_v10 = vld [vmem:[%s11224_s1 + $0x1260] ss:$16 sps:$4 sm:$0xff]  }
 0x214   :  { %5283 = vmatprep.subr.bf16.mxu0 %v8146_v11  ;;  %5816 = vmatprep.subr.bf16.mxu1 %v8149_v12  ;;  %v8231_v11 = vld [vmem:[%s11224_s1 + $0x1268] ss:$16 sps:$4 sm:$0xff]   ;;  %v8236_v12 = vld [vmem:[%s11224_s1 + $0x1284] ss:$16 sps:$4 sm:$0xff]  }
 0x217   :  { %5284 = vmatpush1.bf16.msra.mxu0 %v8144_v52  ;;  %5817 = vmatpush1.bf16.msra.mxu1 %v8147_v15  ;;  %v8239_v52 = vld [vmem:[%s11224_s1 + $0x128c] ss:$16 sps:$4 sm:$0xff]   ;;  %v8234_v15 = vld [vmem:[%s11224_s1 + $0x1280] ss:$16 sps:$4 sm:$0xff]  }
 0x218   :  { %5285 = vmatprep.subr.bf16.mxu0 %v8152_v16  ;;  %5818 = vmatprep.subr.bf16.mxu1 %v8155_v17  ;;  %v8237_v16 = vld [vmem:[%s11224_s1 + $0x1288] ss:$16 sps:$4 sm:$0xff]   ;;  %v8242_v17 = vld [vmem:[%s11224_s1 + $0x12a4] ss:$16 sps:$4 sm:$0xff]  }
 0x21b   :  { %5286 = vmatpush1.bf16.msra.mxu0 %v8150_v18  ;;  %5819 = vmatpush1.bf16.msra.mxu1 %v8153_v19  ;;  %v8245_v18 = vld [vmem:[%s11224_s1 + $0x12ac] ss:$16 sps:$4 sm:$0xff]   ;;  %v8240_v19 = vld [vmem:[%s11224_s1 + $0x12a0] ss:$16 sps:$4 sm:$0xff]  }
 0x21c   :  { %5287 = vmatprep.subr.bf16.mxu0 %v8158_v20  ;;  %5820 = vmatprep.subr.bf16.mxu1 %v8161_v22  ;;  %v8243_v20 = vld [vmem:[%s11224_s1 + $0x12a8] ss:$16 sps:$4 sm:$0xff]   ;;  %v8248_v22 = vld [vmem:[%s11224_s1 + $0x12c4] ss:$16 sps:$4 sm:$0xff]  }
 0x21f   :  { %5288 = vmatpush1.bf16.msra.mxu0 %v8156_v23  ;;  %5821 = vmatpush1.bf16.msra.mxu1 %v8159_v24  ;;  %v8251_v23 = vld [vmem:[%s11224_s1 + $0x12cc] ss:$16 sps:$4 sm:$0xff]   ;;  %v8246_v24 = vld [vmem:[%s11224_s1 + $0x12c0] ss:$16 sps:$4 sm:$0xff]  }
 0x220   :  { %5289 = vmatprep.subr.bf16.mxu0 %v8164_v13  ;;  %5822 = vmatprep.subr.bf16.mxu1 %v8167_v27  ;;  %v8249_v13 = vld [vmem:[%s11224_s1 + $0x12c8] ss:$16 sps:$4 sm:$0xff]   ;;  %v8254_v27 = vld [vmem:[%s11224_s1 + $0x12e4] ss:$16 sps:$4 sm:$0xff]  }
 0x223   :  { %5290 = vmatpush1.bf16.msra.mxu0 %v8162_v28  ;;  %5823 = vmatpush1.bf16.msra.mxu1 %v8165_v29  ;;  %v8257_v28 = vld [vmem:[%s11224_s1 + $0x12ec] ss:$16 sps:$4 sm:$0xff]   ;;  %v8252_v29 = vld [vmem:[%s11224_s1 + $0x12e0] ss:$16 sps:$4 sm:$0xff]  }
 0x224   :  { %5291 = vmatprep.subr.bf16.mxu0 %v8170_v14  ;;  %5824 = vmatprep.subr.bf16.mxu1 %v8173_v30  ;;  %v8255_v14 = vld [vmem:[%s11224_s1 + $0x12e8] ss:$16 sps:$4 sm:$0xff]   ;;  %v8260_v30 = vld [vmem:[%s11224_s1 + $0x1304] ss:$16 sps:$4 sm:$0xff]  }
 0x227   :  { %5292 = vmatpush1.bf16.msra.mxu0 %v8168_v31  ;;  %5825 = vmatpush1.bf16.msra.mxu1 %v8171_v25  ;;  %v8263_v31 = vld [vmem:[%s11224_s1 + $0x130c] ss:$16 sps:$4 sm:$0xff]   ;;  %v8258_v25 = vld [vmem:[%s11224_s1 + $0x1300] ss:$16 sps:$4 sm:$0xff]  }
 0x228   :  { %5293 = vmatprep.subr.bf16.mxu0 %v8176_v32  ;;  %5826 = vmatprep.subr.bf16.mxu1 %v8179_v33  ;;  %v8261_v32 = vld [vmem:[%s11224_s1 + $0x1308] ss:$16 sps:$4 sm:$0xff]   ;;  %v8266_v33 = vld [vmem:[%s11224_s1 + $0x1324] ss:$16 sps:$4 sm:$0xff]  }
 0x22b   :  { %5294 = vmatpush1.bf16.msra.mxu0 %v8174_v26  ;;  %5827 = vmatpush1.bf16.msra.mxu1 %v8177_v36  ;;  %v8269_v26 = vld [vmem:[%s11224_s1 + $0x132c] ss:$16 sps:$4 sm:$0xff]   ;;  %v8264_v36 = vld [vmem:[%s11224_s1 + $0x1320] ss:$16 sps:$4 sm:$0xff]  }
 0x22c   :  { %5295 = vmatprep.subr.bf16.mxu0 %v8182_v37  ;;  %5828 = vmatprep.subr.bf16.mxu1 %v8185_v21  ;;  %v8267_v37 = vld [vmem:[%s11224_s1 + $0x1328] ss:$16 sps:$4 sm:$0xff]   ;;  %v8272_v21 = vld [vmem:[%s11224_s1 + $0x1344] ss:$16 sps:$4 sm:$0xff]  }
 0x22f   :  { %5296 = vmatpush1.bf16.msra.mxu0 %v8180_v39  ;;  %5829 = vmatpush1.bf16.msra.mxu1 %v8183_v40  ;;  %v8275_v39 = vld [vmem:[%s11224_s1 + $0x134c] ss:$16 sps:$4 sm:$0xff]   ;;  %v8270_v40 = vld [vmem:[%s11224_s1 + $0x1340] ss:$16 sps:$4 sm:$0xff]  }
 0x230   :  { %5297 = vmatprep.subr.bf16.mxu0 %v8188_v41  ;;  %5830 = vmatprep.subr.bf16.mxu1 %v8191_v34  ;;  %v8273_v41 = vld [vmem:[%s11224_s1 + $0x1348] ss:$16 sps:$4 sm:$0xff]   ;;  %v8278_v34 = vld [vmem:[%s11224_s1 + $0x1364] ss:$16 sps:$4 sm:$0xff]  }
 0x233   :  { %5298 = vmatpush1.bf16.msra.mxu0 %v8186_v43  ;;  %5831 = vmatpush1.bf16.msra.mxu1 %v8189_v45  ;;  %v8281_v43 = vld [vmem:[%s11224_s1 + $0x136c] ss:$16 sps:$4 sm:$0xff]   ;;  %v8276_v45 = vld [vmem:[%s11224_s1 + $0x1360] ss:$16 sps:$4 sm:$0xff]  }
 0x234   :  { %5299 = vmatprep.subr.bf16.mxu0 %v8194_v46  ;;  %5832 = vmatprep.subr.bf16.mxu1 %v8197_v35  ;;  %v8279_v46 = vld [vmem:[%s11224_s1 + $0x1368] ss:$16 sps:$4 sm:$0xff]   ;;  %v8284_v35 = vld [vmem:[%s11224_s1 + $0x1384] ss:$16 sps:$4 sm:$0xff]  }
 0x237   :  { %5300 = vmatpush1.bf16.msra.mxu0 %v8192_v50  ;;  %5833 = vmatpush1.bf16.msra.mxu1 %v8195_v53  ;;  %v8287_v50 = vld [vmem:[%s11224_s1 + $0x138c] ss:$16 sps:$4 sm:$0xff]   ;;  %v8282_v53 = vld [vmem:[%s11224_s1 + $0x1380] ss:$16 sps:$4 sm:$0xff]  }
 0x238   :  { %5301 = vmatprep.subr.bf16.mxu0 %v8200_v38  ;;  %5834 = vmatprep.subr.bf16.mxu1 %v8203_v54  ;;  %v8285_v38 = vld [vmem:[%s11224_s1 + $0x1388] ss:$16 sps:$4 sm:$0xff]   ;;  %v8290_v54 = vld [vmem:[%s11224_s1 + $0x13a4] ss:$16 sps:$4 sm:$0xff]  }
 0x23b   :  { %5302 = vmatpush1.bf16.msra.mxu0 %v8198_v55  ;;  %5835 = vmatpush1.bf16.msra.mxu1 %v8201_v56  ;;  %v8293_v55 = vld [vmem:[%s11224_s1 + $0x13ac] ss:$16 sps:$4 sm:$0xff]   ;;  %v8288_v56 = vld [vmem:[%s11224_s1 + $0x13a0] ss:$16 sps:$4 sm:$0xff]  }
 0x23c   :  { %5303 = vmatprep.subr.bf16.mxu0 %v8206_v47  ;;  %5836 = vmatprep.subr.bf16.mxu1 %v8209_v57  ;;  %v8291_v47 = vld [vmem:[%s11224_s1 + $0x13a8] ss:$16 sps:$4 sm:$0xff]   ;;  %v8296_v57 = vld [vmem:[%s11224_s1 + $0x13c4] ss:$16 sps:$4 sm:$0xff]  }
 0x23f   :  { %5304 = vmatpush1.bf16.msra.mxu0 %v8204_v58  ;;  %5837 = vmatpush1.bf16.msra.mxu1 %v8207_v59  ;;  %v8299_v58 = vld [vmem:[%s11224_s1 + $0x13cc] ss:$16 sps:$4 sm:$0xff]   ;;  %v934_v59 = vcombine.high %v10220_v44, %v10220_v44 }
 0x240   :  { %5314 = vmatprep.subr.bf16.mxu0 %v8212_v48  ;;  %5847 = vmatprep.subr.bf16.mxu1 %v8215_v61  ;;  %v8294_v48 = vld [vmem:[%s11224_s1 + $0x13c0] ss:$16 sps:$4 sm:$0xff]   ;;  %v8297_v61 = vld [vmem:[%s11224_s1 + $0x13c8] ss:$16 sps:$4 sm:$0xff]   ;;  %v8305_v44 = vld [vmem:[%s11224_s1 + $0x13ec] ss:$16 sps:$4 sm:$0xff]  }
 0x242   :  { %5306 = vmatmul.mubr.bf16.vlgmr.msra.gmra.mrb[0].mxu0 %v10453_v62  ;;  %5839 = vmatmul.mubr.bf16.vlgmr.msra.gmra.mrb[0].mxu1 %v10453_v62 }
 0x243   :  { %5315 = vmatpush1.bf16.msra.mxu0 %v8210_v63  ;;  %5848 = vmatpush1.bf16.msra.mxu1 %v8213_v0  ;;  %v8302_v63 = vld [vmem:[%s11224_s1 + $0x13e4] ss:$16 sps:$4 sm:$0xff]   ;;  %v10642_v0 = vrot.slane %v934_v59, %v8749_v49  ;;  %v8381_v59 = vld [vmem:[%s11224_s1 + $0x1588] ss:$16 sps:$4 sm:$0xff]  }
 0x244   :  { %5316 = vmatprep.subr.bf16.mxu0 %v8218_v1  ;;  %5849 = vmatprep.subr.bf16.mxu1 %v8221_v51  ;;  %v8300_v1 = vld [vmem:[%s11224_s1 + $0x13e0] ss:$16 sps:$4 sm:$0xff]   ;;  %v8303_v51 = vld [vmem:[%s11224_s1 + $0x13e8] ss:$16 sps:$4 sm:$0xff]  }
 0x245   :  { %5346 = vmatprep.mubr.bf16.mxu0 %v981_v2  ;;  %5879 = vmatprep.mubr.bf16.mxu1 %v981_v2  ;;  %v8308_v2 = vld [vmem:[%s11224_s1 + $0x1404] ss:$16 sps:$4 sm:$0xff]  }
 0x247   :  { %5317 = vmatpush1.bf16.msra.mxu0 %v8216_v3  ;;  %5850 = vmatpush1.bf16.msra.mxu1 %v8219_v4  ;;  %v8311_v3 = vld [vmem:[%s11224_s1 + $0x140c] ss:$16 sps:$4 sm:$0xff]   ;;  %v950_v4 = vcombine.high %v10642_v0, %v10642_v0 }
 0x248   :  { %5318 = vmatprep.subr.bf16.mxu0 %v8224_v60  ;;  %5851 = vmatprep.subr.bf16.mxu1 %v8227_v5  ;;  %v979_v60 = vcombine.high %v10453_v62, %v10453_v62  ;;  %v8306_v5 = vld [vmem:[%s11224_s1 + $0x1400] ss:$16 sps:$4 sm:$0xff]   ;;  %v8317_v62 = vld [vmem:[%s11224_s1 + $0x142c] ss:$16 sps:$4 sm:$0xff]  }
 0x24b   :  { %5319 = vmatpush1.bf16.msra.mxu0 %v8222_v6  ;;  %5852 = vmatpush1.bf16.msra.mxu1 %v8225_v7  ;;  %v8309_v6 = vld [vmem:[%s11224_s1 + $0x1408] ss:$16 sps:$4 sm:$0xff]   ;;  %v8314_v7 = vld [vmem:[%s11224_s1 + $0x1424] ss:$16 sps:$4 sm:$0xff]  }
 0x24c   :  { %5320 = vmatprep.subr.bf16.mxu0 %v8230_v8  ;;  %5853 = vmatprep.subr.bf16.mxu1 %v8233_v9  ;;  %v10673_v8 = vrot.slane %v950_v4, %v8749_v49  ;;  %v8312_v9 = vld [vmem:[%s11224_s1 + $0x1420] ss:$16 sps:$4 sm:$0xff]   ;;  %v8398_v4 = vld [vmem:[%s11224_s1 + $0x15e4] ss:$16 sps:$4 sm:$0xff]  }
 0x24f   :  { %5321 = vmatpush1.bf16.msra.mxu0 %v8228_v10  ;;  %5854 = vmatpush1.bf16.msra.mxu1 %v8231_v11  ;;  %v8315_v10 = vld [vmem:[%s11224_s1 + $0x1428] ss:$16 sps:$4 sm:$0xff]   ;;  %v8320_v11 = vld [vmem:[%s11224_s1 + $0x1444] ss:$16 sps:$4 sm:$0xff]  }
 0x250   :  { %5322 = vmatprep.subr.bf16.mxu0 %v8236_v12  ;;  %5855 = vmatprep.subr.bf16.mxu1 %v8239_v52  ;;  %v8323_v12 = vld [vmem:[%s11224_s1 + $0x144c] ss:$16 sps:$4 sm:$0xff]   ;;  %v8318_v52 = vld [vmem:[%s11224_s1 + $0x1440] ss:$16 sps:$4 sm:$0xff]  }
 0x253   :  { %5323 = vmatpush1.bf16.msra.mxu0 %v8234_v15  ;;  %5856 = vmatpush1.bf16.msra.mxu1 %v8237_v16  ;;  %v8321_v15 = vld [vmem:[%s11224_s1 + $0x1448] ss:$16 sps:$4 sm:$0xff]   ;;  %v8326_v16 = vld [vmem:[%s11224_s1 + $0x1464] ss:$16 sps:$4 sm:$0xff]  }
 0x254   :  { %5324 = vmatprep.subr.bf16.mxu0 %v8242_v17  ;;  %5857 = vmatprep.subr.bf16.mxu1 %v8245_v18  ;;  %v8329_v17 = vld [vmem:[%s11224_s1 + $0x146c] ss:$16 sps:$4 sm:$0xff]   ;;  %v8324_v18 = vld [vmem:[%s11224_s1 + $0x1460] ss:$16 sps:$4 sm:$0xff]  }
 0x257   :  { %5325 = vmatpush1.bf16.msra.mxu0 %v8240_v19  ;;  %5858 = vmatpush1.bf16.msra.mxu1 %v8243_v20  ;;  %v8327_v19 = vld [vmem:[%s11224_s1 + $0x1468] ss:$16 sps:$4 sm:$0xff]   ;;  %v8332_v20 = vld [vmem:[%s11224_s1 + $0x1484] ss:$16 sps:$4 sm:$0xff]  }
 0x258   :  { %5326 = vmatprep.subr.bf16.mxu0 %v8248_v22  ;;  %5859 = vmatprep.subr.bf16.mxu1 %v8251_v23  ;;  %v8335_v22 = vld [vmem:[%s11224_s1 + $0x148c] ss:$16 sps:$4 sm:$0xff]   ;;  %v8330_v23 = vld [vmem:[%s11224_s1 + $0x1480] ss:$16 sps:$4 sm:$0xff]  }
 0x25b   :  { %5327 = vmatpush1.bf16.msra.mxu0 %v8246_v24  ;;  %5860 = vmatpush1.bf16.msra.mxu1 %v8249_v13  ;;  %v8333_v24 = vld [vmem:[%s11224_s1 + $0x1488] ss:$16 sps:$4 sm:$0xff]   ;;  %v8338_v13 = vld [vmem:[%s11224_s1 + $0x14a4] ss:$16 sps:$4 sm:$0xff]  }
 0x25c   :  { %5328 = vmatprep.subr.bf16.mxu0 %v8254_v27  ;;  %5861 = vmatprep.subr.bf16.mxu1 %v8257_v28  ;;  %v8341_v27 = vld [vmem:[%s11224_s1 + $0x14ac] ss:$16 sps:$4 sm:$0xff]   ;;  %v8336_v28 = vld [vmem:[%s11224_s1 + $0x14a0] ss:$16 sps:$4 sm:$0xff]  }
 0x25f   :  { %5329 = vmatpush1.bf16.msra.mxu0 %v8252_v29  ;;  %5862 = vmatpush1.bf16.msra.mxu1 %v8255_v14  ;;  %v8339_v29 = vld [vmem:[%s11224_s1 + $0x14a8] ss:$16 sps:$4 sm:$0xff]   ;;  %v8344_v14 = vld [vmem:[%s11224_s1 + $0x14c4] ss:$16 sps:$4 sm:$0xff]  }
 0x260   :  { %5330 = vmatprep.subr.bf16.mxu0 %v8260_v30  ;;  %5863 = vmatprep.subr.bf16.mxu1 %v8263_v31  ;;  %v8347_v30 = vld [vmem:[%s11224_s1 + $0x14cc] ss:$16 sps:$4 sm:$0xff]   ;;  %v8342_v31 = vld [vmem:[%s11224_s1 + $0x14c0] ss:$16 sps:$4 sm:$0xff]  }
 0x263   :  { %5331 = vmatpush1.bf16.msra.mxu0 %v8258_v25  ;;  %5864 = vmatpush1.bf16.msra.mxu1 %v8261_v32  ;;  %v8345_v25 = vld [vmem:[%s11224_s1 + $0x14c8] ss:$16 sps:$4 sm:$0xff]   ;;  %v8350_v32 = vld [vmem:[%s11224_s1 + $0x14e4] ss:$16 sps:$4 sm:$0xff]  }
 0x264   :  { %5332 = vmatprep.subr.bf16.mxu0 %v8266_v33  ;;  %5865 = vmatprep.subr.bf16.mxu1 %v8269_v26  ;;  %v8353_v33 = vld [vmem:[%s11224_s1 + $0x14ec] ss:$16 sps:$4 sm:$0xff]   ;;  %v8348_v26 = vld [vmem:[%s11224_s1 + $0x14e0] ss:$16 sps:$4 sm:$0xff]  }
 0x267   :  { %5333 = vmatpush1.bf16.msra.mxu0 %v8264_v36  ;;  %5866 = vmatpush1.bf16.msra.mxu1 %v8267_v37  ;;  %v8351_v36 = vld [vmem:[%s11224_s1 + $0x14e8] ss:$16 sps:$4 sm:$0xff]   ;;  %v8356_v37 = vld [vmem:[%s11224_s1 + $0x1504] ss:$16 sps:$4 sm:$0xff]  }
 0x268   :  { %5334 = vmatprep.subr.bf16.mxu0 %v8272_v21  ;;  %5867 = vmatprep.subr.bf16.mxu1 %v8275_v39  ;;  %v8359_v21 = vld [vmem:[%s11224_s1 + $0x150c] ss:$16 sps:$4 sm:$0xff]   ;;  %v8354_v39 = vld [vmem:[%s11224_s1 + $0x1500] ss:$16 sps:$4 sm:$0xff]  }
 0x26b   :  { %5335 = vmatpush1.bf16.msra.mxu0 %v8270_v40  ;;  %5868 = vmatpush1.bf16.msra.mxu1 %v8273_v41  ;;  %v8357_v40 = vld [vmem:[%s11224_s1 + $0x1508] ss:$16 sps:$4 sm:$0xff]   ;;  %v8362_v41 = vld [vmem:[%s11224_s1 + $0x1524] ss:$16 sps:$4 sm:$0xff]  }
 0x26c   :  { %5336 = vmatprep.subr.bf16.mxu0 %v8278_v34  ;;  %5869 = vmatprep.subr.bf16.mxu1 %v8281_v43  ;;  %v8365_v34 = vld [vmem:[%s11224_s1 + $0x152c] ss:$16 sps:$4 sm:$0xff]   ;;  %v8360_v43 = vld [vmem:[%s11224_s1 + $0x1520] ss:$16 sps:$4 sm:$0xff]  }
 0x26f   :  { %5337 = vmatpush1.bf16.msra.mxu0 %v8276_v45  ;;  %5870 = vmatpush1.bf16.msra.mxu1 %v8279_v46  ;;  %v8363_v45 = vld [vmem:[%s11224_s1 + $0x1528] ss:$16 sps:$4 sm:$0xff]   ;;  %v8368_v46 = vld [vmem:[%s11224_s1 + $0x1544] ss:$16 sps:$4 sm:$0xff]  }
 0x270   :  { %5338 = vmatprep.subr.bf16.mxu0 %v8284_v35  ;;  %5871 = vmatprep.subr.bf16.mxu1 %v8287_v50  ;;  %v8371_v35 = vld [vmem:[%s11224_s1 + $0x154c] ss:$16 sps:$4 sm:$0xff]   ;;  %v8366_v50 = vld [vmem:[%s11224_s1 + $0x1540] ss:$16 sps:$4 sm:$0xff]  }
 0x273   :  { %5339 = vmatpush1.bf16.msra.mxu0 %v8282_v53  ;;  %5872 = vmatpush1.bf16.msra.mxu1 %v8285_v38  ;;  %v8369_v53 = vld [vmem:[%s11224_s1 + $0x1548] ss:$16 sps:$4 sm:$0xff]   ;;  %v8374_v38 = vld [vmem:[%s11224_s1 + $0x1564] ss:$16 sps:$4 sm:$0xff]  }
 0x274   :  { %5340 = vmatprep.subr.bf16.mxu0 %v8290_v54  ;;  %5873 = vmatprep.subr.bf16.mxu1 %v8293_v55  ;;  %v8377_v54 = vld [vmem:[%s11224_s1 + $0x156c] ss:$16 sps:$4 sm:$0xff]   ;;  %v8372_v55 = vld [vmem:[%s11224_s1 + $0x1560] ss:$16 sps:$4 sm:$0xff]  }
 0x277   :  { %5341 = vmatpush1.bf16.msra.mxu0 %v8288_v56  ;;  %5874 = vmatpush1.bf16.msra.mxu1 %v8291_v47  ;;  %v8375_v56 = vld [vmem:[%s11224_s1 + $0x1568] ss:$16 sps:$4 sm:$0xff]   ;;  %v8380_v47 = vld [vmem:[%s11224_s1 + $0x1584] ss:$16 sps:$4 sm:$0xff]  }
 0x278   :  { %5342 = vmatprep.subr.bf16.mxu0 %v8296_v57  ;;  %5875 = vmatprep.subr.bf16.mxu1 %v8299_v58  ;;  %v8383_v57 = vld [vmem:[%s11224_s1 + $0x158c] ss:$16 sps:$4 sm:$0xff]   ;;  %v8378_v58 = vld [vmem:[%s11224_s1 + $0x1580] ss:$16 sps:$4 sm:$0xff]  }
 0x27b   :  { %5343 = vmatpush1.bf16.msra.mxu0 %v8294_v48  ;;  %5876 = vmatpush1.bf16.msra.mxu1 %v8297_v61  ;;  %v8386_v48 = vld [vmem:[%s11224_s1 + $0x15a4] ss:$16 sps:$4 sm:$0xff]   ;;  %v8389_v61 = vld [vmem:[%s11224_s1 + $0x15ac] ss:$16 sps:$4 sm:$0xff]  }
 0x27c   :  { %5344 = vmatprep.subr.bf16.mxu0 %v8302_v63  ;;  %5877 = vmatprep.subr.bf16.mxu1 %v8305_v44  ;;  %v8384_v63 = vld [vmem:[%s11224_s1 + $0x15a0] ss:$16 sps:$4 sm:$0xff]   ;;  %v8387_v44 = vld [vmem:[%s11224_s1 + $0x15a8] ss:$16 sps:$4 sm:$0xff]  }
 0x27f   :  { %5345 = vmatpush1.bf16.msra.mxu0 %v8300_v1  ;;  %5878 = vmatpush1.bf16.msra.mxu1 %v8303_v51  ;;  %v8392_v1 = vld [vmem:[%s11224_s1 + $0x15c4] ss:$16 sps:$4 sm:$0xff]   ;;  %v8395_v51 = vld [vmem:[%s11224_s1 + $0x15cc] ss:$16 sps:$4 sm:$0xff]  }
 0x280   :  { %5355 = vmatprep.subr.bf16.mxu0 %v8308_v2  ;;  %5888 = vmatprep.subr.bf16.mxu1 %v8311_v3  ;;  %v8390_v2 = vld [vmem:[%s11224_s1 + $0x15c0] ss:$16 sps:$4 sm:$0xff]   ;;  %v8393_v3 = vld [vmem:[%s11224_s1 + $0x15c8] ss:$16 sps:$4 sm:$0xff]  }
 0x282   :  { %5347 = vmatmul.mubr.bf16.vlgmr.msra.gmra.mrb[0].mxu0 %v979_v60  ;;  %5880 = vmatmul.mubr.bf16.vlgmr.msra.gmra.mrb[0].mxu1 %v979_v60  ;;  %v8401_v60 = vld [vmem:[%s11224_s1 + $0x15ec] ss:$16 sps:$4 sm:$0xff]  }
 0x283   :  { %5356 = vmatpush1.bf16.msra.mxu0 %v8306_v5  ;;  %5889 = vmatpush1.bf16.msra.mxu1 %v8309_v6  ;;  %v8396_v5 = vld [vmem:[%s11224_s1 + $0x15e0] ss:$16 sps:$4 sm:$0xff]   ;;  %v8399_v6 = vld [vmem:[%s11224_s1 + $0x15e8] ss:$16 sps:$4 sm:$0xff]  }
 0x284   :  { %5357 = vmatprep.subr.bf16.mxu0 %v8314_v7  ;;  %5890 = vmatprep.subr.bf16.mxu1 %v8317_v62  ;;  %v8405_v7 = vld [vmem:[%s11224_s1 + $0x1604] ss:$16 sps:$4 sm:$0xff]   ;;  %v8408_v62 = vld [vmem:[%s11224_s1 + $0x160c] ss:$16 sps:$4 sm:$0xff]  }
 0x285   :  { %5387 = vmatprep.mubr.bf16.mxu0 %v10673_v8  ;;  %5920 = vmatprep.mubr.bf16.mxu1 %v10673_v8 }
 0x287   :  { %5358 = vmatpush1.bf16.msra.mxu0 %v8312_v9  ;;  %5891 = vmatpush1.bf16.msra.mxu1 %v8315_v10  ;;  %v10859_v9 = vrot.slane %v10642_v0, %v8749_v49  ;;  %v8403_v10 = vld [vmem:[%s11224_s1 + $0x1600] ss:$16 sps:$4 sm:$0xff]   ;;  %v8414_v0 = vld [vmem:[%s11224_s1 + $0x162c] ss:$16 sps:$4 sm:$0xff]  }
 0x288   :  { %5359 = vmatprep.subr.bf16.mxu0 %v8320_v11  ;;  %5892 = vmatprep.subr.bf16.mxu1 %v8323_v12  ;;  %v8406_v11 = vld [vmem:[%s11224_s1 + $0x1608] ss:$16 sps:$4 sm:$0xff]   ;;  %v8411_v12 = vld [vmem:[%s11224_s1 + $0x1624] ss:$16 sps:$4 sm:$0xff]  }
 0x28b   :  { %5360 = vmatpush1.bf16.msra.mxu0 %v8318_v52  ;;  %5893 = vmatpush1.bf16.msra.mxu1 %v8321_v15  ;;  %v982_v52 = vcombine.high %v10673_v8, %v10673_v8  ;;  %v8409_v15 = vld [vmem:[%s11224_s1 + $0x1620] ss:$16 sps:$4 sm:$0xff]   ;;  %v8417_v8 = vld [vmem:[%s11224_s1 + $0x1644] ss:$16 sps:$4 sm:$0xff]  }
 0x28c   :  { %5361 = vmatprep.subr.bf16.mxu0 %v8326_v16  ;;  %5894 = vmatprep.subr.bf16.mxu1 %v8329_v17  ;;  %v8412_v16 = vld [vmem:[%s11224_s1 + $0x1628] ss:$16 sps:$4 sm:$0xff]   ;;  %v8420_v17 = vld [vmem:[%s11224_s1 + $0x164c] ss:$16 sps:$4 sm:$0xff]  }
 0x28f   :  { %5362 = vmatpush1.bf16.msra.mxu0 %v8324_v18  ;;  %5895 = vmatpush1.bf16.msra.mxu1 %v8327_v19  ;;  %v8415_v18 = vld [vmem:[%s11224_s1 + $0x1640] ss:$16 sps:$4 sm:$0xff]   ;;  %v8418_v19 = vld [vmem:[%s11224_s1 + $0x1648] ss:$16 sps:$4 sm:$0xff]  }
 0x290   :  { %5363 = vmatprep.subr.bf16.mxu0 %v8332_v20  ;;  %5896 = vmatprep.subr.bf16.mxu1 %v8335_v22  ;;  %v8423_v20 = vld [vmem:[%s11224_s1 + $0x1664] ss:$16 sps:$4 sm:$0xff]   ;;  %v8426_v22 = vld [vmem:[%s11224_s1 + $0x166c] ss:$16 sps:$4 sm:$0xff]  }
 0x293   :  { %5364 = vmatpush1.bf16.msra.mxu0 %v8330_v23  ;;  %5897 = vmatpush1.bf16.msra.mxu1 %v8333_v24  ;;  %v8421_v23 = vld [vmem:[%s11224_s1 + $0x1660] ss:$16 sps:$4 sm:$0xff]   ;;  %v8424_v24 = vld [vmem:[%s11224_s1 + $0x1668] ss:$16 sps:$4 sm:$0xff]  }
 0x294   :  { %5365 = vmatprep.subr.bf16.mxu0 %v8338_v13  ;;  %5898 = vmatprep.subr.bf16.mxu1 %v8341_v27  ;;  %v8429_v13 = vld [vmem:[%s11224_s1 + $0x1684] ss:$16 sps:$4 sm:$0xff]   ;;  %v8432_v27 = vld [vmem:[%s11224_s1 + $0x168c] ss:$16 sps:$4 sm:$0xff]  }
 0x297   :  { %5366 = vmatpush1.bf16.msra.mxu0 %v8336_v28  ;;  %5899 = vmatpush1.bf16.msra.mxu1 %v8339_v29  ;;  %v8427_v28 = vld [vmem:[%s11224_s1 + $0x1680] ss:$16 sps:$4 sm:$0xff]   ;;  %v8430_v29 = vld [vmem:[%s11224_s1 + $0x1688] ss:$16 sps:$4 sm:$0xff]  }
 0x298   :  { %5367 = vmatprep.subr.bf16.mxu0 %v8344_v14  ;;  %5900 = vmatprep.subr.bf16.mxu1 %v8347_v30  ;;  %v8435_v14 = vld [vmem:[%s11224_s1 + $0x16a4] ss:$16 sps:$4 sm:$0xff]   ;;  %v8438_v30 = vld [vmem:[%s11224_s1 + $0x16ac] ss:$16 sps:$4 sm:$0xff]  }
 0x29b   :  { %5368 = vmatpush1.bf16.msra.mxu0 %v8342_v31  ;;  %5901 = vmatpush1.bf16.msra.mxu1 %v8345_v25  ;;  %v8433_v31 = vld [vmem:[%s11224_s1 + $0x16a0] ss:$16 sps:$4 sm:$0xff]   ;;  %v8436_v25 = vld [vmem:[%s11224_s1 + $0x16a8] ss:$16 sps:$4 sm:$0xff]  }
 0x29c   :  { %5369 = vmatprep.subr.bf16.mxu0 %v8350_v32  ;;  %5902 = vmatprep.subr.bf16.mxu1 %v8353_v33  ;;  %v8441_v32 = vld [vmem:[%s11224_s1 + $0x16c4] ss:$16 sps:$4 sm:$0xff]   ;;  %v8444_v33 = vld [vmem:[%s11224_s1 + $0x16cc] ss:$16 sps:$4 sm:$0xff]  }
 0x29f   :  { %5370 = vmatpush1.bf16.msra.mxu0 %v8348_v26  ;;  %5903 = vmatpush1.bf16.msra.mxu1 %v8351_v36  ;;  %v8439_v26 = vld [vmem:[%s11224_s1 + $0x16c0] ss:$16 sps:$4 sm:$0xff]   ;;  %v8442_v36 = vld [vmem:[%s11224_s1 + $0x16c8] ss:$16 sps:$4 sm:$0xff]  }
 0x2a0   :  { %5371 = vmatprep.subr.bf16.mxu0 %v8356_v37  ;;  %5904 = vmatprep.subr.bf16.mxu1 %v8359_v21  ;;  %v8447_v37 = vld [vmem:[%s11224_s1 + $0x16e4] ss:$16 sps:$4 sm:$0xff]   ;;  %v8450_v21 = vld [vmem:[%s11224_s1 + $0x16ec] ss:$16 sps:$4 sm:$0xff]  }
 0x2a3   :  { %5372 = vmatpush1.bf16.msra.mxu0 %v8354_v39  ;;  %5905 = vmatpush1.bf16.msra.mxu1 %v8357_v40  ;;  %v8445_v39 = vld [vmem:[%s11224_s1 + $0x16e0] ss:$16 sps:$4 sm:$0xff]   ;;  %v8448_v40 = vld [vmem:[%s11224_s1 + $0x16e8] ss:$16 sps:$4 sm:$0xff]  }
 0x2a4   :  { %5373 = vmatprep.subr.bf16.mxu0 %v8362_v41  ;;  %5906 = vmatprep.subr.bf16.mxu1 %v8365_v34  ;;  %v8453_v41 = vld [vmem:[%s11224_s1 + $0x1704] ss:$16 sps:$4 sm:$0xff]   ;;  %v8456_v34 = vld [vmem:[%s11224_s1 + $0x170c] ss:$16 sps:$4 sm:$0xff]  }
 0x2a7   :  { %5374 = vmatpush1.bf16.msra.mxu0 %v8360_v43  ;;  %5907 = vmatpush1.bf16.msra.mxu1 %v8363_v45  ;;  %v8451_v43 = vld [vmem:[%s11224_s1 + $0x1700] ss:$16 sps:$4 sm:$0xff]   ;;  %v8454_v45 = vld [vmem:[%s11224_s1 + $0x1708] ss:$16 sps:$4 sm:$0xff]  }
 0x2a8   :  { %5375 = vmatprep.subr.bf16.mxu0 %v8368_v46  ;;  %5908 = vmatprep.subr.bf16.mxu1 %v8371_v35  ;;  %v8459_v46 = vld [vmem:[%s11224_s1 + $0x1724] ss:$16 sps:$4 sm:$0xff]   ;;  %v8462_v35 = vld [vmem:[%s11224_s1 + $0x172c] ss:$16 sps:$4 sm:$0xff]  }
 0x2ab   :  { %5376 = vmatpush1.bf16.msra.mxu0 %v8366_v50  ;;  %5909 = vmatpush1.bf16.msra.mxu1 %v8369_v53  ;;  %v8457_v50 = vld [vmem:[%s11224_s1 + $0x1720] ss:$16 sps:$4 sm:$0xff]   ;;  %v8460_v53 = vld [vmem:[%s11224_s1 + $0x1728] ss:$16 sps:$4 sm:$0xff]  }
 0x2ac   :  { %5377 = vmatprep.subr.bf16.mxu0 %v8374_v38  ;;  %5910 = vmatprep.subr.bf16.mxu1 %v8377_v54  ;;  %v8465_v38 = vld [vmem:[%s11224_s1 + $0x1744] ss:$16 sps:$4 sm:$0xff]   ;;  %v8468_v54 = vld [vmem:[%s11224_s1 + $0x174c] ss:$16 sps:$4 sm:$0xff]  }
 0x2af   :  { %5378 = vmatpush1.bf16.msra.mxu0 %v8372_v55  ;;  %5911 = vmatpush1.bf16.msra.mxu1 %v8375_v56  ;;  %v8463_v55 = vld [vmem:[%s11224_s1 + $0x1740] ss:$16 sps:$4 sm:$0xff]   ;;  %v8466_v56 = vld [vmem:[%s11224_s1 + $0x1748] ss:$16 sps:$4 sm:$0xff]  }
 0x2b0   :  { %5379 = vmatprep.subr.bf16.mxu0 %v8380_v47  ;;  %5912 = vmatprep.subr.bf16.mxu1 %v8383_v57  ;;  %v8471_v47 = vld [vmem:[%s11224_s1 + $0x1764] ss:$16 sps:$4 sm:$0xff]   ;;  %v8474_v57 = vld [vmem:[%s11224_s1 + $0x176c] ss:$16 sps:$4 sm:$0xff]  }
 0x2b3   :  { %5380 = vmatpush1.bf16.msra.mxu0 %v8378_v58  ;;  %5913 = vmatpush1.bf16.msra.mxu1 %v8381_v59  ;;  %v8469_v58 = vld [vmem:[%s11224_s1 + $0x1760] ss:$16 sps:$4 sm:$0xff]   ;;  %v8472_v59 = vld [vmem:[%s11224_s1 + $0x1768] ss:$16 sps:$4 sm:$0xff]  }
 0x2b4   :  { %5381 = vmatprep.subr.bf16.mxu0 %v8386_v48  ;;  %5914 = vmatprep.subr.bf16.mxu1 %v8389_v61  ;;  %v8477_v48 = vld [vmem:[%s11224_s1 + $0x1784] ss:$16 sps:$4 sm:$0xff]   ;;  %v8480_v61 = vld [vmem:[%s11224_s1 + $0x178c] ss:$16 sps:$4 sm:$0xff]  }
 0x2b7   :  { %5382 = vmatpush1.bf16.msra.mxu0 %v8384_v63  ;;  %5915 = vmatpush1.bf16.msra.mxu1 %v8387_v44  ;;  %v8475_v63 = vld [vmem:[%s11224_s1 + $0x1780] ss:$16 sps:$4 sm:$0xff]   ;;  %v8478_v44 = vld [vmem:[%s11224_s1 + $0x1788] ss:$16 sps:$4 sm:$0xff]  }
 0x2b8   :  { %5383 = vmatprep.subr.bf16.mxu0 %v8392_v1  ;;  %5916 = vmatprep.subr.bf16.mxu1 %v8395_v51  ;;  %v8483_v1 = vld [vmem:[%s11224_s1 + $0x17a4] ss:$16 sps:$4 sm:$0xff]   ;;  %v8486_v51 = vld [vmem:[%s11224_s1 + $0x17ac] ss:$16 sps:$4 sm:$0xff]  }
 0x2bb   :  { %5384 = vmatpush1.bf16.msra.mxu0 %v8390_v2  ;;  %5917 = vmatpush1.bf16.msra.mxu1 %v8393_v3  ;;  %v8481_v2 = vld [vmem:[%s11224_s1 + $0x17a0] ss:$16 sps:$4 sm:$0xff]   ;;  %v8484_v3 = vld [vmem:[%s11224_s1 + $0x17a8] ss:$16 sps:$4 sm:$0xff]  }
 0x2bc   :  { %5385 = vmatprep.subr.bf16.mxu0 %v8398_v4  ;;  %5918 = vmatprep.subr.bf16.mxu1 %v8401_v60  ;;  %v8489_v4 = vld [vmem:[%s11224_s1 + $0x17c4] ss:$16 sps:$4 sm:$0xff]   ;;  %v8492_v60 = vld [vmem:[%s11224_s1 + $0x17cc] ss:$16 sps:$4 sm:$0xff]  }
 0x2bf   :  { %5386 = vmatpush1.bf16.msra.mxu0 %v8396_v5  ;;  %5919 = vmatpush1.bf16.msra.mxu1 %v8399_v6  ;;  %v8487_v5 = vld [vmem:[%s11224_s1 + $0x17c0] ss:$16 sps:$4 sm:$0xff]   ;;  %v8490_v6 = vld [vmem:[%s11224_s1 + $0x17c8] ss:$16 sps:$4 sm:$0xff]  }
 0x2c0   :  { %5396 = vmatprep.subr.bf16.mxu0 %v8405_v7  ;;  %5929 = vmatprep.subr.bf16.mxu1 %v8408_v62  ;;  %v8495_v7 = vld [vmem:[%s11224_s1 + $0x17e4] ss:$16 sps:$4 sm:$0xff]   ;;  %v8498_v62 = vld [vmem:[%s11224_s1 + $0x17ec] ss:$16 sps:$4 sm:$0xff]  }
 0x2c2   :  { %5388 = vmatmul.mubr.bf16.vlgmr.msra.gmra.mrb[0].mxu0 %v10859_v9  ;;  %5921 = vmatmul.mubr.bf16.vlgmr.msra.gmra.mrb[0].mxu1 %v10859_v9 }
 0x2c3   :  { %5397 = vmatpush1.bf16.msra.mxu0 %v8403_v10  ;;  %5930 = vmatpush1.bf16.msra.mxu1 %v8406_v11  ;;  %v8493_v10 = vld [vmem:[%s11224_s1 + $0x17e0] ss:$16 sps:$4 sm:$0xff]   ;;  %v8496_v11 = vld [vmem:[%s11224_s1 + $0x17e8] ss:$16 sps:$4 sm:$0xff]  }
 0x2c4   :  { %5398 = vmatprep.subr.bf16.mxu0 %v8411_v12  ;;  %5931 = vmatprep.subr.bf16.mxu1 %v8414_v0  ;;  %v8501_v12 = vld [vmem:[%s11224_s1 + $0x1804] ss:$16 sps:$4 sm:$0xff]   ;;  %v8504_v0 = vld [vmem:[%s11224_s1 + $0x180c] ss:$16 sps:$4 sm:$0xff]  }
 0x2c5   :  { %5428 = vmatprep.mubr.bf16.mxu0 %v982_v52  ;;  %5961 = vmatprep.mubr.bf16.mxu1 %v982_v52  ;;  %v980_v52 = vcombine.high %v10859_v9, %v10859_v9  ;;  %v8510_v9 = vld [vmem:[%s11224_s1 + $0x182c] ss:$16 sps:$4 sm:$0xff]  }
 0x2c7   :  { %5399 = vmatpush1.bf16.msra.mxu0 %v8409_v15  ;;  %5932 = vmatpush1.bf16.msra.mxu1 %v8412_v16  ;;  %v8499_v15 = vld [vmem:[%s11224_s1 + $0x1800] ss:$16 sps:$4 sm:$0xff]   ;;  %v8502_v16 = vld [vmem:[%s11224_s1 + $0x1808] ss:$16 sps:$4 sm:$0xff]  }
 0x2c8   :  { %5400 = vmatprep.subr.bf16.mxu0 %v8417_v8  ;;  %5933 = vmatprep.subr.bf16.mxu1 %v8420_v17  ;;  %v8507_v8 = vld [vmem:[%s11224_s1 + $0x1824] ss:$16 sps:$4 sm:$0xff]   ;;  %v8505_v17 = vld [vmem:[%s11224_s1 + $0x1820] ss:$16 sps:$4 sm:$0xff]  }
 0x2cb   :  { %5401 = vmatpush1.bf16.msra.mxu0 %v8415_v18  ;;  %5934 = vmatpush1.bf16.msra.mxu1 %v8418_v19  ;;  %v8508_v18 = vld [vmem:[%s11224_s1 + $0x1828] ss:$16 sps:$4 sm:$0xff]   ;;  %v8513_v19 = vld [vmem:[%s11224_s1 + $0x1844] ss:$16 sps:$4 sm:$0xff]  }
 0x2cc   :  { %5402 = vmatprep.subr.bf16.mxu0 %v8423_v20  ;;  %5935 = vmatprep.subr.bf16.mxu1 %v8426_v22  ;;  %v8516_v20 = vld [vmem:[%s11224_s1 + $0x184c] ss:$16 sps:$4 sm:$0xff]   ;;  %v8582_v22 = vmov 0  }
 0x2cf   :  { %5403 = vmatpush1.bf16.msra.mxu0 %v8421_v23  ;;  %5936 = vmatpush1.bf16.msra.mxu1 %v8424_v24  ;;  %v8511_v23 = vld [vmem:[%s11224_s1 + $0x1840] ss:$16 sps:$4 sm:$0xff]   ;;  %v8514_v24 = vld [vmem:[%s11224_s1 + $0x1848] ss:$16 sps:$4 sm:$0xff]  }
 0x2d0   :  { %5404 = vmatprep.subr.bf16.mxu0 %v8429_v13  ;;  %5937 = vmatprep.subr.bf16.mxu1 %v8432_v27  ;;  %v8519_v13 = vld [vmem:[%s11224_s1 + $0x1864] ss:$16 sps:$4 sm:$0xff]   ;;  %v8522_v27 = vld [vmem:[%s11224_s1 + $0x186c] ss:$16 sps:$4 sm:$0xff]  }
 0x2d3   :  { %5405 = vmatpush1.bf16.msra.mxu0 %v8427_v28  ;;  %5938 = vmatpush1.bf16.msra.mxu1 %v8430_v29  ;;  %v8517_v28 = vld [vmem:[%s11224_s1 + $0x1860] ss:$16 sps:$4 sm:$0xff]   ;;  %v8520_v29 = vld [vmem:[%s11224_s1 + $0x1868] ss:$16 sps:$4 sm:$0xff]  }
 0x2d4   :  { %5406 = vmatprep.subr.bf16.mxu0 %v8435_v14  ;;  %5939 = vmatprep.subr.bf16.mxu1 %v8438_v30  ;;  %v6377_v14 = vld.sshfl [vmem:[%s11223_s0 + $0x18] sm:$0x1 pattern:$0x75316420]  ;;  %v8523_v30 = vld [vmem:[%s11226_s3 + $0x40] sm:$0xff]  }
 0x2d7   :  { %5407 = vmatpush1.bf16.msra.mxu0 %v8433_v31  ;;  %5940 = vmatpush1.bf16.msra.mxu1 %v8436_v25  ;;  %v8524_v31 = vld [vmem:[%s11226_s3 + $0xc0] sm:$0xff]   ;;  %v996_v25 = vrot.slane %v6377_v14, %v8749_v49  ;;  %v8528_v49 = vld [vmem:[%s11226_s3 + $0xc8] sm:$0xff]  }
 0x2d8   :  { %5408 = vmatprep.subr.bf16.mxu0 %v8441_v32  ;;  %5941 = vmatprep.subr.bf16.mxu1 %v8444_v33  ;;  %v8525_v32 = vld [vmem:[%s11226_s3] sm:$0xff]  }
 0x2d9   :  { %v8526_v33 = vld [vmem:[%s11226_s3 + $0x80] sm:$0xff]  }
 0x2db   :  { %5409 = vmatpush1.bf16.msra.mxu0 %v8439_v26  ;;  %5942 = vmatpush1.bf16.msra.mxu1 %v8442_v36  ;;  %v8527_v26 = vld [vmem:[%s11226_s3 + $0x48] sm:$0xff]  }
 0x2dc   :  { %5410 = vmatprep.subr.bf16.mxu0 %v8447_v37  ;;  %5943 = vmatprep.subr.bf16.mxu1 %v8450_v21  ;;  %v8529_v36 = vld [vmem:[%s11226_s3 + $0x8] sm:$0xff]   ;;  %v8531_v21 = vld [vmem:[%s11226_s3 + $0x50] sm:$0xff]  }
 0x2dd   :  { %v8530_v37 = vld [vmem:[%s11226_s3 + $0x88] sm:$0xff]  }
 0x2df   :  { %5411 = vmatpush1.bf16.msra.mxu0 %v8445_v39  ;;  %5944 = vmatpush1.bf16.msra.mxu1 %v8448_v40  ;;  %v8532_v39 = vld [vmem:[%s11226_s3 + $0xd0] sm:$0xff]  }
 0x2e0   :  { %5412 = vmatprep.subr.bf16.mxu0 %v8453_v41  ;;  %5945 = vmatprep.subr.bf16.mxu1 %v8456_v34  ;;  %v8533_v40 = vld [vmem:[%s11226_s3 + $0x10] sm:$0xff]   ;;  %v8535_v34 = vld [vmem:[%s11226_s3 + $0x58] sm:$0xff]  }
 0x2e1   :  { %v8534_v41 = vld [vmem:[%s11226_s3 + $0x90] sm:$0xff]  }
 0x2e3   :  { %5413 = vmatpush1.bf16.msra.mxu0 %v8451_v43  ;;  %5946 = vmatpush1.bf16.msra.mxu1 %v8454_v45  ;;  %v8536_v43 = vld [vmem:[%s11226_s3 + $0xd8] sm:$0xff]  }
 0x2e4   :  { %5414 = vmatprep.subr.bf16.mxu0 %v8459_v46  ;;  %5947 = vmatprep.subr.bf16.mxu1 %v8462_v35  ;;  %v8537_v45 = vld [vmem:[%s11226_s3 + $0x18] sm:$0xff]   ;;  %v8539_v35 = vld [vmem:[%s11226_s3 + $0x60] sm:$0xff]  }
 0x2e5   :  { %v8538_v46 = vld [vmem:[%s11226_s3 + $0x98] sm:$0xff]  }
 0x2e7   :  { %5415 = vmatpush1.bf16.msra.mxu0 %v8457_v50  ;;  %5948 = vmatpush1.bf16.msra.mxu1 %v8460_v53  ;;  %v8540_v50 = vld [vmem:[%s11226_s3 + $0xe0] sm:$0xff]  }
 0x2e8   :  { %5416 = vmatprep.subr.bf16.mxu0 %v8465_v38  ;;  %5949 = vmatprep.subr.bf16.mxu1 %v8468_v54  ;;  %v8541_v53 = vld [vmem:[%s11226_s3 + $0x20] sm:$0xff]   ;;  %v8543_v54 = vld [vmem:[%s11226_s3 + $0x68] sm:$0xff]  }
 0x2e9   :  { %v8542_v38 = vld [vmem:[%s11226_s3 + $0xa0] sm:$0xff]  }
 0x2eb   :  { %5417 = vmatpush1.bf16.msra.mxu0 %v8463_v55  ;;  %5950 = vmatpush1.bf16.msra.mxu1 %v8466_v56  ;;  %v8544_v55 = vld [vmem:[%s11226_s3 + $0xe8] sm:$0xff]  }
 0x2ec   :  { %5418 = vmatprep.subr.bf16.mxu0 %v8471_v47  ;;  %5951 = vmatprep.subr.bf16.mxu1 %v8474_v57  ;;  %v8545_v56 = vld [vmem:[%s11226_s3 + $0x28] sm:$0xff]   ;;  %v8547_v57 = vld [vmem:[%s11226_s3 + $0x70] sm:$0xff]  }
 0x2ed   :  { %v8546_v47 = vld [vmem:[%s11226_s3 + $0xa8] sm:$0xff]  }
 0x2ef   :  { %5419 = vmatpush1.bf16.msra.mxu0 %v8469_v58  ;;  %5952 = vmatpush1.bf16.msra.mxu1 %v8472_v59  ;;  %v8548_v58 = vld [vmem:[%s11226_s3 + $0xf0] sm:$0xff]  }
 0x2f0   :  { %5420 = vmatprep.subr.bf16.mxu0 %v8477_v48  ;;  %5953 = vmatprep.subr.bf16.mxu1 %v8480_v61  ;;  %v8549_v59 = vld [vmem:[%s11226_s3 + $0x30] sm:$0xff]   ;;  %v8551_v61 = vld [vmem:[%s11226_s3 + $0x78] sm:$0xff]  }
 0x2f1   :  { %v8550_v48 = vld [vmem:[%s11226_s3 + $0xb0] sm:$0xff]  }
 0x2f3   :  { %5421 = vmatpush1.bf16.msra.mxu0 %v8475_v63  ;;  %5954 = vmatpush1.bf16.msra.mxu1 %v8478_v44  ;;  %v8552_v63 = vld [vmem:[%s11226_s3 + $0xf8] sm:$0xff]  }
 0x2f4   :  { %5422 = vmatprep.subr.bf16.mxu0 %v8483_v1  ;;  %5955 = vmatprep.subr.bf16.mxu1 %v8486_v51  ;;  %v8553_v44 = vld [vmem:[%s11226_s3 + $0x38] sm:$0xff]   ;;  %v814_v51 = vsub.s32 0, %v8731_v42 }
 0x2f5   :  { %v8554_v1 = vld [vmem:[%s11226_s3 + $0xb8] sm:$0xff]  }
 0x2f7   :  { %5423 = vmatpush1.bf16.msra.mxu0 %v8481_v2  ;;  %5956 = vmatpush1.bf16.msra.mxu1 %v8484_v3  ;;  %v822_v2 = vsub.s32 2, %v8731_v42  ;;  %v810_v3 = vld [vmem:[%s11225_s2] sm:$0xf] }
 0x2f8   :  { %5424 = vmatprep.subr.bf16.mxu0 %v8489_v4  ;;  %5957 = vmatprep.subr.bf16.mxu1 %v8492_v60  ;;  %v818_v4 = vsub.s32 1, %v8731_v42  ;;  %v826_v60 = vsub.s32 3, %v8731_v42 }
 0x2fb   :  { %5425 = vmatpush1.bf16.msra.mxu0 %v8487_v5  ;;  %5958 = vmatpush1.bf16.msra.mxu1 %v8490_v6  ;;  %v815_v5 = vrot.slane %v810_v3, %v814_v51  ;;  %v823_v6 = vrot.slane %v810_v3, %v822_v2 }
 0x2fc   :  { %5426 = vmatprep.subr.bf16.mxu0 %v8495_v7  ;;  %5959 = vmatprep.subr.bf16.mxu1 %v8498_v62  ;;  %v819_v7 = vrot.slane %v810_v3, %v818_v4  ;;  %v827_v62 = vrot.slane %v810_v3, %v826_v60 }
 0x2ff   :  { %5427 = vmatpush1.bf16.msra.mxu0 %v8493_v10  ;;  %5960 = vmatpush1.bf16.msra.mxu1 %v8496_v11 }
 0x300   :  { %5437 = vmatprep.subr.bf16.mxu0 %v8501_v12  ;;  %5970 = vmatprep.subr.bf16.mxu1 %v8504_v0 }
 0x302   :  { %5429 = vmatmul.mubr.bf16.vlgmr.msra.gmra.mrb[0].mxu0 %v980_v52  ;;  %5962 = vmatmul.mubr.bf16.vlgmr.msra.gmra.mrb[0].mxu1 %v980_v52 }
 0x303   :  { %5438 = vmatpush1.bf16.msra.mxu0 %v8499_v15  ;;  %5971 = vmatpush1.bf16.msra.mxu1 %v8502_v16 }
 0x304   :  { %5439 = vmatprep.subr.bf16.mxu0 %v8507_v8  ;;  %5972 = vmatprep.subr.bf16.mxu1 %v8510_v9 }
 0x305   :  { %5469 = vmatprep.mubr.bf16.mxu0 %v8582_v22  ;;  %6002 = vmatprep.mubr.bf16.mxu1 %v8582_v22 }
 0x307   :  { %5440 = vmatpush1.bf16.msra.mxu0 %v8505_v17  ;;  %5973 = vmatpush1.bf16.msra.mxu1 %v8508_v18 }
 0x308   :  { %5441 = vmatprep.subr.bf16.mxu0 %v8513_v19  ;;  %5974 = vmatprep.subr.bf16.mxu1 %v8516_v20 }
 0x30b   :  { %5442 = vmatpush1.bf16.msra.mxu0 %v8511_v23  ;;  %5975 = vmatpush1.bf16.msra.mxu1 %v8514_v24 }
 0x30c   :  { %5443 = vmatprep.subr.bf16.mxu0 %v8519_v13  ;;  %5976 = vmatprep.subr.bf16.mxu1 %v8522_v27 }
 0x30f   :  { %5444 = vmatpush1.bf16.msra.mxu0 %v8517_v28  ;;  %5977 = vmatpush1.bf16.msra.mxu1 %v8520_v29 }
 0x310   :  { %7197 = vmatprep.subr.bf16.mxu0 %v8523_v30  ;;  %7219 = vmatprep.subr.bf16.mxu1 %v8524_v31  ;;  %v7164_v30 = vld [vmem:[%s11227_s4] ss:$0 sm:$0xff] }
 0x312   :  { %7162 = vmatmul.mubr.msk.bf16.vlgmr.msra.gmra.mrb[0].mxu0 %vm4941_vm0, %v996_v25  ;;  %7163 = vmatmul.mubr.msk.bf16.vlgmr.msra.gmra.mrb[0].mxu1 %vm4941_vm0, %v996_v25 }
 0x313   :  { %7198 = vmatpush3.bf16.msra.mxu0 %v8525_v32  ;;  %7220 = vmatpush3.bf16.msra.mxu1 %v8526_v33 }
 0x314   :  { %7199 = vmatprep.subr.bf16.mxu0 %v8527_v26  ;;  %7221 = vmatprep.subr.bf16.mxu1 %v8528_v49 }
 0x317   :  { %7200 = vmatpush3.bf16.msra.mxu0 %v8529_v36  ;;  %7222 = vmatpush3.bf16.msra.mxu1 %v8530_v37 }
 0x318   :  { %7201 = vmatprep.subr.bf16.mxu0 %v8531_v21  ;;  %7223 = vmatprep.subr.bf16.mxu1 %v8532_v39 }
 0x31b   :  { %7202 = vmatpush3.bf16.msra.mxu0 %v8533_v40  ;;  %7224 = vmatpush3.bf16.msra.mxu1 %v8534_v41 }
 0x31c   :  { %7203 = vmatprep.subr.bf16.mxu0 %v8535_v34  ;;  %7225 = vmatprep.subr.bf16.mxu1 %v8536_v43 }
 0x31f   :  { %7204 = vmatpush3.bf16.msra.mxu0 %v8537_v45  ;;  %7226 = vmatpush3.bf16.msra.mxu1 %v8538_v46 }
 0x320   :  { %7205 = vmatprep.subr.bf16.mxu0 %v8539_v35  ;;  %7227 = vmatprep.subr.bf16.mxu1 %v8540_v50 }
 0x323   :  { %7206 = vmatpush3.bf16.msra.mxu0 %v8541_v53  ;;  %7228 = vmatpush3.bf16.msra.mxu1 %v8542_v38 }
 0x324   :  { %7207 = vmatprep.subr.bf16.mxu0 %v8543_v54  ;;  %7229 = vmatprep.subr.bf16.mxu1 %v8544_v55 }
 0x327   :  { %7208 = vmatpush3.bf16.msra.mxu0 %v8545_v56  ;;  %7230 = vmatpush3.bf16.msra.mxu1 %v8546_v47 }
 0x328   :  { %7209 = vmatprep.subr.bf16.mxu0 %v8547_v57  ;;  %7231 = vmatprep.subr.bf16.mxu1 %v8548_v58 }
 0x32b   :  { %7210 = vmatpush3.bf16.msra.mxu0 %v8549_v59  ;;  %7232 = vmatpush3.bf16.msra.mxu1 %v8550_v48 }
 0x32c   :  { %7211 = vmatprep.subr.bf16.mxu0 %v8551_v61  ;;  %7233 = vmatprep.subr.bf16.mxu1 %v8552_v63 }
 0x32f   :  { %7212 = vmatpush3.bf16.msra.mxu0 %v8553_v44  ;;  %7234 = vmatpush3.bf16.msra.mxu1 %v8554_v1 }
 0x3e5   :  { %v5471_v10 = vpop.f32.mrb[0].mxu0  ;;  %v6004_v11 = vpop.f32.mrb[0].mxu1 }
 0x3e6   :  { %v7241_v12 = vadd.f32 %v5471_v10, %v815_v5  ;;  %v7243_v0 = vadd.f32 %v6004_v11, %v823_v6  ;;  %v5473_v52 = vpop.f32.mrb[1].mxu0  ;;  %v6006_v15 = vpop.f32.mrb[1].mxu1 }
 0x3e7   :  { %v7242_v16 = vadd.f32 %v5473_v52, %v819_v7  ;;  %v7244_v8 = vadd.f32 %v6006_v15, %v827_v62  ;;  %v5475_v9 = vpop.f32.mrb[2].mxu0  ;;  %v6008_v17 = vpop.f32.mrb[2].mxu1 }
 0x3e8   :  { %v6011_v18 = vmax.f32 %v7241_v12, 0.0  ;;  %v6013_v19 = vmax.f32 %v7243_v0, 0.0  ;;  %v5476_v20 = vpop.f32.mrb[3].mxu0  ;;  %v6009_v22 = vpop.f32.mrb[3].mxu1 }
 0x3e9   :  { %v6012_v23 = vmax.f32 %v7242_v16, 0.0  ;;  %v6014_v42 = vmax.f32 %v7244_v8, 0.0 }
 0x3ea   :  { %v6015_v27 = vpack.c.bf16 %v6011_v18, %v6011_v18  ;;  %v6017_v28 = vpack.c.bf16 %v6013_v19, %v6013_v19 }
 0x3eb   :  { %v6016_v24 = vpack.c.bf16 %v6012_v23, %v6012_v23  ;;  %v6018_v13 = vpack.c.bf16 %v6014_v42, %v6014_v42 }
 0x3ed   :  { %6314 = vmatprep.mubr.bf16.mxu0 %v6016_v24  ;;  %6354 = vmatprep.mubr.bf16.mxu1 %v6018_v13 }
 0x3ee   :  { %6315 = vmatmul.mubr.bf16.vlgmr.msra.gmra.mrb[4].mxu0 %v6015_v27  ;;  %6355 = vmatmul.mubr.bf16.vlgmr.msra.gmra.mrb[4].mxu1 %v6017_v28 }
 0x4c1   :  { %v7213_v29 = vpop.f32.mrb[4].mxu0  ;;  %v7235_v14 = vpop.f32.mrb[4].mxu1 }
 0x4c2   :  { %v7214_v31 = vpop.f32.mrb[5].mxu0  ;;  %v7236_v25 = vpop.f32.mrb[5].mxu1 }
 0x4c3   :  { %v7215_v32 = vadd.f32 %v7214_v31, %v7213_v29  ;;  %v7237_v33 = vadd.f32 %v7236_v25, %v7235_v14  ;;  %v7216_v26 = vpop.f32.mrb[6].mxu0  ;;  %v7238_v49 = vpop.f32.mrb[6].mxu1 }
 0x4c4   :  { %v7217_v36 = vpop.f32.mrb[7].mxu0  ;;  %v7239_v37 = vpop.f32.mrb[7].mxu1 }
 0x4c5   :  { %v6317_v21 = vadd.f32 %v7215_v32, %v7164_v30 }
 0x4c7   :  { %v6357_v39 = vadd.f32 %v7237_v33, %v6317_v21 }
 0x4c9   :  { %6362 = vst [vmem:[#allocation2] sm:$0x3] %v6357_v39 }
 0x4ca   :  { %8568 = shalt.err (!%p8565_p4)
}
 0x4cb   :  { %s8569_s10 = scalar_lea.hbm %s11228_s5, 32 }
 0x4cc   :  { %p8570_p5 = scmp.ne.s32.totalorder %s11228_s5, %s8569_s10  ;;  %p8573_p6 = scmp.lt.u32.totalorder %s8569_s10, %s11228_s5 }
 0x4ce   :  { %p8575_p7 = pnand %p8573_p6, %p8570_p5 }
 0x4d0   :  { %8578 = shalt.err (!%p8575_p7)
}
 0x4d1   :  { %6372 = dma.vmem_to_hbm [thread:$0]  %s6370_s7, 32, %s11228_s5, [#allocation3]  }
 0x4d2   :  { %8579 = dma.done.wait [#allocation3], 32  }
 0x4d3   :  { %8580 = vsyncadd [#allocation3], 4294967264 }
 0x4d4   :  { %6376 = vsyncpa [#allocation3], 1 }

</bundles_post_ra>
